<compile_context>
chip_gen: v6e
topology: v6e:2x2x1
jax: 0.10.0
libtpu: 0.0.40
codegen_flags: <defaults>
</compile_context>

<pallas_src>
import functools

import jax
import jax.numpy as jnp
from jax.experimental import pallas as pl
from jax.experimental.pallas import tpu as pltpu

LN_EPS = 1e-5  # nn.LayerNorm default


def _layernorm(y, gamma, beta):
    mu = jnp.mean(y, axis=-1, keepdims=True)
    var = jnp.mean((y - mu) ** 2, axis=-1, keepdims=True)
    return (y - mu) * jax.lax.rsqrt(var + LN_EPS) * gamma + beta


def cross_attention_kernel(
    x_ref, qt_ref,
    wq_ref, bq_ref, gq_ref, betaq_ref,
    wkv_ref, bkv_ref, gk_ref, betak_ref, gv_ref, betav_ref,
    wp_ref, bp_ref,
    o_ref,
    *, num_heads, head_dim, batch_block, m_queries, n_keys, scale, reshape_heads,
):
    H, D = num_heads, head_dim
    C = H * D
    Bb, M, N = batch_block, m_queries, n_keys
    cdt = x_ref.dtype                       # MXU operand dtype (bf16 by default)

    x = x_ref[...]                          # (Bb*N, C)
    qt = qt_ref[...]                        # (Bb*M, C)

    # ---- projections (Q, fused K|V) + LayerNorm; accumulate & normalize in f32 ----
    q = _layernorm(
        jnp.dot(qt, wq_ref[...], preferred_element_type=jnp.float32) + bq_ref[...],
        gq_ref[...], betaq_ref[...])                                    # (Bb*M, C) f32
    kv = jnp.dot(x, wkv_ref[...], preferred_element_type=jnp.float32) + bkv_ref[...]
    k = _layernorm(kv[:, :C], gk_ref[...], betak_ref[...])              # (Bb*N, C) f32
    v = _layernorm(kv[:, C:], gv_ref[...], betav_ref[...])              # (Bb*N, C) f32

    # ---- split heads: (Bb*rows, C) -> (Bb*H, rows, D), group dim = (batch, head) ----
    if reshape_heads:
        def split(t, rows):                  # one reshape + one transpose (review fix)
            t = t.reshape(Bb, rows, H, D)
            t = jnp.transpose(t, (0, 2, 1, 3))        # (Bb, H, rows, D)
            return t.reshape(Bb * H, rows, D)
    else:
        def split(t, rows):                  # conservative fallback lowering path
            parts = [t[b * rows:(b + 1) * rows, h * D:(h + 1) * D]
                     for b in range(Bb) for h in range(H)]
            return jnp.stack(parts, axis=0)

    qh = split((q * scale).astype(cdt), M)   # fold softmax scale into the small q tile
    kh = split(k.astype(cdt), N)
    vh = split(v.astype(cdt), N)

    # ---- attention: batched einsums over the (Bb*H) group dim (no bias, no Bb^2 work) ----
    s = jnp.einsum("gmd,gnd->gmn", qh, kh,
                   preferred_element_type=jnp.float32)                  # (Bb*H, M, N)
    s = s - jnp.max(s, axis=-1, keepdims=True)
    p = jnp.exp(s)
    denom = jnp.sum(p, axis=-1, keepdims=True)
    ctx = jnp.einsum("gmn,gnd->gmd", p.astype(cdt), vh,
                     preferred_element_type=jnp.float32)                # (Bb*H, M, D)
    # Normalize after PV: D-wide multiply instead of N-wide; reciprocal rides the EUP slot.
    ctx = ctx * pl.reciprocal(denom, approx=True)

    # ---- merge heads back to (Bb*M, C) and do ONE C-deep output projection ----
    if reshape_heads:
        ctx = ctx.reshape(Bb, H, M, D)
        ctx = jnp.transpose(ctx, (0, 2, 1, 3)).reshape(Bb * M, C)
    else:
        per_b = [jnp.concatenate([ctx[b * H + h] for h in range(H)], axis=-1)
                 for b in range(Bb)]
        ctx = per_b[0] if Bb == 1 else jnp.concatenate(per_b, axis=0)

    out = jnp.dot(ctx.astype(cdt), wp_ref[...],
                  preferred_element_type=jnp.float32) + bp_ref[...]     # (Bb*M, C)
    o_ref[...] = out.astype(o_ref.dtype)


def _physical_vmem_bytes():
    """Generation-aware VMEM capacity; conservative fallback = v7x per-TC (64 MiB)."""
    try:
        cap = getattr(pltpu.get_tpu_info(), "vmem_capacity_bytes", None)
        if cap:
            return int(cap)
    except Exception:
        pass
    return 64 << 20


def _act_bytes(Bb, M, N, C, H, cd_bytes):
    """Rough per-grid-step activation footprint (post-review: scores scale with Bb, not Bb^2)."""
    f32 = 4
    rq, rk = Bb * M, Bb * N
    return (2 * (2 * rq + rk) * C * cd_bytes        # double-buffered x / qt / out tiles
            + f32 * (rq * C + 4 * rk * C)           # q, kv(2C), k, v (f32)
            + cd_bytes * (rq + 2 * rk) * C          # qh / kh / vh (compute dtype)
            + f32 * 2 * Bb * H * M * N              # scores + probs (per-batch)
            + f32 * 3 * rq * C)                     # ctx, merged ctx, out


def _pick_batch_block(B, M, N, C, H, cd_bytes, row_target=256):
    """Largest divisor of B that fills MXU rows and fits the (generation-aware) VMEM budget,
    while keeping the grid >= 2 steps when possible (v7x has 2 TensorCores)."""
    phys = _physical_vmem_bytes()
    act_budget = min(12 << 20, phys // 6)
    legal = [d for d in range(1, B + 1)
             if B % d == 0 and (d == B or (d * M % 8 == 0 and d * N % 8 == 0))]
    good = [d for d in legal
            if d * M <= row_target and _act_bytes(d, M, N, C, H, cd_bytes) <= act_budget]

    def best(cands):
        pref = [d for d in cands if (d * M) % 256 == 0]   # fill 256-wide MXU rows (v6e/v7x)
        return max(pref) if pref else max(cands)

    multi = [d for d in good if B // d >= 2]
    if multi:
        return best(multi)
    if good:
        return best(good)
    legal_multi = [d for d in legal if B // d >= 2]
    if legal_multi:
        return min(legal_multi)
    return min(legal)   # d == B is always legal (full-array blocks)


def _vmem_limit_bytes(Bb, M, N, C, H, cd_bytes):
    phys = _physical_vmem_bytes()
    weights = cd_bytes * 4 * C * C + 4 * 10 * C     # single-buffered wq/wkv/wp + f32 row vectors
    est = weights + _act_bytes(Bb, M, N, C, H, cd_bytes)
    return int(min(max(2 * est, 32 << 20), phys * 7 // 8))


def cross_attention(input_tokens, query_tokens, params, *, num_heads,
                    batch_block=None, compute_dtype=jnp.bfloat16):
    """input_tokens: (B, N, C); query_tokens: (B, M, C). Returns (B, M, C).

    compute_dtype controls the MXU operand dtype (mixed-precision contract:
    bf16 operands, f32 accumulation / LayerNorm / softmax). Pass jnp.float32
    (or None to follow the input dtype) for full-precision matmuls.
    """
    B, N, C = input_tokens.shape
    Bq, M, Cq = query_tokens.shape
    assert B == Bq and C == Cq and C % num_heads == 0
    H = num_heads
    D = C // H
    scale = D ** (-0.5)

    (wq, bq, gq, betaq,
     wk, bk, gk, betak,
     wv, bv, gv, betav,
     wp, bp) = params

    cdt = jnp.dtype(compute_dtype) if compute_dtype is not None else jnp.dtype(input_tokens.dtype)
    cd_bytes = cdt.itemsize

    # Host-side prep (plain XLA, outside the kernel): fuse K|V projection, cast MXU operands.
    wkv = jnp.concatenate([wk, wv], axis=1).astype(cdt)   # (C, 2C)
    bkv = jnp.concatenate([bk, bv], axis=1)               # (1, 2C), added in f32
    wq_c = wq.astype(cdt)
    wp_c = wp.astype(cdt)

    Bb = batch_block if batch_block is not None else _pick_batch_block(B, M, N, C, H, cd_bytes)
    assert B % Bb == 0
    grid = (B // Bb,)

    # Flatten batch into rows: lane-dense 2-D tiles; projections see Bb*M / Bb*N MXU rows.
    x2 = input_tokens.reshape(B * N, C).astype(cdt)
    q2 = query_tokens.reshape(B * M, C).astype(cdt)

    vmem_limit = _vmem_limit_bytes(Bb, M, N, C, H, cd_bytes)

    def build_and_run(reshape_heads, single_buffer_invariants):
        kernel = functools.partial(
            cross_attention_kernel, num_heads=H, head_dim=D, batch_block=Bb,
            m_queries=M, n_keys=N, scale=scale, reshape_heads=reshape_heads)

        def inv(shape):
            # Grid-invariant blocks never change block index -> single-buffer them.
            if single_buffer_invariants and hasattr(pl, "Buffered"):
                try:
                    return pl.BlockSpec(shape, lambda b: (0, 0),
                                        pipeline_mode=pl.Buffered(1))
                except TypeError:
                    pass
            return pl.BlockSpec(shape, lambda b: (0, 0))

        return pl.pallas_call(
            kernel,
            out_shape=jax.ShapeDtypeStruct((B * M, C), query_tokens.dtype),
            grid_spec=pltpu.PrefetchScalarGridSpec(
                num_scalar_prefetch=0,
                grid=grid,
                in_specs=[
                    pl.BlockSpec((Bb * N, C), lambda b: (b, 0)),      # input_tokens rows
                    pl.BlockSpec((Bb * M, C), lambda b: (b, 0)),      # query_tokens rows
                    inv((C, C)), inv((1, C)), inv((1, C)), inv((1, C)),   # q proj + LN
                    inv((C, 2 * C)), inv((1, 2 * C)),                     # fused k|v proj
                    inv((1, C)), inv((1, C)), inv((1, C)), inv((1, C)),   # k LN, v LN
                    inv((C, C)), inv((1, C)),                             # out proj
                ],
                out_specs=pl.BlockSpec((Bb * M, C), lambda b: (b, 0)),
            ),
            compiler_params=pltpu.CompilerParams(
                dimension_semantics=("parallel",),
                vmem_limit_bytes=vmem_limit),
        )(x2, q2,
          wq_c, bq, gq, betaq,
          wkv, bkv, gk, betak, gv, betav,
          wp_c, bp)

    # Preference ladder: optimized path first, progressively more conservative lowering.
    attempts = ((True, True), (True, False), (False, True), (False, False))
    err = None
    out2 = None
    for reshape_heads, single_buffer in attempts:
        try:
            out2 = build_and_run(reshape_heads, single_buffer)
            break
        except Exception as e:   # fall back to a more conservative lowering path
            err = e
    if out2 is None:
        raise err

    return out2.reshape(B, M, C)


def init_params(key, embed_dim):
    """Deterministic synthetic parameters. Linear weights stored as (C_in, C_out)."""
    C = embed_dim
    keys = jax.random.split(key, 8)
    std = 0.02

    def linear(kw, kb):
        w = std * jax.random.normal(kw, (C, C), jnp.float32)
        b = std * jax.random.normal(kb, (1, C), jnp.float32)
        return w, b

    wq, bq = linear(keys[0], keys[1])
    wk, bk = linear(keys[2], keys[3])
    wv, bv = linear(keys[4], keys[5])
    wp, bp = linear(keys[6], keys[7])
    ones = jnp.ones((1, C), jnp.float32)     # LayerNorm gamma (PyTorch default)
    zeros = jnp.zeros((1, C), jnp.float32)   # LayerNorm beta
    return (wq, bq, ones, zeros,
            wk, bk, ones, zeros,
            wv, bv, ones, zeros,
            wp, bp)


def reference(input_tokens, query_tokens, params, *, num_heads):
    """Pure-JAX f32 reference mirroring the PyTorch forward."""
    B, N, C = input_tokens.shape
    _, M, _ = query_tokens.shape
    D = C // num_heads
    scale = D ** (-0.5)
    (wq, bq, gq, betaq, wk, bk, gk, betak, wv, bv, gv, betav, wp, bp) = params

    def ln(y, g, b):
        mu = jnp.mean(y, -1, keepdims=True)
        var = jnp.mean((y - mu) ** 2, -1, keepdims=True)
        return (y - mu) / jnp.sqrt(var + LN_EPS) * g + b

    q = ln(query_tokens @ wq + bq, gq, betaq).reshape(B, M, num_heads, D).transpose(0, 2, 1, 3)
    k = ln(input_tokens @ wk + bk, gk, betak).reshape(B, N, num_heads, D).transpose(0, 2, 1, 3)
    v = ln(input_tokens @ wv + bv, gv, betav).reshape(B, N, num_heads, D).transpose(0, 2, 1, 3)
    s = jnp.einsum("bhmd,bhnd->bhmn", q, k) * scale
    p = jax.nn.softmax(s, axis=-1)
    o = jnp.einsum("bhmn,bhnd->bhmd", p, v).transpose(0, 2, 1, 3).reshape(B, M, C)
    return o @ wp + bp


if __name__ == "__main__":
    B, N, M, C = 2, 16, 8, 32
    num_heads = 4

    key = jax.random.PRNGKey(0)
    k_in, k_q, k_par = jax.random.split(key, 3)
    input_tokens = jax.random.normal(k_in, (B, N, C), jnp.float32)
    query_tokens = jax.random.normal(k_q, (B, M, C), jnp.float32)
    params = init_params(k_par, C)

    ref = reference(input_tokens, query_tokens, params, num_heads=num_heads)

    # Full-precision compute path: only op-ordering / approx-reciprocal divergence.
    out_f32 = cross_attention(input_tokens, query_tokens, params,
                              num_heads=num_heads, compute_dtype=jnp.float32)
    out_f32 = jax.block_until_ready(out_f32)
    assert out_f32.shape == (B, M, C)
    err_f32 = float(jnp.max(jnp.abs(out_f32 - ref)))
    assert jnp.allclose(out_f32, ref, atol=2e-3, rtol=2e-3), err_f32

    # Default mixed-precision path (bf16 MXU operands, f32 accumulation/LN/softmax).
    out_bf16 = cross_attention(input_tokens, query_tokens, params, num_heads=num_heads)
    out_bf16 = jax.block_until_ready(out_bf16)
    assert out_bf16.shape == (B, M, C)
    err_bf16 = float(jnp.max(jnp.abs(out_bf16 - ref)))
    assert jnp.allclose(out_bf16, ref, atol=2.5e-2, rtol=2.5e-2), err_bf16

    print("KERNEL_OK")
</pallas_src>

<mosaic_0001>
module attributes {stable_mosaic.version = 11 : i64} {
  func.func @cross_attention_kernel(%arg0: i32, %arg1: memref<16x32xf32, #tpu.memory_space<vmem>>, %arg2: memref<8x32xf32, #tpu.memory_space<vmem>>, %arg3: memref<32x32xf32, #tpu.memory_space<vmem>>, %arg4: memref<1x32xf32, #tpu.memory_space<vmem>>, %arg5: memref<1x32xf32, #tpu.memory_space<vmem>>, %arg6: memref<1x32xf32, #tpu.memory_space<vmem>>, %arg7: memref<32x64xf32, #tpu.memory_space<vmem>>, %arg8: memref<1x64xf32, #tpu.memory_space<vmem>>, %arg9: memref<1x32xf32, #tpu.memory_space<vmem>>, %arg10: memref<1x32xf32, #tpu.memory_space<vmem>>, %arg11: memref<1x32xf32, #tpu.memory_space<vmem>>, %arg12: memref<1x32xf32, #tpu.memory_space<vmem>>, %arg13: memref<32x32xf32, #tpu.memory_space<vmem>>, %arg14: memref<1x32xf32, #tpu.memory_space<vmem>>, %arg15: memref<8x32xf32, #tpu.memory_space<vmem>>) attributes {dimension_semantics = [#tpu.dimension_semantics<parallel>], iteration_bounds = array<i64: 2>, scalar_prefetch = 0 : i64, scratch_operands = 0 : i64, tpu.core_type = #tpu.core_type<tc>, window_params = [{transform_indices = @transform_0, window_bounds = array<i64: 16, 32>}, {transform_indices = @transform_1, window_bounds = array<i64: 8, 32>}, {pipeline_mode = #tpu.pipeline_mode<synchronous>, transform_indices = @transform_2, window_bounds = array<i64: 32, 32>}, {pipeline_mode = #tpu.pipeline_mode<synchronous>, transform_indices = @transform_3, window_bounds = array<i64: 1, 32>}, {pipeline_mode = #tpu.pipeline_mode<synchronous>, transform_indices = @transform_4, window_bounds = array<i64: 1, 32>}, {pipeline_mode = #tpu.pipeline_mode<synchronous>, transform_indices = @transform_5, window_bounds = array<i64: 1, 32>}, {pipeline_mode = #tpu.pipeline_mode<synchronous>, transform_indices = @transform_6, window_bounds = array<i64: 32, 64>}, {pipeline_mode = #tpu.pipeline_mode<synchronous>, transform_indices = @transform_7, window_bounds = array<i64: 1, 64>}, {pipeline_mode = #tpu.pipeline_mode<synchronous>, transform_indices = @transform_8, window_bounds = array<i64: 1, 32>}, {pipeline_mode = #tpu.pipeline_mode<synchronous>, transform_indices = @transform_9, window_bounds = array<i64: 1, 32>}, {pipeline_mode = #tpu.pipeline_mode<synchronous>, transform_indices = @transform_10, window_bounds = array<i64: 1, 32>}, {pipeline_mode = #tpu.pipeline_mode<synchronous>, transform_indices = @transform_11, window_bounds = array<i64: 1, 32>}, {pipeline_mode = #tpu.pipeline_mode<synchronous>, transform_indices = @transform_12, window_bounds = array<i64: 32, 32>}, {pipeline_mode = #tpu.pipeline_mode<synchronous>, transform_indices = @transform_13, window_bounds = array<i64: 1, 32>}, {transform_indices = @transform_14, window_bounds = array<i64: 8, 32>}]} {
    %c0 = arith.constant 0 : index
    %c0_0 = arith.constant 0 : index
    %0 = vector.load %arg1[%c0, %c0_0] : memref<16x32xf32, #tpu.memory_space<vmem>>, vector<16x32xf32>
    %c0_1 = arith.constant 0 : index
    %c0_2 = arith.constant 0 : index
    %1 = vector.load %arg2[%c0_1, %c0_2] : memref<8x32xf32, #tpu.memory_space<vmem>>, vector<8x32xf32>
    %c0_3 = arith.constant 0 : index
    %c0_4 = arith.constant 0 : index
    %2 = vector.load %arg3[%c0_3, %c0_4] : memref<32x32xf32, #tpu.memory_space<vmem>>, vector<32x32xf32>
    %cst = arith.constant dense<0.000000e+00> : vector<8x32xf32>
    %3 = tpu.matmul %1, %2, %cst {dimension_numbers = #tpu.dot_dimension_numbers<[1], [0], [0], [1], [0, 0, 1, 1], [], []>} : vector<8x32xf32>, vector<32x32xf32>, vector<8x32xf32> -> vector<8x32xf32>
    %c0_5 = arith.constant 0 : index
    %c0_6 = arith.constant 0 : index
    %4 = vector.load %arg4[%c0_5, %c0_6] : memref<1x32xf32, #tpu.memory_space<vmem>>, vector<1x32xf32>
    %5 = vector.broadcast %4 : vector<1x32xf32> to vector<8x32xf32>
    %6 = arith.addf %3, %5 : vector<8x32xf32>
    %c0_7 = arith.constant 0 : index
    %c0_8 = arith.constant 0 : index
    %7 = vector.load %arg5[%c0_7, %c0_8] : memref<1x32xf32, #tpu.memory_space<vmem>>, vector<1x32xf32>
    %c0_9 = arith.constant 0 : index
    %c0_10 = arith.constant 0 : index
    %8 = vector.load %arg6[%c0_9, %c0_10] : memref<1x32xf32, #tpu.memory_space<vmem>>, vector<1x32xf32>
    %cst_11 = arith.constant dense<0.000000e+00> : vector<8xf32>
    %9 = vector.multi_reduction <add>, %6, %cst_11 [1] : vector<8x32xf32> to vector<8xf32>
    %10 = vector.shape_cast %9 : vector<8xf32> to vector<8x1xf32>
    %cst_12 = arith.constant 3.200000e+01 : f32
    %11 = vector.broadcast %cst_12 : f32 to vector<8x1xf32>
    %12 = arith.divf %10, %11 : vector<8x1xf32>
    %13 = vector.broadcast %12 : vector<8x1xf32> to vector<8x32xf32>
    %14 = arith.subf %6, %13 : vector<8x32xf32>
    %15 = arith.mulf %14, %14 : vector<8x32xf32>
    %cst_13 = arith.constant dense<0.000000e+00> : vector<8xf32>
    %16 = vector.multi_reduction <add>, %15, %cst_13 [1] : vector<8x32xf32> to vector<8xf32>
    %17 = vector.shape_cast %16 : vector<8xf32> to vector<8x1xf32>
    %cst_14 = arith.constant 3.200000e+01 : f32
    %18 = vector.broadcast %cst_14 : f32 to vector<8x1xf32>
    %19 = arith.divf %17, %18 : vector<8x1xf32>
    %20 = vector.broadcast %12 : vector<8x1xf32> to vector<8x32xf32>
    %21 = arith.subf %6, %20 : vector<8x32xf32>
    %cst_15 = arith.constant 9.99999974E-6 : f32
    %22 = vector.broadcast %cst_15 : f32 to vector<8x1xf32>
    %23 = arith.addf %19, %22 : vector<8x1xf32>
    %24 = math.rsqrt %23 : vector<8x1xf32>
    %25 = vector.broadcast %24 : vector<8x1xf32> to vector<8x32xf32>
    %26 = arith.mulf %21, %25 : vector<8x32xf32>
    %27 = vector.broadcast %7 : vector<1x32xf32> to vector<8x32xf32>
    %28 = arith.mulf %26, %27 : vector<8x32xf32>
    %29 = vector.broadcast %8 : vector<1x32xf32> to vector<8x32xf32>
    %30 = arith.addf %28, %29 : vector<8x32xf32>
    %c0_16 = arith.constant 0 : index
    %c0_17 = arith.constant 0 : index
    %31 = vector.load %arg7[%c0_16, %c0_17] : memref<32x64xf32, #tpu.memory_space<vmem>>, vector<32x64xf32>
    %cst_18 = arith.constant dense<0.000000e+00> : vector<16x64xf32>
    %32 = tpu.matmul %0, %31, %cst_18 {dimension_numbers = #tpu.dot_dimension_numbers<[1], [0], [0], [1], [0, 0, 1, 1], [], []>} : vector<16x32xf32>, vector<32x64xf32>, vector<16x64xf32> -> vector<16x64xf32>
    %c0_19 = arith.constant 0 : index
    %c0_20 = arith.constant 0 : index
    %33 = vector.load %arg8[%c0_19, %c0_20] : memref<1x64xf32, #tpu.memory_space<vmem>>, vector<1x64xf32>
    %34 = vector.broadcast %33 : vector<1x64xf32> to vector<16x64xf32>
    %35 = arith.addf %32, %34 : vector<16x64xf32>
    %36 = vector.extract_strided_slice %35 {offsets = [0, 0], sizes = [16, 32], strides = [1, 1]} : vector<16x64xf32> to vector<16x32xf32>
    %c0_21 = arith.constant 0 : index
    %c0_22 = arith.constant 0 : index
    %37 = vector.load %arg9[%c0_21, %c0_22] : memref<1x32xf32, #tpu.memory_space<vmem>>, vector<1x32xf32>
    %c0_23 = arith.constant 0 : index
    %c0_24 = arith.constant 0 : index
    %38 = vector.load %arg10[%c0_23, %c0_24] : memref<1x32xf32, #tpu.memory_space<vmem>>, vector<1x32xf32>
    %cst_25 = arith.constant dense<0.000000e+00> : vector<16xf32>
    %39 = vector.multi_reduction <add>, %36, %cst_25 [1] : vector<16x32xf32> to vector<16xf32>
    %40 = vector.shape_cast %39 : vector<16xf32> to vector<16x1xf32>
    %cst_26 = arith.constant 3.200000e+01 : f32
    %41 = vector.broadcast %cst_26 : f32 to vector<16x1xf32>
    %42 = arith.divf %40, %41 : vector<16x1xf32>
    %43 = vector.broadcast %42 : vector<16x1xf32> to vector<16x32xf32>
    %44 = arith.subf %36, %43 : vector<16x32xf32>
    %45 = arith.mulf %44, %44 : vector<16x32xf32>
    %cst_27 = arith.constant dense<0.000000e+00> : vector<16xf32>
    %46 = vector.multi_reduction <add>, %45, %cst_27 [1] : vector<16x32xf32> to vector<16xf32>
    %47 = vector.shape_cast %46 : vector<16xf32> to vector<16x1xf32>
    %cst_28 = arith.constant 3.200000e+01 : f32
    %48 = vector.broadcast %cst_28 : f32 to vector<16x1xf32>
    %49 = arith.divf %47, %48 : vector<16x1xf32>
    %50 = vector.broadcast %42 : vector<16x1xf32> to vector<16x32xf32>
    %51 = arith.subf %36, %50 : vector<16x32xf32>
    %cst_29 = arith.constant 9.99999974E-6 : f32
    %52 = vector.broadcast %cst_29 : f32 to vector<16x1xf32>
    %53 = arith.addf %49, %52 : vector<16x1xf32>
    %54 = math.rsqrt %53 : vector<16x1xf32>
    %55 = vector.broadcast %54 : vector<16x1xf32> to vector<16x32xf32>
    %56 = arith.mulf %51, %55 : vector<16x32xf32>
    %57 = vector.broadcast %37 : vector<1x32xf32> to vector<16x32xf32>
    %58 = arith.mulf %56, %57 : vector<16x32xf32>
    %59 = vector.broadcast %38 : vector<1x32xf32> to vector<16x32xf32>
    %60 = arith.addf %58, %59 : vector<16x32xf32>
    %61 = vector.extract_strided_slice %35 {offsets = [0, 32], sizes = [16, 32], strides = [1, 1]} : vector<16x64xf32> to vector<16x32xf32>
    %c0_30 = arith.constant 0 : index
    %c0_31 = arith.constant 0 : index
    %62 = vector.load %arg11[%c0_30, %c0_31] : memref<1x32xf32, #tpu.memory_space<vmem>>, vector<1x32xf32>
    %c0_32 = arith.constant 0 : index
    %c0_33 = arith.constant 0 : index
    %63 = vector.load %arg12[%c0_32, %c0_33] : memref<1x32xf32, #tpu.memory_space<vmem>>, vector<1x32xf32>
    %cst_34 = arith.constant dense<0.000000e+00> : vector<16xf32>
    %64 = vector.multi_reduction <add>, %61, %cst_34 [1] : vector<16x32xf32> to vector<16xf32>
    %65 = vector.shape_cast %64 : vector<16xf32> to vector<16x1xf32>
    %cst_35 = arith.constant 3.200000e+01 : f32
    %66 = vector.broadcast %cst_35 : f32 to vector<16x1xf32>
    %67 = arith.divf %65, %66 : vector<16x1xf32>
    %68 = vector.broadcast %67 : vector<16x1xf32> to vector<16x32xf32>
    %69 = arith.subf %61, %68 : vector<16x32xf32>
    %70 = arith.mulf %69, %69 : vector<16x32xf32>
    %cst_36 = arith.constant dense<0.000000e+00> : vector<16xf32>
    %71 = vector.multi_reduction <add>, %70, %cst_36 [1] : vector<16x32xf32> to vector<16xf32>
    %72 = vector.shape_cast %71 : vector<16xf32> to vector<16x1xf32>
    %cst_37 = arith.constant 3.200000e+01 : f32
    %73 = vector.broadcast %cst_37 : f32 to vector<16x1xf32>
    %74 = arith.divf %72, %73 : vector<16x1xf32>
    %75 = vector.broadcast %67 : vector<16x1xf32> to vector<16x32xf32>
    %76 = arith.subf %61, %75 : vector<16x32xf32>
    %cst_38 = arith.constant 9.99999974E-6 : f32
    %77 = vector.broadcast %cst_38 : f32 to vector<16x1xf32>
    %78 = arith.addf %74, %77 : vector<16x1xf32>
    %79 = math.rsqrt %78 : vector<16x1xf32>
    %80 = vector.broadcast %79 : vector<16x1xf32> to vector<16x32xf32>
    %81 = arith.mulf %76, %80 : vector<16x32xf32>
    %82 = vector.broadcast %62 : vector<1x32xf32> to vector<16x32xf32>
    %83 = arith.mulf %81, %82 : vector<16x32xf32>
    %84 = vector.broadcast %63 : vector<1x32xf32> to vector<16x32xf32>
    %85 = arith.addf %83, %84 : vector<16x32xf32>
    %cst_39 = arith.constant 0.353553385 : f32
    %86 = vector.broadcast %cst_39 : f32 to vector<8x32xf32>
    %87 = arith.mulf %30, %86 : vector<8x32xf32>
    %88 = vector.shape_cast %87 : vector<8x32xf32> to vector<1x8x4x8xf32>
    %89 = tpu.transpose %88, [0, 2, 1, 3] : vector<1x8x4x8xf32> -> vector<1x4x8x8xf32>
    %90 = vector.shape_cast %89 : vector<1x4x8x8xf32> to vector<4x8x8xf32>
    %91 = vector.shape_cast %60 : vector<16x32xf32> to vector<1x16x4x8xf32>
    %92 = tpu.transpose %91, [0, 2, 1, 3] : vector<1x16x4x8xf32> -> vector<1x4x16x8xf32>
    %93 = vector.shape_cast %92 : vector<1x4x16x8xf32> to vector<4x16x8xf32>
    %94 = vector.shape_cast %85 : vector<16x32xf32> to vector<1x16x4x8xf32>
    %95 = tpu.transpose %94, [0, 2, 1, 3] : vector<1x16x4x8xf32> -> vector<1x4x16x8xf32>
    %96 = vector.shape_cast %95 : vector<1x4x16x8xf32> to vector<4x16x8xf32>
    "tpu.trace_start"() <{level = 10 : i32, message = "gmd,gnd->gmn"}> : () -> ()
    %cst_40 = arith.constant dense<0.000000e+00> : vector<4x8x16xf32>
    %97 = tpu.matmul %90, %93, %cst_40 {dimension_numbers = #tpu.dot_dimension_numbers<[2], [2], [1], [1], [0, 0, 0, 1, 1, 1], [0], [0]>} : vector<4x8x8xf32>, vector<4x16x8xf32>, vector<4x8x16xf32> -> vector<4x8x16xf32>
    "tpu.trace_stop"() : () -> ()
    %cst_41 = arith.constant dense<0xFF800000> : vector<4x8xf32>
    %98 = vector.multi_reduction <maximumf>, %97, %cst_41 [2] : vector<4x8x16xf32> to vector<4x8xf32>
    %99 = vector.shape_cast %98 : vector<4x8xf32> to vector<4x8x1xf32>
    %100 = vector.broadcast %99 : vector<4x8x1xf32> to vector<4x8x16xf32>
    %101 = arith.subf %97, %100 : vector<4x8x16xf32>
    %102 = math.exp %101 : vector<4x8x16xf32>
    %cst_42 = arith.constant dense<0.000000e+00> : vector<4x8xf32>
    %103 = vector.multi_reduction <add>, %102, %cst_42 [2] : vector<4x8x16xf32> to vector<4x8xf32>
    %104 = vector.shape_cast %103 : vector<4x8xf32> to vector<4x8x1xf32>
    "tpu.trace_start"() <{level = 10 : i32, message = "gmn,gnd->gmd"}> : () -> ()
    %cst_43 = arith.constant dense<0.000000e+00> : vector<4x8x8xf32>
    %105 = tpu.matmul %102, %96, %cst_43 {dimension_numbers = #tpu.dot_dimension_numbers<[2], [1], [1], [2], [0, 0, 0, 1, 1, 2], [0], [0]>} : vector<4x8x16xf32>, vector<4x16x8xf32>, vector<4x8x8xf32> -> vector<4x8x8xf32>
    "tpu.trace_stop"() : () -> ()
    %106 = tpu.reciprocal %104 {approx = true} : vector<4x8x1xf32> -> vector<4x8x1xf32>
    %107 = vector.broadcast %106 : vector<4x8x1xf32> to vector<4x8x8xf32>
    %108 = arith.mulf %105, %107 : vector<4x8x8xf32>
    %109 = vector.shape_cast %108 : vector<4x8x8xf32> to vector<1x4x8x8xf32>
    %110 = tpu.transpose %109, [0, 2, 1, 3] : vector<1x4x8x8xf32> -> vector<1x8x4x8xf32>
    %111 = vector.shape_cast %110 : vector<1x8x4x8xf32> to vector<8x32xf32>
    %c0_44 = arith.constant 0 : index
    %c0_45 = arith.constant 0 : index
    %112 = vector.load %arg13[%c0_44, %c0_45] : memref<32x32xf32, #tpu.memory_space<vmem>>, vector<32x32xf32>
    %cst_46 = arith.constant dense<0.000000e+00> : vector<8x32xf32>
    %113 = tpu.matmul %111, %112, %cst_46 {dimension_numbers = #tpu.dot_dimension_numbers<[1], [0], [0], [1], [0, 0, 1, 1], [], []>} : vector<8x32xf32>, vector<32x32xf32>, vector<8x32xf32> -> vector<8x32xf32>
    %c0_47 = arith.constant 0 : index
    %c0_48 = arith.constant 0 : index
    %114 = vector.load %arg14[%c0_47, %c0_48] : memref<1x32xf32, #tpu.memory_space<vmem>>, vector<1x32xf32>
    %115 = vector.broadcast %114 : vector<1x32xf32> to vector<8x32xf32>
    %116 = arith.addf %113, %115 : vector<8x32xf32>
    %c0_49 = arith.constant 0 : index
    %c0_50 = arith.constant 0 : index
    %117 = vector.load %arg15[%c0_49, %c0_50] : memref<8x32xf32, #tpu.memory_space<vmem>>, vector<8x32xf32>
    tpu.vector_store %arg15[%c0_49, %c0_50], %116 {strides = array<i32>} : memref<8x32xf32, #tpu.memory_space<vmem>>, vector<8x32xf32>,
    return
  }
  func.func @transform_0(%arg0: i32) -> (i32, i32) {
    %c0_i32 = arith.constant 0 : i32
    %c0_i32_0 = arith.constant 0 : i32
    return %arg0, %c0_i32 : i32, i32
  }
  func.func @transform_1(%arg0: i32) -> (i32, i32) {
    %c0_i32 = arith.constant 0 : i32
    %c0_i32_0 = arith.constant 0 : i32
    return %arg0, %c0_i32 : i32, i32
  }
  func.func @transform_2(%arg0: i32) -> (i32, i32) {
    %c0_i32 = arith.constant 0 : i32
    %c0_i32_0 = arith.constant 0 : i32
    %c0_i32_1 = arith.constant 0 : i32
    return %c0_i32, %c0_i32_0 : i32, i32
  }
  func.func @transform_3(%arg0: i32) -> (i32, i32) {
    %c0_i32 = arith.constant 0 : i32
    %c0_i32_0 = arith.constant 0 : i32
    %c0_i32_1 = arith.constant 0 : i32
    return %c0_i32, %c0_i32_0 : i32, i32
  }
  func.func @transform_4(%arg0: i32) -> (i32, i32) {
    %c0_i32 = arith.constant 0 : i32
    %c0_i32_0 = arith.constant 0 : i32
    %c0_i32_1 = arith.constant 0 : i32
    return %c0_i32, %c0_i32_0 : i32, i32
  }
  func.func @transform_5(%arg0: i32) -> (i32, i32) {
    %c0_i32 = arith.constant 0 : i32
    %c0_i32_0 = arith.constant 0 : i32
    %c0_i32_1 = arith.constant 0 : i32
    return %c0_i32, %c0_i32_0 : i32, i32
  }
  func.func @transform_6(%arg0: i32) -> (i32, i32) {
    %c0_i32 = arith.constant 0 : i32
    %c0_i32_0 = arith.constant 0 : i32
    %c0_i32_1 = arith.constant 0 : i32
    return %c0_i32, %c0_i32_0 : i32, i32
  }
  func.func @transform_7(%arg0: i32) -> (i32, i32) {
    %c0_i32 = arith.constant 0 : i32
    %c0_i32_0 = arith.constant 0 : i32
    %c0_i32_1 = arith.constant 0 : i32
    return %c0_i32, %c0_i32_0 : i32, i32
  }
  func.func @transform_8(%arg0: i32) -> (i32, i32) {
    %c0_i32 = arith.constant 0 : i32
    %c0_i32_0 = arith.constant 0 : i32
    %c0_i32_1 = arith.constant 0 : i32
    return %c0_i32, %c0_i32_0 : i32, i32
  }
  func.func @transform_9(%arg0: i32) -> (i32, i32) {
    %c0_i32 = arith.constant 0 : i32
    %c0_i32_0 = arith.constant 0 : i32
    %c0_i32_1 = arith.constant 0 : i32
    return %c0_i32, %c0_i32_0 : i32, i32
  }
  func.func @transform_10(%arg0: i32) -> (i32, i32) {
    %c0_i32 = arith.constant 0 : i32
    %c0_i32_0 = arith.constant 0 : i32
    %c0_i32_1 = arith.constant 0 : i32
    return %c0_i32, %c0_i32_0 : i32, i32
  }
  func.func @transform_11(%arg0: i32) -> (i32, i32) {
    %c0_i32 = arith.constant 0 : i32
    %c0_i32_0 = arith.constant 0 : i32
    %c0_i32_1 = arith.constant 0 : i32
    return %c0_i32, %c0_i32_0 : i32, i32
  }
  func.func @transform_12(%arg0: i32) -> (i32, i32) {
    %c0_i32 = arith.constant 0 : i32
    %c0_i32_0 = arith.constant 0 : i32
    %c0_i32_1 = arith.constant 0 : i32
    return %c0_i32, %c0_i32_0 : i32, i32
  }
  func.func @transform_13(%arg0: i32) -> (i32, i32) {
    %c0_i32 = arith.constant 0 : i32
    %c0_i32_0 = arith.constant 0 : i32
    %c0_i32_1 = arith.constant 0 : i32
    return %c0_i32, %c0_i32_0 : i32, i32
  }
  func.func @transform_14(%arg0: i32) -> (i32, i32) {
    %c0_i32 = arith.constant 0 : i32
    %c0_i32_0 = arith.constant 0 : i32
    return %arg0, %c0_i32 : i32, i32
  }
}

module attributes {stable_mosaic.version = 11 : i64} {
  func.func @cross_attention_kernel(%arg0: i32, %arg1: memref<16x32xf32, #tpu.memory_space<vmem>>, %arg2: memref<8x32xf32, #tpu.memory_space<vmem>>, %arg3: memref<32x32xf32, #tpu.memory_space<vmem>>, %arg4: memref<1x32xf32, #tpu.memory_space<vmem>>, %arg5: memref<1x32xf32, #tpu.memory_space<vmem>>, %arg6: memref<1x32xf32, #tpu.memory_space<vmem>>, %arg7: memref<32x64xf32, #tpu.memory_space<vmem>>, %arg8: memref<1x64xf32, #tpu.memory_space<vmem>>, %arg9: memref<1x32xf32, #tpu.memory_space<vmem>>, %arg10: memref<1x32xf32, #tpu.memory_space<vmem>>, %arg11: memref<1x32xf32, #tpu.memory_space<vmem>>, %arg12: memref<1x32xf32, #tpu.memory_space<vmem>>, %arg13: memref<32x32xf32, #tpu.memory_space<vmem>>, %arg14: memref<1x32xf32, #tpu.memory_space<vmem>>, %arg15: memref<8x32xf32, #tpu.memory_space<vmem>>) attributes {dimension_semantics = [#tpu.dimension_semantics<parallel>], iteration_bounds = array<i64: 2>, scalar_prefetch = 0 : i64, scratch_operands = 0 : i64, tpu.core_type = #tpu.core_type<tc>, window_params = [{transform_indices = @transform_0, window_bounds = array<i64: 16, 32>}, {transform_indices = @transform_1, window_bounds = array<i64: 8, 32>}, {pipeline_mode = #tpu.pipeline_mode<synchronous>, transform_indices = @transform_2, window_bounds = array<i64: 32, 32>}, {pipeline_mode = #tpu.pipeline_mode<synchronous>, transform_indices = @transform_3, window_bounds = array<i64: 1, 32>}, {pipeline_mode = #tpu.pipeline_mode<synchronous>, transform_indices = @transform_4, window_bounds = array<i64: 1, 32>}, {pipeline_mode = #tpu.pipeline_mode<synchronous>, transform_indices = @transform_5, window_bounds = array<i64: 1, 32>}, {pipeline_mode = #tpu.pipeline_mode<synchronous>, transform_indices = @transform_6, window_bounds = array<i64: 32, 64>}, {pipeline_mode = #tpu.pipeline_mode<synchronous>, transform_indices = @transform_7, window_bounds = array<i64: 1, 64>}, {pipeline_mode = #tpu.pipeline_mode<synchronous>, transform_indices = @transform_8, window_bounds = array<i64: 1, 32>}, {pipeline_mode = #tpu.pipeline_mode<synchronous>, transform_indices = @transform_9, window_bounds = array<i64: 1, 32>}, {pipeline_mode = #tpu.pipeline_mode<synchronous>, transform_indices = @transform_10, window_bounds = array<i64: 1, 32>}, {pipeline_mode = #tpu.pipeline_mode<synchronous>, transform_indices = @transform_11, window_bounds = array<i64: 1, 32>}, {pipeline_mode = #tpu.pipeline_mode<synchronous>, transform_indices = @transform_12, window_bounds = array<i64: 32, 32>}, {pipeline_mode = #tpu.pipeline_mode<synchronous>, transform_indices = @transform_13, window_bounds = array<i64: 1, 32>}, {transform_indices = @transform_14, window_bounds = array<i64: 8, 32>}]} {
    %c0 = arith.constant 0 : index
    %c0_0 = arith.constant 0 : index
    %0 = vector.load %arg1[%c0, %c0_0] : memref<16x32xf32, #tpu.memory_space<vmem>>, vector<16x32xf32>
    %c0_1 = arith.constant 0 : index
    %c0_2 = arith.constant 0 : index
    %1 = vector.load %arg2[%c0_1, %c0_2] : memref<8x32xf32, #tpu.memory_space<vmem>>, vector<8x32xf32>
    %c0_3 = arith.constant 0 : index
    %c0_4 = arith.constant 0 : index
    %2 = vector.load %arg3[%c0_3, %c0_4] : memref<32x32xf32, #tpu.memory_space<vmem>>, vector<32x32xf32>
    %cst = arith.constant dense<0.000000e+00> : vector<8x32xf32>
    %3 = tpu.matmul %1, %2, %cst {dimension_numbers = #tpu.dot_dimension_numbers<[1], [0], [0], [1], [0, 0, 1, 1], [], []>} : vector<8x32xf32>, vector<32x32xf32>, vector<8x32xf32> -> vector<8x32xf32>
    %c0_5 = arith.constant 0 : index
    %c0_6 = arith.constant 0 : index
    %4 = vector.load %arg4[%c0_5, %c0_6] : memref<1x32xf32, #tpu.memory_space<vmem>>, vector<1x32xf32>
    %5 = vector.broadcast %4 : vector<1x32xf32> to vector<8x32xf32>
    %6 = arith.addf %3, %5 : vector<8x32xf32>
    %c0_7 = arith.constant 0 : index
    %c0_8 = arith.constant 0 : index
    %7 = vector.load %arg5[%c0_7, %c0_8] : memref<1x32xf32, #tpu.memory_space<vmem>>, vector<1x32xf32>
    %c0_9 = arith.constant 0 : index
    %c0_10 = arith.constant 0 : index
    %8 = vector.load %arg6[%c0_9, %c0_10] : memref<1x32xf32, #tpu.memory_space<vmem>>, vector<1x32xf32>
    %cst_11 = arith.constant dense<0.000000e+00> : vector<8xf32>
    %9 = vector.multi_reduction <add>, %6, %cst_11 [1] : vector<8x32xf32> to vector<8xf32>
    %10 = vector.shape_cast %9 : vector<8xf32> to vector<8x1xf32>
    %cst_12 = arith.constant 3.200000e+01 : f32
    %11 = vector.broadcast %cst_12 : f32 to vector<8x1xf32>
    %12 = arith.divf %10, %11 : vector<8x1xf32>
    %13 = vector.broadcast %12 : vector<8x1xf32> to vector<8x32xf32>
    %14 = arith.subf %6, %13 : vector<8x32xf32>
    %15 = arith.mulf %14, %14 : vector<8x32xf32>
    %cst_13 = arith.constant dense<0.000000e+00> : vector<8xf32>
    %16 = vector.multi_reduction <add>, %15, %cst_13 [1] : vector<8x32xf32> to vector<8xf32>
    %17 = vector.shape_cast %16 : vector<8xf32> to vector<8x1xf32>
    %cst_14 = arith.constant 3.200000e+01 : f32
    %18 = vector.broadcast %cst_14 : f32 to vector<8x1xf32>
    %19 = arith.divf %17, %18 : vector<8x1xf32>
    %20 = vector.broadcast %12 : vector<8x1xf32> to vector<8x32xf32>
    %21 = arith.subf %6, %20 : vector<8x32xf32>
    %cst_15 = arith.constant 9.99999974E-6 : f32
    %22 = vector.broadcast %cst_15 : f32 to vector<8x1xf32>
    %23 = arith.addf %19, %22 : vector<8x1xf32>
    %24 = math.rsqrt %23 : vector<8x1xf32>
    %25 = vector.broadcast %24 : vector<8x1xf32> to vector<8x32xf32>
    %26 = arith.mulf %21, %25 : vector<8x32xf32>
    %27 = vector.broadcast %7 : vector<1x32xf32> to vector<8x32xf32>
    %28 = arith.mulf %26, %27 : vector<8x32xf32>
    %29 = vector.broadcast %8 : vector<1x32xf32> to vector<8x32xf32>
    %30 = arith.addf %28, %29 : vector<8x32xf32>
    %c0_16 = arith.constant 0 : index
    %c0_17 = arith.constant 0 : index
    %31 = vector.load %arg7[%c0_16, %c0_17] : memref<32x64xf32, #tpu.memory_space<vmem>>, vector<32x64xf32>
    %cst_18 = arith.constant dense<0.000000e+00> : vector<16x64xf32>
    %32 = tpu.matmul %0, %31, %cst_18 {dimension_numbers = #tpu.dot_dimension_numbers<[1], [0], [0], [1], [0, 0, 1, 1], [], []>} : vector<16x32xf32>, vector<32x64xf32>, vector<16x64xf32> -> vector<16x64xf32>
    %c0_19 = arith.constant 0 : index
    %c0_20 = arith.constant 0 : index
    %33 = vector.load %arg8[%c0_19, %c0_20] : memref<1x64xf32, #tpu.memory_space<vmem>>, vector<1x64xf32>
    %34 = vector.broadcast %33 : vector<1x64xf32> to vector<16x64xf32>
    %35 = arith.addf %32, %34 : vector<16x64xf32>
    %36 = vector.extract_strided_slice %35 {offsets = [0, 0], sizes = [16, 32], strides = [1, 1]} : vector<16x64xf32> to vector<16x32xf32>
    %c0_21 = arith.constant 0 : index
    %c0_22 = arith.constant 0 : index
    %37 = vector.load %arg9[%c0_21, %c0_22] : memref<1x32xf32, #tpu.memory_space<vmem>>, vector<1x32xf32>
    %c0_23 = arith.constant 0 : index
    %c0_24 = arith.constant 0 : index
    %38 = vector.load %arg10[%c0_23, %c0_24] : memref<1x32xf32, #tpu.memory_space<vmem>>, vector<1x32xf32>
    %cst_25 = arith.constant dense<0.000000e+00> : vector<16xf32>
    %39 = vector.multi_reduction <add>, %36, %cst_25 [1] : vector<16x32xf32> to vector<16xf32>
    %40 = vector.shape_cast %39 : vector<16xf32> to vector<16x1xf32>
    %cst_26 = arith.constant 3.200000e+01 : f32
    %41 = vector.broadcast %cst_26 : f32 to vector<16x1xf32>
    %42 = arith.divf %40, %41 : vector<16x1xf32>
    %43 = vector.broadcast %42 : vector<16x1xf32> to vector<16x32xf32>
    %44 = arith.subf %36, %43 : vector<16x32xf32>
    %45 = arith.mulf %44, %44 : vector<16x32xf32>
    %cst_27 = arith.constant dense<0.000000e+00> : vector<16xf32>
    %46 = vector.multi_reduction <add>, %45, %cst_27 [1] : vector<16x32xf32> to vector<16xf32>
    %47 = vector.shape_cast %46 : vector<16xf32> to vector<16x1xf32>
    %cst_28 = arith.constant 3.200000e+01 : f32
    %48 = vector.broadcast %cst_28 : f32 to vector<16x1xf32>
    %49 = arith.divf %47, %48 : vector<16x1xf32>
    %50 = vector.broadcast %42 : vector<16x1xf32> to vector<16x32xf32>
    %51 = arith.subf %36, %50 : vector<16x32xf32>
    %cst_29 = arith.constant 9.99999974E-6 : f32
    %52 = vector.broadcast %cst_29 : f32 to vector<16x1xf32>
    %53 = arith.addf %49, %52 : vector<16x1xf32>
    %54 = math.rsqrt %53 : vector<16x1xf32>
    %55 = vector.broadcast %54 : vector<16x1xf32> to vector<16x32xf32>
    %56 = arith.mulf %51, %55 : vector<16x32xf32>
    %57 = vector.broadcast %37 : vector<1x32xf32> to vector<16x32xf32>
    %58 = arith.mulf %56, %57 : vector<16x32xf32>
    %59 = vector.broadcast %38 : vector<1x32xf32> to vector<16x32xf32>
    %60 = arith.addf %58, %59 : vector<16x32xf32>
    %61 = vector.extract_strided_slice %35 {offsets = [0, 32], sizes = [16, 32], strides = [1, 1]} : vector<16x64xf32> to vector<16x32xf32>
    %c0_30 = arith.constant 0 : index
    %c0_31 = arith.constant 0 : index
    %62 = vector.load %arg11[%c0_30, %c0_31] : memref<1x32xf32, #tpu.memory_space<vmem>>, vector<1x32xf32>
    %c0_32 = arith.constant 0 : index
    %c0_33 = arith.constant 0 : index
    %63 = vector.load %arg12[%c0_32, %c0_33] : memref<1x32xf32, #tpu.memory_space<vmem>>, vector<1x32xf32>
    %cst_34 = arith.constant dense<0.000000e+00> : vector<16xf32>
    %64 = vector.multi_reduction <add>, %61, %cst_34 [1] : vector<16x32xf32> to vector<16xf32>
    %65 = vector.shape_cast %64 : vector<16xf32> to vector<16x1xf32>
    %cst_35 = arith.constant 3.200000e+01 : f32
    %66 = vector.broadcast %cst_35 : f32 to vector<16x1xf32>
    %67 = arith.divf %65, %66 : vector<16x1xf32>
    %68 = vector.broadcast %67 : vector<16x1xf32> to vector<16x32xf32>
    %69 = arith.subf %61, %68 : vector<16x32xf32>
    %70 = arith.mulf %69, %69 : vector<16x32xf32>
    %cst_36 = arith.constant dense<0.000000e+00> : vector<16xf32>
    %71 = vector.multi_reduction <add>, %70, %cst_36 [1] : vector<16x32xf32> to vector<16xf32>
    %72 = vector.shape_cast %71 : vector<16xf32> to vector<16x1xf32>
    %cst_37 = arith.constant 3.200000e+01 : f32
    %73 = vector.broadcast %cst_37 : f32 to vector<16x1xf32>
    %74 = arith.divf %72, %73 : vector<16x1xf32>
    %75 = vector.broadcast %67 : vector<16x1xf32> to vector<16x32xf32>
    %76 = arith.subf %61, %75 : vector<16x32xf32>
    %cst_38 = arith.constant 9.99999974E-6 : f32
    %77 = vector.broadcast %cst_38 : f32 to vector<16x1xf32>
    %78 = arith.addf %74, %77 : vector<16x1xf32>
    %79 = math.rsqrt %78 : vector<16x1xf32>
    %80 = vector.broadcast %79 : vector<16x1xf32> to vector<16x32xf32>
    %81 = arith.mulf %76, %80 : vector<16x32xf32>
    %82 = vector.broadcast %62 : vector<1x32xf32> to vector<16x32xf32>
    %83 = arith.mulf %81, %82 : vector<16x32xf32>
    %84 = vector.broadcast %63 : vector<1x32xf32> to vector<16x32xf32>
    %85 = arith.addf %83, %84 : vector<16x32xf32>
    %cst_39 = arith.constant 0.353553385 : f32
    %86 = vector.broadcast %cst_39 : f32 to vector<8x32xf32>
    %87 = arith.mulf %30, %86 : vector<8x32xf32>
    %88 = vector.shape_cast %87 : vector<8x32xf32> to vector<1x8x4x8xf32>
    %89 = tpu.transpose %88, [0, 2, 1, 3] : vector<1x8x4x8xf32> -> vector<1x4x8x8xf32>
    %90 = vector.shape_cast %89 : vector<1x4x8x8xf32> to vector<4x8x8xf32>
    %91 = vector.shape_cast %60 : vector<16x32xf32> to vector<1x16x4x8xf32>
    %92 = tpu.transpose %91, [0, 2, 1, 3] : vector<1x16x4x8xf32> -> vector<1x4x16x8xf32>
    %93 = vector.shape_cast %92 : vector<1x4x16x8xf32> to vector<4x16x8xf32>
    %94 = vector.shape_cast %85 : vector<16x32xf32> to vector<1x16x4x8xf32>
    %95 = tpu.transpose %94, [0, 2, 1, 3] : vector<1x16x4x8xf32> -> vector<1x4x16x8xf32>
    %96 = vector.shape_cast %95 : vector<1x4x16x8xf32> to vector<4x16x8xf32>
    "tpu.trace_start"() <{level = 10 : i32, message = "gmd,gnd->gmn"}> : () -> ()
    %cst_40 = arith.constant dense<0.000000e+00> : vector<4x8x16xf32>
    %97 = tpu.matmul %90, %93, %cst_40 {dimension_numbers = #tpu.dot_dimension_numbers<[2], [2], [1], [1], [0, 0, 0, 1, 1, 1], [0], [0]>} : vector<4x8x8xf32>, vector<4x16x8xf32>, vector<4x8x16xf32> -> vector<4x8x16xf32>
    "tpu.trace_stop"() : () -> ()
    %cst_41 = arith.constant dense<0xFF800000> : vector<4x8xf32>
    %98 = vector.multi_reduction <maximumf>, %97, %cst_41 [2] : vector<4x8x16xf32> to vector<4x8xf32>
    %99 = vector.shape_cast %98 : vector<4x8xf32> to vector<4x8x1xf32>
    %100 = vector.broadcast %99 : vector<4x8x1xf32> to vector<4x8x16xf32>
    %101 = arith.subf %97, %100 : vector<4x8x16xf32>
    %102 = math.exp %101 : vector<4x8x16xf32>
    %cst_42 = arith.constant dense<0.000000e+00> : vector<4x8xf32>
    %103 = vector.multi_reduction <add>, %102, %cst_42 [2] : vector<4x8x16xf32> to vector<4x8xf32>
    %104 = vector.shape_cast %103 : vector<4x8xf32> to vector<4x8x1xf32>
    "tpu.trace_start"() <{level = 10 : i32, message = "gmn,gnd->gmd"}> : () -> ()
    %cst_43 = arith.constant dense<0.000000e+00> : vector<4x8x8xf32>
    %105 = tpu.matmul %102, %96, %cst_43 {dimension_numbers = #tpu.dot_dimension_numbers<[2], [1], [1], [2], [0, 0, 0, 1, 1, 2], [0], [0]>} : vector<4x8x16xf32>, vector<4x16x8xf32>, vector<4x8x8xf32> -> vector<4x8x8xf32>
    "tpu.trace_stop"() : () -> ()
    %106 = tpu.reciprocal %104 {approx = true} : vector<4x8x1xf32> -> vector<4x8x1xf32>
    %107 = vector.broadcast %106 : vector<4x8x1xf32> to vector<4x8x8xf32>
    %108 = arith.mulf %105, %107 : vector<4x8x8xf32>
    %109 = vector.shape_cast %108 : vector<4x8x8xf32> to vector<1x4x8x8xf32>
    %110 = tpu.transpose %109, [0, 2, 1, 3] : vector<1x4x8x8xf32> -> vector<1x8x4x8xf32>
    %111 = vector.shape_cast %110 : vector<1x8x4x8xf32> to vector<8x32xf32>
    %c0_44 = arith.constant 0 : index
    %c0_45 = arith.constant 0 : index
    %112 = vector.load %arg13[%c0_44, %c0_45] : memref<32x32xf32, #tpu.memory_space<vmem>>, vector<32x32xf32>
    %cst_46 = arith.constant dense<0.000000e+00> : vector<8x32xf32>
    %113 = tpu.matmul %111, %112, %cst_46 {dimension_numbers = #tpu.dot_dimension_numbers<[1], [0], [0], [1], [0, 0, 1, 1], [], []>} : vector<8x32xf32>, vector<32x32xf32>, vector<8x32xf32> -> vector<8x32xf32>
    %c0_47 = arith.constant 0 : index
    %c0_48 = arith.constant 0 : index
    %114 = vector.load %arg14[%c0_47, %c0_48] : memref<1x32xf32, #tpu.memory_space<vmem>>, vector<1x32xf32>
    %115 = vector.broadcast %114 : vector<1x32xf32> to vector<8x32xf32>
    %116 = arith.addf %113, %115 : vector<8x32xf32>
    %c0_49 = arith.constant 0 : index
    %c0_50 = arith.constant 0 : index
    %117 = vector.load %arg15[%c0_49, %c0_50] : memref<8x32xf32, #tpu.memory_space<vmem>>, vector<8x32xf32>
    tpu.vector_store %arg15[%c0_49, %c0_50], %116 {strides = array<i32>} : memref<8x32xf32, #tpu.memory_space<vmem>>, vector<8x32xf32>,
    return
  }
  func.func @transform_0(%arg0: i32) -> (i32, i32) {
    %c0_i32 = arith.constant 0 : i32
    %c0_i32_0 = arith.constant 0 : i32
    return %arg0, %c0_i32 : i32, i32
  }
  func.func @transform_1(%arg0: i32) -> (i32, i32) {
    %c0_i32 = arith.constant 0 : i32
    %c0_i32_0 = arith.constant 0 : i32
    return %arg0, %c0_i32 : i32, i32
  }
  func.func @transform_2(%arg0: i32) -> (i32, i32) {
    %c0_i32 = arith.constant 0 : i32
    %c0_i32_0 = arith.constant 0 : i32
    %c0_i32_1 = arith.constant 0 : i32
    return %c0_i32, %c0_i32_0 : i32, i32
  }
  func.func @transform_3(%arg0: i32) -> (i32, i32) {
    %c0_i32 = arith.constant 0 : i32
    %c0_i32_0 = arith.constant 0 : i32
    %c0_i32_1 = arith.constant 0 : i32
    return %c0_i32, %c0_i32_0 : i32, i32
  }
  func.func @transform_4(%arg0: i32) -> (i32, i32) {
    %c0_i32 = arith.constant 0 : i32
    %c0_i32_0 = arith.constant 0 : i32
    %c0_i32_1 = arith.constant 0 : i32
    return %c0_i32, %c0_i32_0 : i32, i32
  }
  func.func @transform_5(%arg0: i32) -> (i32, i32) {
    %c0_i32 = arith.constant 0 : i32
    %c0_i32_0 = arith.constant 0 : i32
    %c0_i32_1 = arith.constant 0 : i32
    return %c0_i32, %c0_i32_0 : i32, i32
  }
  func.func @transform_6(%arg0: i32) -> (i32, i32) {
    %c0_i32 = arith.constant 0 : i32
    %c0_i32_0 = arith.constant 0 : i32
    %c0_i32_1 = arith.constant 0 : i32
    return %c0_i32, %c0_i32_0 : i32, i32
  }
  func.func @transform_7(%arg0: i32) -> (i32, i32) {
    %c0_i32 = arith.constant 0 : i32
    %c0_i32_0 = arith.constant 0 : i32
    %c0_i32_1 = arith.constant 0 : i32
    return %c0_i32, %c0_i32_0 : i32, i32
  }
  func.func @transform_8(%arg0: i32) -> (i32, i32) {
    %c0_i32 = arith.constant 0 : i32
    %c0_i32_0 = arith.constant 0 : i32
    %c0_i32_1 = arith.constant 0 : i32
    return %c0_i32, %c0_i32_0 : i32, i32
  }
  func.func @transform_9(%arg0: i32) -> (i32, i32) {
    %c0_i32 = arith.constant 0 : i32
    %c0_i32_0 = arith.constant 0 : i32
    %c0_i32_1 = arith.constant 0 : i32
    return %c0_i32, %c0_i32_0 : i32, i32
  }
  func.func @transform_10(%arg0: i32) -> (i32, i32) {
    %c0_i32 = arith.constant 0 : i32
    %c0_i32_0 = arith.constant 0 : i32
    %c0_i32_1 = arith.constant 0 : i32
    return %c0_i32, %c0_i32_0 : i32, i32
  }
  func.func @transform_11(%arg0: i32) -> (i32, i32) {
    %c0_i32 = arith.constant 0 : i32
    %c0_i32_0 = arith.constant 0 : i32
    %c0_i32_1 = arith.constant 0 : i32
    return %c0_i32, %c0_i32_0 : i32, i32
  }
  func.func @transform_12(%arg0: i32) -> (i32, i32) {
    %c0_i32 = arith.constant 0 : i32
    %c0_i32_0 = arith.constant 0 : i32
    %c0_i32_1 = arith.constant 0 : i32
    return %c0_i32, %c0_i32_0 : i32, i32
  }
  func.func @transform_13(%arg0: i32) -> (i32, i32) {
    %c0_i32 = arith.constant 0 : i32
    %c0_i32_0 = arith.constant 0 : i32
    %c0_i32_1 = arith.constant 0 : i32
    return %c0_i32, %c0_i32_0 : i32, i32
  }
  func.func @transform_14(%arg0: i32) -> (i32, i32) {
    %c0_i32 = arith.constant 0 : i32
    %c0_i32_0 = arith.constant 0 : i32
    return %arg0, %c0_i32 : i32, i32
  }
}

module attributes {stable_mosaic.version = 11 : i64} {
  func.func @cross_attention_kernel(%arg0: i32, %arg1: memref<16x32xf32, #tpu.memory_space<vmem>>, %arg2: memref<8x32xf32, #tpu.memory_space<vmem>>, %arg3: memref<32x32xf32, #tpu.memory_space<vmem>>, %arg4: memref<1x32xf32, #tpu.memory_space<vmem>>, %arg5: memref<1x32xf32, #tpu.memory_space<vmem>>, %arg6: memref<1x32xf32, #tpu.memory_space<vmem>>, %arg7: memref<32x64xf32, #tpu.memory_space<vmem>>, %arg8: memref<1x64xf32, #tpu.memory_space<vmem>>, %arg9: memref<1x32xf32, #tpu.memory_space<vmem>>, %arg10: memref<1x32xf32, #tpu.memory_space<vmem>>, %arg11: memref<1x32xf32, #tpu.memory_space<vmem>>, %arg12: memref<1x32xf32, #tpu.memory_space<vmem>>, %arg13: memref<32x32xf32, #tpu.memory_space<vmem>>, %arg14: memref<1x32xf32, #tpu.memory_space<vmem>>, %arg15: memref<8x32xf32, #tpu.memory_space<vmem>>) attributes {dimension_semantics = [#tpu.dimension_semantics<parallel>], iteration_bounds = array<i64: 2>, scalar_prefetch = 0 : i64, scratch_operands = 0 : i64, tpu.core_type = #tpu.core_type<tc>, window_params = [{transform_indices = @transform_0, window_bounds = array<i64: 16, 32>}, {transform_indices = @transform_1, window_bounds = array<i64: 8, 32>}, {pipeline_mode = #tpu.pipeline_mode<synchronous>, transform_indices = @transform_2, window_bounds = array<i64: 32, 32>}, {pipeline_mode = #tpu.pipeline_mode<synchronous>, transform_indices = @transform_3, window_bounds = array<i64: 1, 32>}, {pipeline_mode = #tpu.pipeline_mode<synchronous>, transform_indices = @transform_4, window_bounds = array<i64: 1, 32>}, {pipeline_mode = #tpu.pipeline_mode<synchronous>, transform_indices = @transform_5, window_bounds = array<i64: 1, 32>}, {pipeline_mode = #tpu.pipeline_mode<synchronous>, transform_indices = @transform_6, window_bounds = array<i64: 32, 64>}, {pipeline_mode = #tpu.pipeline_mode<synchronous>, transform_indices = @transform_7, window_bounds = array<i64: 1, 64>}, {pipeline_mode = #tpu.pipeline_mode<synchronous>, transform_indices = @transform_8, window_bounds = array<i64: 1, 32>}, {pipeline_mode = #tpu.pipeline_mode<synchronous>, transform_indices = @transform_9, window_bounds = array<i64: 1, 32>}, {pipeline_mode = #tpu.pipeline_mode<synchronous>, transform_indices = @transform_10, window_bounds = array<i64: 1, 32>}, {pipeline_mode = #tpu.pipeline_mode<synchronous>, transform_indices = @transform_11, window_bounds = array<i64: 1, 32>}, {pipeline_mode = #tpu.pipeline_mode<synchronous>, transform_indices = @transform_12, window_bounds = array<i64: 32, 32>}, {pipeline_mode = #tpu.pipeline_mode<synchronous>, transform_indices = @transform_13, window_bounds = array<i64: 1, 32>}, {transform_indices = @transform_14, window_bounds = array<i64: 8, 32>}]} {
    %c0 = arith.constant 0 : index
    %c0_0 = arith.constant 0 : index
    %0 = vector.load %arg1[%c0, %c0_0] : memref<16x32xf32, #tpu.memory_space<vmem>>, vector<16x32xf32>
    %c0_1 = arith.constant 0 : index
    %c0_2 = arith.constant 0 : index
    %1 = vector.load %arg2[%c0_1, %c0_2] : memref<8x32xf32, #tpu.memory_space<vmem>>, vector<8x32xf32>
    %c0_3 = arith.constant 0 : index
    %c0_4 = arith.constant 0 : index
    %2 = vector.load %arg3[%c0_3, %c0_4] : memref<32x32xf32, #tpu.memory_space<vmem>>, vector<32x32xf32>
    %cst = arith.constant dense<0.000000e+00> : vector<8x32xf32>
    %3 = tpu.matmul %1, %2, %cst {dimension_numbers = #tpu.dot_dimension_numbers<[1], [0], [0], [1], [0, 0, 1, 1], [], []>} : vector<8x32xf32>, vector<32x32xf32>, vector<8x32xf32> -> vector<8x32xf32>
    %c0_5 = arith.constant 0 : index
    %c0_6 = arith.constant 0 : index
    %4 = vector.load %arg4[%c0_5, %c0_6] : memref<1x32xf32, #tpu.memory_space<vmem>>, vector<1x32xf32>
    %5 = vector.broadcast %4 : vector<1x32xf32> to vector<8x32xf32>
    %6 = arith.addf %3, %5 : vector<8x32xf32>
    %c0_7 = arith.constant 0 : index
    %c0_8 = arith.constant 0 : index
    %7 = vector.load %arg5[%c0_7, %c0_8] : memref<1x32xf32, #tpu.memory_space<vmem>>, vector<1x32xf32>
    %c0_9 = arith.constant 0 : index
    %c0_10 = arith.constant 0 : index
    %8 = vector.load %arg6[%c0_9, %c0_10] : memref<1x32xf32, #tpu.memory_space<vmem>>, vector<1x32xf32>
    %cst_11 = arith.constant dense<0.000000e+00> : vector<8xf32>
    %9 = vector.multi_reduction <add>, %6, %cst_11 [1] : vector<8x32xf32> to vector<8xf32>
    %10 = vector.shape_cast %9 : vector<8xf32> to vector<8x1xf32>
    %cst_12 = arith.constant 3.200000e+01 : f32
    %11 = vector.broadcast %cst_12 : f32 to vector<8x1xf32>
    %12 = arith.divf %10, %11 : vector<8x1xf32>
    %13 = vector.broadcast %12 : vector<8x1xf32> to vector<8x32xf32>
    %14 = arith.subf %6, %13 : vector<8x32xf32>
    %15 = arith.mulf %14, %14 : vector<8x32xf32>
    %cst_13 = arith.constant dense<0.000000e+00> : vector<8xf32>
    %16 = vector.multi_reduction <add>, %15, %cst_13 [1] : vector<8x32xf32> to vector<8xf32>
    %17 = vector.shape_cast %16 : vector<8xf32> to vector<8x1xf32>
    %cst_14 = arith.constant 3.200000e+01 : f32
    %18 = vector.broadcast %cst_14 : f32 to vector<8x1xf32>
    %19 = arith.divf %17, %18 : vector<8x1xf32>
    %20 = vector.broadcast %12 : vector<8x1xf32> to vector<8x32xf32>
    %21 = arith.subf %6, %20 : vector<8x32xf32>
    %cst_15 = arith.constant 9.99999974E-6 : f32
    %22 = vector.broadcast %cst_15 : f32 to vector<8x1xf32>
    %23 = arith.addf %19, %22 : vector<8x1xf32>
    %24 = math.rsqrt %23 : vector<8x1xf32>
    %25 = vector.broadcast %24 : vector<8x1xf32> to vector<8x32xf32>
    %26 = arith.mulf %21, %25 : vector<8x32xf32>
    %27 = vector.broadcast %7 : vector<1x32xf32> to vector<8x32xf32>
    %28 = arith.mulf %26, %27 : vector<8x32xf32>
    %29 = vector.broadcast %8 : vector<1x32xf32> to vector<8x32xf32>
    %30 = arith.addf %28, %29 : vector<8x32xf32>
    %c0_16 = arith.constant 0 : index
    %c0_17 = arith.constant 0 : index
    %31 = vector.load %arg7[%c0_16, %c0_17] : memref<32x64xf32, #tpu.memory_space<vmem>>, vector<32x64xf32>
    %cst_18 = arith.constant dense<0.000000e+00> : vector<16x64xf32>
    %32 = tpu.matmul %0, %31, %cst_18 {dimension_numbers = #tpu.dot_dimension_numbers<[1], [0], [0], [1], [0, 0, 1, 1], [], []>} : vector<16x32xf32>, vector<32x64xf32>, vector<16x64xf32> -> vector<16x64xf32>
    %c0_19 = arith.constant 0 : index
    %c0_20 = arith.constant 0 : index
    %33 = vector.load %arg8[%c0_19, %c0_20] : memref<1x64xf32, #tpu.memory_space<vmem>>, vector<1x64xf32>
    %34 = vector.broadcast %33 : vector<1x64xf32> to vector<16x64xf32>
    %35 = arith.addf %32, %34 : vector<16x64xf32>
    %36 = vector.extract_strided_slice %35 {offsets = [0, 0], sizes = [16, 32], strides = [1, 1]} : vector<16x64xf32> to vector<16x32xf32>
    %c0_21 = arith.constant 0 : index
    %c0_22 = arith.constant 0 : index
    %37 = vector.load %arg9[%c0_21, %c0_22] : memref<1x32xf32, #tpu.memory_space<vmem>>, vector<1x32xf32>
    %c0_23 = arith.constant 0 : index
    %c0_24 = arith.constant 0 : index
    %38 = vector.load %arg10[%c0_23, %c0_24] : memref<1x32xf32, #tpu.memory_space<vmem>>, vector<1x32xf32>
    %cst_25 = arith.constant dense<0.000000e+00> : vector<16xf32>
    %39 = vector.multi_reduction <add>, %36, %cst_25 [1] : vector<16x32xf32> to vector<16xf32>
    %40 = vector.shape_cast %39 : vector<16xf32> to vector<16x1xf32>
    %cst_26 = arith.constant 3.200000e+01 : f32
    %41 = vector.broadcast %cst_26 : f32 to vector<16x1xf32>
    %42 = arith.divf %40, %41 : vector<16x1xf32>
    %43 = vector.broadcast %42 : vector<16x1xf32> to vector<16x32xf32>
    %44 = arith.subf %36, %43 : vector<16x32xf32>
    %45 = arith.mulf %44, %44 : vector<16x32xf32>
    %cst_27 = arith.constant dense<0.000000e+00> : vector<16xf32>
    %46 = vector.multi_reduction <add>, %45, %cst_27 [1] : vector<16x32xf32> to vector<16xf32>
    %47 = vector.shape_cast %46 : vector<16xf32> to vector<16x1xf32>
    %cst_28 = arith.constant 3.200000e+01 : f32
    %48 = vector.broadcast %cst_28 : f32 to vector<16x1xf32>
    %49 = arith.divf %47, %48 : vector<16x1xf32>
    %50 = vector.broadcast %42 : vector<16x1xf32> to vector<16x32xf32>
    %51 = arith.subf %36, %50 : vector<16x32xf32>
    %cst_29 = arith.constant 9.99999974E-6 : f32
    %52 = vector.broadcast %cst_29 : f32 to vector<16x1xf32>
    %53 = arith.addf %49, %52 : vector<16x1xf32>
    %54 = math.rsqrt %53 : vector<16x1xf32>
    %55 = vector.broadcast %54 : vector<16x1xf32> to vector<16x32xf32>
    %56 = arith.mulf %51, %55 : vector<16x32xf32>
    %57 = vector.broadcast %37 : vector<1x32xf32> to vector<16x32xf32>
    %58 = arith.mulf %56, %57 : vector<16x32xf32>
    %59 = vector.broadcast %38 : vector<1x32xf32> to vector<16x32xf32>
    %60 = arith.addf %58, %59 : vector<16x32xf32>
    %61 = vector.extract_strided_slice %35 {offsets = [0, 32], sizes = [16, 32], strides = [1, 1]} : vector<16x64xf32> to vector<16x32xf32>
    %c0_30 = arith.constant 0 : index
    %c0_31 = arith.constant 0 : index
    %62 = vector.load %arg11[%c0_30, %c0_31] : memref<1x32xf32, #tpu.memory_space<vmem>>, vector<1x32xf32>
    %c0_32 = arith.constant 0 : index
    %c0_33 = arith.constant 0 : index
    %63 = vector.load %arg12[%c0_32, %c0_33] : memref<1x32xf32, #tpu.memory_space<vmem>>, vector<1x32xf32>
    %cst_34 = arith.constant dense<0.000000e+00> : vector<16xf32>
    %64 = vector.multi_reduction <add>, %61, %cst_34 [1] : vector<16x32xf32> to vector<16xf32>
    %65 = vector.shape_cast %64 : vector<16xf32> to vector<16x1xf32>
    %cst_35 = arith.constant 3.200000e+01 : f32
    %66 = vector.broadcast %cst_35 : f32 to vector<16x1xf32>
    %67 = arith.divf %65, %66 : vector<16x1xf32>
    %68 = vector.broadcast %67 : vector<16x1xf32> to vector<16x32xf32>
    %69 = arith.subf %61, %68 : vector<16x32xf32>
    %70 = arith.mulf %69, %69 : vector<16x32xf32>
    %cst_36 = arith.constant dense<0.000000e+00> : vector<16xf32>
    %71 = vector.multi_reduction <add>, %70, %cst_36 [1] : vector<16x32xf32> to vector<16xf32>
    %72 = vector.shape_cast %71 : vector<16xf32> to vector<16x1xf32>
    %cst_37 = arith.constant 3.200000e+01 : f32
    %73 = vector.broadcast %cst_37 : f32 to vector<16x1xf32>
    %74 = arith.divf %72, %73 : vector<16x1xf32>
    %75 = vector.broadcast %67 : vector<16x1xf32> to vector<16x32xf32>
    %76 = arith.subf %61, %75 : vector<16x32xf32>
    %cst_38 = arith.constant 9.99999974E-6 : f32
    %77 = vector.broadcast %cst_38 : f32 to vector<16x1xf32>
    %78 = arith.addf %74, %77 : vector<16x1xf32>
    %79 = math.rsqrt %78 : vector<16x1xf32>
    %80 = vector.broadcast %79 : vector<16x1xf32> to vector<16x32xf32>
    %81 = arith.mulf %76, %80 : vector<16x32xf32>
    %82 = vector.broadcast %62 : vector<1x32xf32> to vector<16x32xf32>
    %83 = arith.mulf %81, %82 : vector<16x32xf32>
    %84 = vector.broadcast %63 : vector<1x32xf32> to vector<16x32xf32>
    %85 = arith.addf %83, %84 : vector<16x32xf32>
    %cst_39 = arith.constant 0.353553385 : f32
    %86 = vector.broadcast %cst_39 : f32 to vector<8x32xf32>
    %87 = arith.mulf %30, %86 : vector<8x32xf32>
    %88 = vector.extract_strided_slice %87 {offsets = [0, 0], sizes = [8, 8], strides = [1, 1]} : vector<8x32xf32> to vector<8x8xf32>
    %89 = vector.extract_strided_slice %87 {offsets = [0, 8], sizes = [8, 8], strides = [1, 1]} : vector<8x32xf32> to vector<8x8xf32>
    %90 = vector.extract_strided_slice %87 {offsets = [0, 16], sizes = [8, 8], strides = [1, 1]} : vector<8x32xf32> to vector<8x8xf32>
    %91 = vector.extract_strided_slice %87 {offsets = [0, 24], sizes = [8, 8], strides = [1, 1]} : vector<8x32xf32> to vector<8x8xf32>
    %92 = vector.shape_cast %88 : vector<8x8xf32> to vector<1x8x8xf32>
    %93 = vector.shape_cast %89 : vector<8x8xf32> to vector<1x8x8xf32>
    %94 = vector.shape_cast %90 : vector<8x8xf32> to vector<1x8x8xf32>
    %95 = vector.shape_cast %91 : vector<8x8xf32> to vector<1x8x8xf32>
    %96 = tpu.concatenate %92, %93, %94, %95 in 0 : vector<1x8x8xf32>, vector<1x8x8xf32>, vector<1x8x8xf32>, vector<1x8x8xf32> -> vector<4x8x8xf32>
    %97 = vector.extract_strided_slice %60 {offsets = [0, 0], sizes = [16, 8], strides = [1, 1]} : vector<16x32xf32> to vector<16x8xf32>
    %98 = vector.extract_strided_slice %60 {offsets = [0, 8], sizes = [16, 8], strides = [1, 1]} : vector<16x32xf32> to vector<16x8xf32>
    %99 = vector.extract_strided_slice %60 {offsets = [0, 16], sizes = [16, 8], strides = [1, 1]} : vector<16x32xf32> to vector<16x8xf32>
    %100 = vector.extract_strided_slice %60 {offsets = [0, 24], sizes = [16, 8], strides = [1, 1]} : vector<16x32xf32> to vector<16x8xf32>
    %101 = vector.shape_cast %97 : vector<16x8xf32> to vector<1x16x8xf32>
    %102 = vector.shape_cast %98 : vector<16x8xf32> to vector<1x16x8xf32>
    %103 = vector.shape_cast %99 : vector<16x8xf32> to vector<1x16x8xf32>
    %104 = vector.shape_cast %100 : vector<16x8xf32> to vector<1x16x8xf32>
    %105 = tpu.concatenate %101, %102, %103, %104 in 0 : vector<1x16x8xf32>, vector<1x16x8xf32>, vector<1x16x8xf32>, vector<1x16x8xf32> -> vector<4x16x8xf32>
    %106 = vector.extract_strided_slice %85 {offsets = [0, 0], sizes = [16, 8], strides = [1, 1]} : vector<16x32xf32> to vector<16x8xf32>
    %107 = vector.extract_strided_slice %85 {offsets = [0, 8], sizes = [16, 8], strides = [1, 1]} : vector<16x32xf32> to vector<16x8xf32>
    %108 = vector.extract_strided_slice %85 {offsets = [0, 16], sizes = [16, 8], strides = [1, 1]} : vector<16x32xf32> to vector<16x8xf32>
    %109 = vector.extract_strided_slice %85 {offsets = [0, 24], sizes = [16, 8], strides = [1, 1]} : vector<16x32xf32> to vector<16x8xf32>
    %110 = vector.shape_cast %106 : vector<16x8xf32> to vector<1x16x8xf32>
    %111 = vector.shape_cast %107 : vector<16x8xf32> to vector<1x16x8xf32>
    %112 = vector.shape_cast %108 : vector<16x8xf32> to vector<1x16x8xf32>
    %113 = vector.shape_cast %109 : vector<16x8xf32> to vector<1x16x8xf32>
    %114 = tpu.concatenate %110, %111, %112, %113 in 0 : vector<1x16x8xf32>, vector<1x16x8xf32>, vector<1x16x8xf32>, vector<1x16x8xf32> -> vector<4x16x8xf32>
    "tpu.trace_start"() <{level = 10 : i32, message = "gmd,gnd->gmn"}> : () -> ()
    %cst_40 = arith.constant dense<0.000000e+00> : vector<4x8x16xf32>
    %115 = tpu.matmul %96, %105, %cst_40 {dimension_numbers = #tpu.dot_dimension_numbers<[2], [2], [1], [1], [0, 0, 0, 1, 1, 1], [0], [0]>} : vector<4x8x8xf32>, vector<4x16x8xf32>, vector<4x8x16xf32> -> vector<4x8x16xf32>
    "tpu.trace_stop"() : () -> ()
    %cst_41 = arith.constant dense<0xFF800000> : vector<4x8xf32>
    %116 = vector.multi_reduction <maximumf>, %115, %cst_41 [2] : vector<4x8x16xf32> to vector<4x8xf32>
    %117 = vector.shape_cast %116 : vector<4x8xf32> to vector<4x8x1xf32>
    %118 = vector.broadcast %117 : vector<4x8x1xf32> to vector<4x8x16xf32>
    %119 = arith.subf %115, %118 : vector<4x8x16xf32>
    %120 = math.exp %119 : vector<4x8x16xf32>
    %cst_42 = arith.constant dense<0.000000e+00> : vector<4x8xf32>
    %121 = vector.multi_reduction <add>, %120, %cst_42 [2] : vector<4x8x16xf32> to vector<4x8xf32>
    %122 = vector.shape_cast %121 : vector<4x8xf32> to vector<4x8x1xf32>
    "tpu.trace_start"() <{level = 10 : i32, message = "gmn,gnd->gmd"}> : () -> ()
    %cst_43 = arith.constant dense<0.000000e+00> : vector<4x8x8xf32>
    %123 = tpu.matmul %120, %114, %cst_43 {dimension_numbers = #tpu.dot_dimension_numbers<[2], [1], [1], [2], [0, 0, 0, 1, 1, 2], [0], [0]>} : vector<4x8x16xf32>, vector<4x16x8xf32>, vector<4x8x8xf32> -> vector<4x8x8xf32>
    "tpu.trace_stop"() : () -> ()
    %124 = tpu.reciprocal %122 {approx = true} : vector<4x8x1xf32> -> vector<4x8x1xf32>
    %125 = vector.broadcast %124 : vector<4x8x1xf32> to vector<4x8x8xf32>
    %126 = arith.mulf %123, %125 : vector<4x8x8xf32>
    %127 = vector.extract_strided_slice %126 {offsets = [0, 0, 0], sizes = [1, 8, 8], strides = [1, 1, 1]} : vector<4x8x8xf32> to vector<1x8x8xf32>
    %128 = vector.shape_cast %127 : vector<1x8x8xf32> to vector<8x8xf32>
    %129 = vector.extract_strided_slice %126 {offsets = [1, 0, 0], sizes = [1, 8, 8], strides = [1, 1, 1]} : vector<4x8x8xf32> to vector<1x8x8xf32>
    %130 = vector.shape_cast %129 : vector<1x8x8xf32> to vector<8x8xf32>
    %131 = vector.extract_strided_slice %126 {offsets = [2, 0, 0], sizes = [1, 8, 8], strides = [1, 1, 1]} : vector<4x8x8xf32> to vector<1x8x8xf32>
    %132 = vector.shape_cast %131 : vector<1x8x8xf32> to vector<8x8xf32>
    %133 = vector.extract_strided_slice %126 {offsets = [3, 0, 0], sizes = [1, 8, 8], strides = [1, 1, 1]} : vector<4x8x8xf32> to vector<1x8x8xf32>
    %134 = vector.shape_cast %133 : vector<1x8x8xf32> to vector<8x8xf32>
    %135 = tpu.concatenate %128, %130, %132, %134 in 1 : vector<8x8xf32>, vector<8x8xf32>, vector<8x8xf32>, vector<8x8xf32> -> vector<8x32xf32>
    %c0_44 = arith.constant 0 : index
    %c0_45 = arith.constant 0 : index
    %136 = vector.load %arg13[%c0_44, %c0_45] : memref<32x32xf32, #tpu.memory_space<vmem>>, vector<32x32xf32>
    %cst_46 = arith.constant dense<0.000000e+00> : vector<8x32xf32>
    %137 = tpu.matmul %135, %136, %cst_46 {dimension_numbers = #tpu.dot_dimension_numbers<[1], [0], [0], [1], [0, 0, 1, 1], [], []>} : vector<8x32xf32>, vector<32x32xf32>, vector<8x32xf32> -> vector<8x32xf32>
    %c0_47 = arith.constant 0 : index
    %c0_48 = arith.constant 0 : index
    %138 = vector.load %arg14[%c0_47, %c0_48] : memref<1x32xf32, #tpu.memory_space<vmem>>, vector<1x32xf32>
    %139 = vector.broadcast %138 : vector<1x32xf32> to vector<8x32xf32>
    %140 = arith.addf %137, %139 : vector<8x32xf32>
    %c0_49 = arith.constant 0 : index
    %c0_50 = arith.constant 0 : index
    %141 = vector.load %arg15[%c0_49, %c0_50] : memref<8x32xf32, #tpu.memory_space<vmem>>, vector<8x32xf32>
    tpu.vector_store %arg15[%c0_49, %c0_50], %140 {strides = array<i32>} : memref<8x32xf32, #tpu.memory_space<vmem>>, vector<8x32xf32>,
    return
  }
  func.func @transform_0(%arg0: i32) -> (i32, i32) {
    %c0_i32 = arith.constant 0 : i32
    %c0_i32_0 = arith.constant 0 : i32
    return %arg0, %c0_i32 : i32, i32
  }
  func.func @transform_1(%arg0: i32) -> (i32, i32) {
    %c0_i32 = arith.constant 0 : i32
    %c0_i32_0 = arith.constant 0 : i32
    return %arg0, %c0_i32 : i32, i32
  }
  func.func @transform_2(%arg0: i32) -> (i32, i32) {
    %c0_i32 = arith.constant 0 : i32
    %c0_i32_0 = arith.constant 0 : i32
    %c0_i32_1 = arith.constant 0 : i32
    return %c0_i32, %c0_i32_0 : i32, i32
  }
  func.func @transform_3(%arg0: i32) -> (i32, i32) {
    %c0_i32 = arith.constant 0 : i32
    %c0_i32_0 = arith.constant 0 : i32
    %c0_i32_1 = arith.constant 0 : i32
    return %c0_i32, %c0_i32_0 : i32, i32
  }
  func.func @transform_4(%arg0: i32) -> (i32, i32) {
    %c0_i32 = arith.constant 0 : i32
    %c0_i32_0 = arith.constant 0 : i32
    %c0_i32_1 = arith.constant 0 : i32
    return %c0_i32, %c0_i32_0 : i32, i32
  }
  func.func @transform_5(%arg0: i32) -> (i32, i32) {
    %c0_i32 = arith.constant 0 : i32
    %c0_i32_0 = arith.constant 0 : i32
    %c0_i32_1 = arith.constant 0 : i32
    return %c0_i32, %c0_i32_0 : i32, i32
  }
  func.func @transform_6(%arg0: i32) -> (i32, i32) {
    %c0_i32 = arith.constant 0 : i32
    %c0_i32_0 = arith.constant 0 : i32
    %c0_i32_1 = arith.constant 0 : i32
    return %c0_i32, %c0_i32_0 : i32, i32
  }
  func.func @transform_7(%arg0: i32) -> (i32, i32) {
    %c0_i32 = arith.constant 0 : i32
    %c0_i32_0 = arith.constant 0 : i32
    %c0_i32_1 = arith.constant 0 : i32
    return %c0_i32, %c0_i32_0 : i32, i32
  }
  func.func @transform_8(%arg0: i32) -> (i32, i32) {
    %c0_i32 = arith.constant 0 : i32
    %c0_i32_0 = arith.constant 0 : i32
    %c0_i32_1 = arith.constant 0 : i32
    return %c0_i32, %c0_i32_0 : i32, i32
  }
  func.func @transform_9(%arg0: i32) -> (i32, i32) {
    %c0_i32 = arith.constant 0 : i32
    %c0_i32_0 = arith.constant 0 : i32
    %c0_i32_1 = arith.constant 0 : i32
    return %c0_i32, %c0_i32_0 : i32, i32
  }
  func.func @transform_10(%arg0: i32) -> (i32, i32) {
    %c0_i32 = arith.constant 0 : i32
    %c0_i32_0 = arith.constant 0 : i32
    %c0_i32_1 = arith.constant 0 : i32
    return %c0_i32, %c0_i32_0 : i32, i32
  }
  func.func @transform_11(%arg0: i32) -> (i32, i32) {
    %c0_i32 = arith.constant 0 : i32
    %c0_i32_0 = arith.constant 0 : i32
    %c0_i32_1 = arith.constant 0 : i32
    return %c0_i32, %c0_i32_0 : i32, i32
  }
  func.func @transform_12(%arg0: i32) -> (i32, i32) {
    %c0_i32 = arith.constant 0 : i32
    %c0_i32_0 = arith.constant 0 : i32
    %c0_i32_1 = arith.constant 0 : i32
    return %c0_i32, %c0_i32_0 : i32, i32
  }
  func.func @transform_13(%arg0: i32) -> (i32, i32) {
    %c0_i32 = arith.constant 0 : i32
    %c0_i32_0 = arith.constant 0 : i32
    %c0_i32_1 = arith.constant 0 : i32
    return %c0_i32, %c0_i32_0 : i32, i32
  }
  func.func @transform_14(%arg0: i32) -> (i32, i32) {
    %c0_i32 = arith.constant 0 : i32
    %c0_i32_0 = arith.constant 0 : i32
    return %arg0, %c0_i32 : i32, i32
  }
}

module attributes {stable_mosaic.version = 11 : i64} {
  func.func @cross_attention_kernel(%arg0: i32, %arg1: memref<16x32xf32, #tpu.memory_space<vmem>>, %arg2: memref<8x32xf32, #tpu.memory_space<vmem>>, %arg3: memref<32x32xf32, #tpu.memory_space<vmem>>, %arg4: memref<1x32xf32, #tpu.memory_space<vmem>>, %arg5: memref<1x32xf32, #tpu.memory_space<vmem>>, %arg6: memref<1x32xf32, #tpu.memory_space<vmem>>, %arg7: memref<32x64xf32, #tpu.memory_space<vmem>>, %arg8: memref<1x64xf32, #tpu.memory_space<vmem>>, %arg9: memref<1x32xf32, #tpu.memory_space<vmem>>, %arg10: memref<1x32xf32, #tpu.memory_space<vmem>>, %arg11: memref<1x32xf32, #tpu.memory_space<vmem>>, %arg12: memref<1x32xf32, #tpu.memory_space<vmem>>, %arg13: memref<32x32xf32, #tpu.memory_space<vmem>>, %arg14: memref<1x32xf32, #tpu.memory_space<vmem>>, %arg15: memref<8x32xf32, #tpu.memory_space<vmem>>) attributes {dimension_semantics = [#tpu.dimension_semantics<parallel>], iteration_bounds = array<i64: 2>, scalar_prefetch = 0 : i64, scratch_operands = 0 : i64, tpu.core_type = #tpu.core_type<tc>, window_params = [{transform_indices = @transform_0, window_bounds = array<i64: 16, 32>}, {transform_indices = @transform_1, window_bounds = array<i64: 8, 32>}, {pipeline_mode = #tpu.pipeline_mode<synchronous>, transform_indices = @transform_2, window_bounds = array<i64: 32, 32>}, {pipeline_mode = #tpu.pipeline_mode<synchronous>, transform_indices = @transform_3, window_bounds = array<i64: 1, 32>}, {pipeline_mode = #tpu.pipeline_mode<synchronous>, transform_indices = @transform_4, window_bounds = array<i64: 1, 32>}, {pipeline_mode = #tpu.pipeline_mode<synchronous>, transform_indices = @transform_5, window_bounds = array<i64: 1, 32>}, {pipeline_mode = #tpu.pipeline_mode<synchronous>, transform_indices = @transform_6, window_bounds = array<i64: 32, 64>}, {pipeline_mode = #tpu.pipeline_mode<synchronous>, transform_indices = @transform_7, window_bounds = array<i64: 1, 64>}, {pipeline_mode = #tpu.pipeline_mode<synchronous>, transform_indices = @transform_8, window_bounds = array<i64: 1, 32>}, {pipeline_mode = #tpu.pipeline_mode<synchronous>, transform_indices = @transform_9, window_bounds = array<i64: 1, 32>}, {pipeline_mode = #tpu.pipeline_mode<synchronous>, transform_indices = @transform_10, window_bounds = array<i64: 1, 32>}, {pipeline_mode = #tpu.pipeline_mode<synchronous>, transform_indices = @transform_11, window_bounds = array<i64: 1, 32>}, {pipeline_mode = #tpu.pipeline_mode<synchronous>, transform_indices = @transform_12, window_bounds = array<i64: 32, 32>}, {pipeline_mode = #tpu.pipeline_mode<synchronous>, transform_indices = @transform_13, window_bounds = array<i64: 1, 32>}, {transform_indices = @transform_14, window_bounds = array<i64: 8, 32>}]} {
    %c0 = arith.constant 0 : index
    %c0_0 = arith.constant 0 : index
    %0 = vector.load %arg1[%c0, %c0_0] : memref<16x32xf32, #tpu.memory_space<vmem>>, vector<16x32xf32>
    %c0_1 = arith.constant 0 : index
    %c0_2 = arith.constant 0 : index
    %1 = vector.load %arg2[%c0_1, %c0_2] : memref<8x32xf32, #tpu.memory_space<vmem>>, vector<8x32xf32>
    %c0_3 = arith.constant 0 : index
    %c0_4 = arith.constant 0 : index
    %2 = vector.load %arg3[%c0_3, %c0_4] : memref<32x32xf32, #tpu.memory_space<vmem>>, vector<32x32xf32>
    %cst = arith.constant dense<0.000000e+00> : vector<8x32xf32>
    %3 = tpu.matmul %1, %2, %cst {dimension_numbers = #tpu.dot_dimension_numbers<[1], [0], [0], [1], [0, 0, 1, 1], [], []>} : vector<8x32xf32>, vector<32x32xf32>, vector<8x32xf32> -> vector<8x32xf32>
    %c0_5 = arith.constant 0 : index
    %c0_6 = arith.constant 0 : index
    %4 = vector.load %arg4[%c0_5, %c0_6] : memref<1x32xf32, #tpu.memory_space<vmem>>, vector<1x32xf32>
    %5 = vector.broadcast %4 : vector<1x32xf32> to vector<8x32xf32>
    %6 = arith.addf %3, %5 : vector<8x32xf32>
    %c0_7 = arith.constant 0 : index
    %c0_8 = arith.constant 0 : index
    %7 = vector.load %arg5[%c0_7, %c0_8] : memref<1x32xf32, #tpu.memory_space<vmem>>, vector<1x32xf32>
    %c0_9 = arith.constant 0 : index
    %c0_10 = arith.constant 0 : index
    %8 = vector.load %arg6[%c0_9, %c0_10] : memref<1x32xf32, #tpu.memory_space<vmem>>, vector<1x32xf32>
    %cst_11 = arith.constant dense<0.000000e+00> : vector<8xf32>
    %9 = vector.multi_reduction <add>, %6, %cst_11 [1] : vector<8x32xf32> to vector<8xf32>
    %10 = vector.shape_cast %9 : vector<8xf32> to vector<8x1xf32>
    %cst_12 = arith.constant 3.200000e+01 : f32
    %11 = vector.broadcast %cst_12 : f32 to vector<8x1xf32>
    %12 = arith.divf %10, %11 : vector<8x1xf32>
    %13 = vector.broadcast %12 : vector<8x1xf32> to vector<8x32xf32>
    %14 = arith.subf %6, %13 : vector<8x32xf32>
    %15 = arith.mulf %14, %14 : vector<8x32xf32>
    %cst_13 = arith.constant dense<0.000000e+00> : vector<8xf32>
    %16 = vector.multi_reduction <add>, %15, %cst_13 [1] : vector<8x32xf32> to vector<8xf32>
    %17 = vector.shape_cast %16 : vector<8xf32> to vector<8x1xf32>
    %cst_14 = arith.constant 3.200000e+01 : f32
    %18 = vector.broadcast %cst_14 : f32 to vector<8x1xf32>
    %19 = arith.divf %17, %18 : vector<8x1xf32>
    %20 = vector.broadcast %12 : vector<8x1xf32> to vector<8x32xf32>
    %21 = arith.subf %6, %20 : vector<8x32xf32>
    %cst_15 = arith.constant 9.99999974E-6 : f32
    %22 = vector.broadcast %cst_15 : f32 to vector<8x1xf32>
    %23 = arith.addf %19, %22 : vector<8x1xf32>
    %24 = math.rsqrt %23 : vector<8x1xf32>
    %25 = vector.broadcast %24 : vector<8x1xf32> to vector<8x32xf32>
    %26 = arith.mulf %21, %25 : vector<8x32xf32>
    %27 = vector.broadcast %7 : vector<1x32xf32> to vector<8x32xf32>
    %28 = arith.mulf %26, %27 : vector<8x32xf32>
    %29 = vector.broadcast %8 : vector<1x32xf32> to vector<8x32xf32>
    %30 = arith.addf %28, %29 : vector<8x32xf32>
    %c0_16 = arith.constant 0 : index
    %c0_17 = arith.constant 0 : index
    %31 = vector.load %arg7[%c0_16, %c0_17] : memref<32x64xf32, #tpu.memory_space<vmem>>, vector<32x64xf32>
    %cst_18 = arith.constant dense<0.000000e+00> : vector<16x64xf32>
    %32 = tpu.matmul %0, %31, %cst_18 {dimension_numbers = #tpu.dot_dimension_numbers<[1], [0], [0], [1], [0, 0, 1, 1], [], []>} : vector<16x32xf32>, vector<32x64xf32>, vector<16x64xf32> -> vector<16x64xf32>
    %c0_19 = arith.constant 0 : index
    %c0_20 = arith.constant 0 : index
    %33 = vector.load %arg8[%c0_19, %c0_20] : memref<1x64xf32, #tpu.memory_space<vmem>>, vector<1x64xf32>
    %34 = vector.broadcast %33 : vector<1x64xf32> to vector<16x64xf32>
    %35 = arith.addf %32, %34 : vector<16x64xf32>
    %36 = vector.extract_strided_slice %35 {offsets = [0, 0], sizes = [16, 32], strides = [1, 1]} : vector<16x64xf32> to vector<16x32xf32>
    %c0_21 = arith.constant 0 : index
    %c0_22 = arith.constant 0 : index
    %37 = vector.load %arg9[%c0_21, %c0_22] : memref<1x32xf32, #tpu.memory_space<vmem>>, vector<1x32xf32>
    %c0_23 = arith.constant 0 : index
    %c0_24 = arith.constant 0 : index
    %38 = vector.load %arg10[%c0_23, %c0_24] : memref<1x32xf32, #tpu.memory_space<vmem>>, vector<1x32xf32>
    %cst_25 = arith.constant dense<0.000000e+00> : vector<16xf32>
    %39 = vector.multi_reduction <add>, %36, %cst_25 [1] : vector<16x32xf32> to vector<16xf32>
    %40 = vector.shape_cast %39 : vector<16xf32> to vector<16x1xf32>
    %cst_26 = arith.constant 3.200000e+01 : f32
    %41 = vector.broadcast %cst_26 : f32 to vector<16x1xf32>
    %42 = arith.divf %40, %41 : vector<16x1xf32>
    %43 = vector.broadcast %42 : vector<16x1xf32> to vector<16x32xf32>
    %44 = arith.subf %36, %43 : vector<16x32xf32>
    %45 = arith.mulf %44, %44 : vector<16x32xf32>
    %cst_27 = arith.constant dense<0.000000e+00> : vector<16xf32>
    %46 = vector.multi_reduction <add>, %45, %cst_27 [1] : vector<16x32xf32> to vector<16xf32>
    %47 = vector.shape_cast %46 : vector<16xf32> to vector<16x1xf32>
    %cst_28 = arith.constant 3.200000e+01 : f32
    %48 = vector.broadcast %cst_28 : f32 to vector<16x1xf32>
    %49 = arith.divf %47, %48 : vector<16x1xf32>
    %50 = vector.broadcast %42 : vector<16x1xf32> to vector<16x32xf32>
    %51 = arith.subf %36, %50 : vector<16x32xf32>
    %cst_29 = arith.constant 9.99999974E-6 : f32
    %52 = vector.broadcast %cst_29 : f32 to vector<16x1xf32>
    %53 = arith.addf %49, %52 : vector<16x1xf32>
    %54 = math.rsqrt %53 : vector<16x1xf32>
    %55 = vector.broadcast %54 : vector<16x1xf32> to vector<16x32xf32>
    %56 = arith.mulf %51, %55 : vector<16x32xf32>
    %57 = vector.broadcast %37 : vector<1x32xf32> to vector<16x32xf32>
    %58 = arith.mulf %56, %57 : vector<16x32xf32>
    %59 = vector.broadcast %38 : vector<1x32xf32> to vector<16x32xf32>
    %60 = arith.addf %58, %59 : vector<16x32xf32>
    %61 = vector.extract_strided_slice %35 {offsets = [0, 32], sizes = [16, 32], strides = [1, 1]} : vector<16x64xf32> to vector<16x32xf32>
    %c0_30 = arith.constant 0 : index
    %c0_31 = arith.constant 0 : index
    %62 = vector.load %arg11[%c0_30, %c0_31] : memref<1x32xf32, #tpu.memory_space<vmem>>, vector<1x32xf32>
    %c0_32 = arith.constant 0 : index
    %c0_33 = arith.constant 0 : index
    %63 = vector.load %arg12[%c0_32, %c0_33] : memref<1x32xf32, #tpu.memory_space<vmem>>, vector<1x32xf32>
    %cst_34 = arith.constant dense<0.000000e+00> : vector<16xf32>
    %64 = vector.multi_reduction <add>, %61, %cst_34 [1] : vector<16x32xf32> to vector<16xf32>
    %65 = vector.shape_cast %64 : vector<16xf32> to vector<16x1xf32>
    %cst_35 = arith.constant 3.200000e+01 : f32
    %66 = vector.broadcast %cst_35 : f32 to vector<16x1xf32>
    %67 = arith.divf %65, %66 : vector<16x1xf32>
    %68 = vector.broadcast %67 : vector<16x1xf32> to vector<16x32xf32>
    %69 = arith.subf %61, %68 : vector<16x32xf32>
    %70 = arith.mulf %69, %69 : vector<16x32xf32>
    %cst_36 = arith.constant dense<0.000000e+00> : vector<16xf32>
    %71 = vector.multi_reduction <add>, %70, %cst_36 [1] : vector<16x32xf32> to vector<16xf32>
    %72 = vector.shape_cast %71 : vector<16xf32> to vector<16x1xf32>
    %cst_37 = arith.constant 3.200000e+01 : f32
    %73 = vector.broadcast %cst_37 : f32 to vector<16x1xf32>
    %74 = arith.divf %72, %73 : vector<16x1xf32>
    %75 = vector.broadcast %67 : vector<16x1xf32> to vector<16x32xf32>
    %76 = arith.subf %61, %75 : vector<16x32xf32>
    %cst_38 = arith.constant 9.99999974E-6 : f32
    %77 = vector.broadcast %cst_38 : f32 to vector<16x1xf32>
    %78 = arith.addf %74, %77 : vector<16x1xf32>
    %79 = math.rsqrt %78 : vector<16x1xf32>
    %80 = vector.broadcast %79 : vector<16x1xf32> to vector<16x32xf32>
    %81 = arith.mulf %76, %80 : vector<16x32xf32>
    %82 = vector.broadcast %62 : vector<1x32xf32> to vector<16x32xf32>
    %83 = arith.mulf %81, %82 : vector<16x32xf32>
    %84 = vector.broadcast %63 : vector<1x32xf32> to vector<16x32xf32>
    %85 = arith.addf %83, %84 : vector<16x32xf32>
    %cst_39 = arith.constant 0.353553385 : f32
    %86 = vector.broadcast %cst_39 : f32 to vector<8x32xf32>
    %87 = arith.mulf %30, %86 : vector<8x32xf32>
    %88 = vector.extract_strided_slice %87 {offsets = [0, 0], sizes = [8, 8], strides = [1, 1]} : vector<8x32xf32> to vector<8x8xf32>
    %89 = vector.extract_strided_slice %87 {offsets = [0, 8], sizes = [8, 8], strides = [1, 1]} : vector<8x32xf32> to vector<8x8xf32>
    %90 = vector.extract_strided_slice %87 {offsets = [0, 16], sizes = [8, 8], strides = [1, 1]} : vector<8x32xf32> to vector<8x8xf32>
    %91 = vector.extract_strided_slice %87 {offsets = [0, 24], sizes = [8, 8], strides = [1, 1]} : vector<8x32xf32> to vector<8x8xf32>
    %92 = vector.shape_cast %88 : vector<8x8xf32> to vector<1x8x8xf32>
    %93 = vector.shape_cast %89 : vector<8x8xf32> to vector<1x8x8xf32>
    %94 = vector.shape_cast %90 : vector<8x8xf32> to vector<1x8x8xf32>
    %95 = vector.shape_cast %91 : vector<8x8xf32> to vector<1x8x8xf32>
    %96 = tpu.concatenate %92, %93, %94, %95 in 0 : vector<1x8x8xf32>, vector<1x8x8xf32>, vector<1x8x8xf32>, vector<1x8x8xf32> -> vector<4x8x8xf32>
    %97 = vector.extract_strided_slice %60 {offsets = [0, 0], sizes = [16, 8], strides = [1, 1]} : vector<16x32xf32> to vector<16x8xf32>
    %98 = vector.extract_strided_slice %60 {offsets = [0, 8], sizes = [16, 8], strides = [1, 1]} : vector<16x32xf32> to vector<16x8xf32>
    %99 = vector.extract_strided_slice %60 {offsets = [0, 16], sizes = [16, 8], strides = [1, 1]} : vector<16x32xf32> to vector<16x8xf32>
    %100 = vector.extract_strided_slice %60 {offsets = [0, 24], sizes = [16, 8], strides = [1, 1]} : vector<16x32xf32> to vector<16x8xf32>
    %101 = vector.shape_cast %97 : vector<16x8xf32> to vector<1x16x8xf32>
    %102 = vector.shape_cast %98 : vector<16x8xf32> to vector<1x16x8xf32>
    %103 = vector.shape_cast %99 : vector<16x8xf32> to vector<1x16x8xf32>
    %104 = vector.shape_cast %100 : vector<16x8xf32> to vector<1x16x8xf32>
    %105 = tpu.concatenate %101, %102, %103, %104 in 0 : vector<1x16x8xf32>, vector<1x16x8xf32>, vector<1x16x8xf32>, vector<1x16x8xf32> -> vector<4x16x8xf32>
    %106 = vector.extract_strided_slice %85 {offsets = [0, 0], sizes = [16, 8], strides = [1, 1]} : vector<16x32xf32> to vector<16x8xf32>
    %107 = vector.extract_strided_slice %85 {offsets = [0, 8], sizes = [16, 8], strides = [1, 1]} : vector<16x32xf32> to vector<16x8xf32>
    %108 = vector.extract_strided_slice %85 {offsets = [0, 16], sizes = [16, 8], strides = [1, 1]} : vector<16x32xf32> to vector<16x8xf32>
    %109 = vector.extract_strided_slice %85 {offsets = [0, 24], sizes = [16, 8], strides = [1, 1]} : vector<16x32xf32> to vector<16x8xf32>
    %110 = vector.shape_cast %106 : vector<16x8xf32> to vector<1x16x8xf32>
    %111 = vector.shape_cast %107 : vector<16x8xf32> to vector<1x16x8xf32>
    %112 = vector.shape_cast %108 : vector<16x8xf32> to vector<1x16x8xf32>
    %113 = vector.shape_cast %109 : vector<16x8xf32> to vector<1x16x8xf32>
    %114 = tpu.concatenate %110, %111, %112, %113 in 0 : vector<1x16x8xf32>, vector<1x16x8xf32>, vector<1x16x8xf32>, vector<1x16x8xf32> -> vector<4x16x8xf32>
    "tpu.trace_start"() <{level = 10 : i32, message = "gmd,gnd->gmn"}> : () -> ()
    %cst_40 = arith.constant dense<0.000000e+00> : vector<4x8x16xf32>
    %115 = tpu.matmul %96, %105, %cst_40 {dimension_numbers = #tpu.dot_dimension_numbers<[2], [2], [1], [1], [0, 0, 0, 1, 1, 1], [0], [0]>} : vector<4x8x8xf32>, vector<4x16x8xf32>, vector<4x8x16xf32> -> vector<4x8x16xf32>
    "tpu.trace_stop"() : () -> ()
    %cst_41 = arith.constant dense<0xFF800000> : vector<4x8xf32>
    %116 = vector.multi_reduction <maximumf>, %115, %cst_41 [2] : vector<4x8x16xf32> to vector<4x8xf32>
    %117 = vector.shape_cast %116 : vector<4x8xf32> to vector<4x8x1xf32>
    %118 = vector.broadcast %117 : vector<4x8x1xf32> to vector<4x8x16xf32>
    %119 = arith.subf %115, %118 : vector<4x8x16xf32>
    %120 = math.exp %119 : vector<4x8x16xf32>
    %cst_42 = arith.constant dense<0.000000e+00> : vector<4x8xf32>
    %121 = vector.multi_reduction <add>, %120, %cst_42 [2] : vector<4x8x16xf32> to vector<4x8xf32>
    %122 = vector.shape_cast %121 : vector<4x8xf32> to vector<4x8x1xf32>
    "tpu.trace_start"() <{level = 10 : i32, message = "gmn,gnd->gmd"}> : () -> ()
    %cst_43 = arith.constant dense<0.000000e+00> : vector<4x8x8xf32>
    %123 = tpu.matmul %120, %114, %cst_43 {dimension_numbers = #tpu.dot_dimension_numbers<[2], [1], [1], [2], [0, 0, 0, 1, 1, 2], [0], [0]>} : vector<4x8x16xf32>, vector<4x16x8xf32>, vector<4x8x8xf32> -> vector<4x8x8xf32>
    "tpu.trace_stop"() : () -> ()
    %124 = tpu.reciprocal %122 {approx = true} : vector<4x8x1xf32> -> vector<4x8x1xf32>
    %125 = vector.broadcast %124 : vector<4x8x1xf32> to vector<4x8x8xf32>
    %126 = arith.mulf %123, %125 : vector<4x8x8xf32>
    %127 = vector.extract_strided_slice %126 {offsets = [0, 0, 0], sizes = [1, 8, 8], strides = [1, 1, 1]} : vector<4x8x8xf32> to vector<1x8x8xf32>
    %128 = vector.shape_cast %127 : vector<1x8x8xf32> to vector<8x8xf32>
    %129 = vector.extract_strided_slice %126 {offsets = [1, 0, 0], sizes = [1, 8, 8], strides = [1, 1, 1]} : vector<4x8x8xf32> to vector<1x8x8xf32>
    %130 = vector.shape_cast %129 : vector<1x8x8xf32> to vector<8x8xf32>
    %131 = vector.extract_strided_slice %126 {offsets = [2, 0, 0], sizes = [1, 8, 8], strides = [1, 1, 1]} : vector<4x8x8xf32> to vector<1x8x8xf32>
    %132 = vector.shape_cast %131 : vector<1x8x8xf32> to vector<8x8xf32>
    %133 = vector.extract_strided_slice %126 {offsets = [3, 0, 0], sizes = [1, 8, 8], strides = [1, 1, 1]} : vector<4x8x8xf32> to vector<1x8x8xf32>
    %134 = vector.shape_cast %133 : vector<1x8x8xf32> to vector<8x8xf32>
    %135 = tpu.concatenate %128, %130, %132, %134 in 1 : vector<8x8xf32>, vector<8x8xf32>, vector<8x8xf32>, vector<8x8xf32> -> vector<8x32xf32>
    %c0_44 = arith.constant 0 : index
    %c0_45 = arith.constant 0 : index
    %136 = vector.load %arg13[%c0_44, %c0_45] : memref<32x32xf32, #tpu.memory_space<vmem>>, vector<32x32xf32>
    %cst_46 = arith.constant dense<0.000000e+00> : vector<8x32xf32>
    %137 = tpu.matmul %135, %136, %cst_46 {dimension_numbers = #tpu.dot_dimension_numbers<[1], [0], [0], [1], [0, 0, 1, 1], [], []>} : vector<8x32xf32>, vector<32x32xf32>, vector<8x32xf32> -> vector<8x32xf32>
    %c0_47 = arith.constant 0 : index
    %c0_48 = arith.constant 0 : index
    %138 = vector.load %arg14[%c0_47, %c0_48] : memref<1x32xf32, #tpu.memory_space<vmem>>, vector<1x32xf32>
    %139 = vector.broadcast %138 : vector<1x32xf32> to vector<8x32xf32>
    %140 = arith.addf %137, %139 : vector<8x32xf32>
    %c0_49 = arith.constant 0 : index
    %c0_50 = arith.constant 0 : index
    %141 = vector.load %arg15[%c0_49, %c0_50] : memref<8x32xf32, #tpu.memory_space<vmem>>, vector<8x32xf32>
    tpu.vector_store %arg15[%c0_49, %c0_50], %140 {strides = array<i32>} : memref<8x32xf32, #tpu.memory_space<vmem>>, vector<8x32xf32>,
    return
  }
  func.func @transform_0(%arg0: i32) -> (i32, i32) {
    %c0_i32 = arith.constant 0 : i32
    %c0_i32_0 = arith.constant 0 : i32
    return %arg0, %c0_i32 : i32, i32
  }
  func.func @transform_1(%arg0: i32) -> (i32, i32) {
    %c0_i32 = arith.constant 0 : i32
    %c0_i32_0 = arith.constant 0 : i32
    return %arg0, %c0_i32 : i32, i32
  }
  func.func @transform_2(%arg0: i32) -> (i32, i32) {
    %c0_i32 = arith.constant 0 : i32
    %c0_i32_0 = arith.constant 0 : i32
    %c0_i32_1 = arith.constant 0 : i32
    return %c0_i32, %c0_i32_0 : i32, i32
  }
  func.func @transform_3(%arg0: i32) -> (i32, i32) {
    %c0_i32 = arith.constant 0 : i32
    %c0_i32_0 = arith.constant 0 : i32
    %c0_i32_1 = arith.constant 0 : i32
    return %c0_i32, %c0_i32_0 : i32, i32
  }
  func.func @transform_4(%arg0: i32) -> (i32, i32) {
    %c0_i32 = arith.constant 0 : i32
    %c0_i32_0 = arith.constant 0 : i32
    %c0_i32_1 = arith.constant 0 : i32
    return %c0_i32, %c0_i32_0 : i32, i32
  }
  func.func @transform_5(%arg0: i32) -> (i32, i32) {
    %c0_i32 = arith.constant 0 : i32
    %c0_i32_0 = arith.constant 0 : i32
    %c0_i32_1 = arith.constant 0 : i32
    return %c0_i32, %c0_i32_0 : i32, i32
  }
  func.func @transform_6(%arg0: i32) -> (i32, i32) {
    %c0_i32 = arith.constant 0 : i32
    %c0_i32_0 = arith.constant 0 : i32
    %c0_i32_1 = arith.constant 0 : i32
    return %c0_i32, %c0_i32_0 : i32, i32
  }
  func.func @transform_7(%arg0: i32) -> (i32, i32) {
    %c0_i32 = arith.constant 0 : i32
    %c0_i32_0 = arith.constant 0 : i32
    %c0_i32_1 = arith.constant 0 : i32
    return %c0_i32, %c0_i32_0 : i32, i32
  }
  func.func @transform_8(%arg0: i32) -> (i32, i32) {
    %c0_i32 = arith.constant 0 : i32
    %c0_i32_0 = arith.constant 0 : i32
    %c0_i32_1 = arith.constant 0 : i32
    return %c0_i32, %c0_i32_0 : i32, i32
  }
  func.func @transform_9(%arg0: i32) -> (i32, i32) {
    %c0_i32 = arith.constant 0 : i32
    %c0_i32_0 = arith.constant 0 : i32
    %c0_i32_1 = arith.constant 0 : i32
    return %c0_i32, %c0_i32_0 : i32, i32
  }
  func.func @transform_10(%arg0: i32) -> (i32, i32) {
    %c0_i32 = arith.constant 0 : i32
    %c0_i32_0 = arith.constant 0 : i32
    %c0_i32_1 = arith.constant 0 : i32
    return %c0_i32, %c0_i32_0 : i32, i32
  }
  func.func @transform_11(%arg0: i32) -> (i32, i32) {
    %c0_i32 = arith.constant 0 : i32
    %c0_i32_0 = arith.constant 0 : i32
    %c0_i32_1 = arith.constant 0 : i32
    return %c0_i32, %c0_i32_0 : i32, i32
  }
  func.func @transform_12(%arg0: i32) -> (i32, i32) {
    %c0_i32 = arith.constant 0 : i32
    %c0_i32_0 = arith.constant 0 : i32
    %c0_i32_1 = arith.constant 0 : i32
    return %c0_i32, %c0_i32_0 : i32, i32
  }
  func.func @transform_13(%arg0: i32) -> (i32, i32) {
    %c0_i32 = arith.constant 0 : i32
    %c0_i32_0 = arith.constant 0 : i32
    %c0_i32_1 = arith.constant 0 : i32
    return %c0_i32, %c0_i32_0 : i32, i32
  }
  func.func @transform_14(%arg0: i32) -> (i32, i32) {
    %c0_i32 = arith.constant 0 : i32
    %c0_i32_0 = arith.constant 0 : i32
    return %arg0, %c0_i32 : i32, i32
  }
}

</mosaic_0001>

<bundles_post_ra>
// kernel: tpu_custom_call.1
= control target key start
LH: loop header
LB: loop body
LE: loop exit
PB: predicated region body
PF: predicated region fallthrough
CT: control target
= control target key end

     0   :  { %s3852_s0 = inlined_call_operand.hbm [shape: f32[32,32], index: 0, kind: input, shape index: {}]   ;;  %s3853_s1 = inlined_call_operand.hbm [shape: f32[16,32], index: 1, kind: input, shape index: {}]   ;;  %s3854_s2 = inlined_call_operand.hbm [shape: f32[32,32], index: 2, kind: input, shape index: {}]   ;;  %s3855_s3 = inlined_call_operand.vmem [shape: f32[1,32], index: 3, kind: input, shape index: {}]   ;;  %s3856_s4 = inlined_call_operand.vmem [shape: f32[1,32], index: 4, kind: input, shape index: {}]   ;;  %s3857_s5 = inlined_call_operand.vmem [shape: f32[1,32], index: 5, kind: input, shape index: {}]   ;;  %s3858_s6 = inlined_call_operand.hbm [shape: f32[32,64], index: 6, kind: input, shape index: {}]   ;;  %s3859_s7 = inlined_call_operand.vmem [shape: f32[1,64], index: 7, kind: input, shape index: {}]   ;;  %s3860_s8 = inlined_call_operand.vmem [shape: f32[1,32], index: 8, kind: input, shape index: {}]   ;;  %s3861_s9 = inlined_call_operand.vmem [shape: f32[1,32], index: 9, kind: input, shape index: {}]   ;;  %s3862_s10 = inlined_call_operand.vmem [shape: f32[1,32], index: 10, kind: input, shape index: {}]   ;;  %s3863_s11 = inlined_call_operand.vmem [shape: f32[1,32], index: 11, kind: input, shape index: {}]   ;;  %s3864_s12 = inlined_call_operand.hbm [shape: f32[32,32], index: 12, kind: input, shape index: {}]   ;;  %s3865_s13 = inlined_call_operand.vmem [shape: f32[1,32], index: 13, kind: input, shape index: {}]   ;;  %s3866_s14 = inlined_call_operand.hbm [shape: f32[16,32], index: 14, kind: output, shape index: {}]  }
   0x1   :  { %3881 = sst [smem:[#allocation23_spill]] %s3852_s0 }
   0x2   :  { %3882 = sst [smem:[#allocation24_spill]] %s3854_s2 }
   0x3   :  { %3883 = sst [smem:[#allocation25_spill]] %s3858_s6 }
   0x4   :  { %3884 = sst [smem:[#allocation26_spill]] %s3864_s12 }
   0x5   :  { %3885 = sst [smem:[#allocation27_spill]] %s3865_s13 }
   0x6   :  { %3886 = sst [smem:[#allocation28_spill]] %s3866_s14 }
   0x7   :  { %19 = vsyncpa [#allocation3], 0 }
   0x8   :  { %21 = vsyncpa [#allocation3 + $0x1], 0 }
   0x9   :  { %22 = vsyncpa [#allocation6], 0 }
   0xa   :  { %24 = vsyncpa [#allocation6 + $0x1], 0 }
   0xb   :  { %25 = vsyncpa [#allocation9], 0 }
   0xc   :  { %26 = vsyncpa [#allocation4], 0 }
   0xd   :  { %28 = vsyncpa [#allocation4 + $0x1], 0  ;;  %s3282_s29 = smov 0   ;;  %s3284_s30 = smov 0  }
   0xe   :  { %s3286_s15 = smov 0   ;;  %s3288_s16 = smov 0  }
   0xf LB: > { %3887 = sst [smem:[#allocation17_spill]] %s3173_s29  ;;  %s3303_s17 = sadd.s32 4294967295, %s3185_s16   ;;  %s3185_s16 = sphi %s3288_s16, %s3921_s16   ;;  %s3181_s15 = sphi %s3286_s15, %s3926_s15   ;;  %s3177_s30 = sphi %s3284_s30, %s3925_s30   ;;  %s3173_s29 = sphi %s3282_s29, %s3924_s29  }
  0x10   : > { %3888 = sst [smem:[#allocation18_spill]] %s3181_s15  ;;  %s2660_s18 = sadd.s32 4294967294, %s3185_s16  }
  0x11   : > { %p54_p0 = scmp.ne.s32.totalorder %s3177_s30, %s3173_s29  ;;  %p3870_p1 = scmp.eq.s32.totalorder %s3303_s17, 0 }
  0x12   : > { %p356_p2 = scmp.eq.s32.totalorder %s3303_s17, 1  ;;  %p362_p3 = scmp.eq.s32.totalorder %s2660_s18, 1 }
  0x13   : > { %p3312_p4 = por %p3870_p1, %p54_p0  ;;  %p2661_p5 = scmp.ge.s32.totalorder %s3185_s16, 1 }
  0x14   : > { %p3317_p6 = por %p362_p3, %p54_p0  ;;  %p369_p7 = scmp.lt.s32.totalorder %s3185_s16, 3 }
  0x15   : > { %s3889_s19 = scalar_select %p3312_p4, 1, 0 }
  0x16   : > { %s3890_s20 = scalar_select %p3317_p6, 1, 0 }
  0x17   : > { %p3322_p8 = pnand %p2661_p5, %p369_p7  ;;  %s3187_s22 = smov [#allocation7]  }
  0x18   : > { %3891 = sst [smem:[#allocation19_spill]] %s3890_s20  ;;  %s381_s23 = sshll.u32 %s3187_s22, 4  ;;  %s382_s23 = int_to_ptr.vmem [resolvable:$true] %s381_s23 }
  0x19   : > { %s3892_s21 = scalar_select %p3322_p8, 1, 0 }
  0x1a   : > { %p2871_p9 = pneg %p3322_p8  ;;  %s3188_s25 = smov [#allocation8]  }
  0x1b   : > { %s403_s26 = sshll.u32 %s3188_s25, 4  ;;  %s3189_s27 = smov [#allocation10]   ;;  %s404_s26 = int_to_ptr.vmem [resolvable:$true] %s403_s26 }
  0x1c   : > { %p3331_p11 = pnand %p2871_p9, %p3870_p1  ;;  %s431_s28 = sshll.u32 %s3189_s27, 4  ;;  %s432_s28 = int_to_ptr.vmem [resolvable:$true] %s431_s28 }
  0x1d   : > { %s2986_s18 = scalar_lea.vmem %s382_s23, 512  ;;  %p2994_p5 = scmp.lt.s32.totalorder %s382_s23, %s382_s23 }
  0x1e   : > { %p2977_p12 = pneg %p3331_p11  ;;  %p2987_p13 = scmp.ne.s32.totalorder %s382_s23, %s2986_s18 }
  0x1f   : > { %p2995_p7 = scmp.lt.s32.totalorder %s2986_s18, %s2986_s18 }
  0x20   : > { %p2989_p0 = pnand %p2987_p13, %p2977_p12 }
  0x21   : > { %p2996_p9 = por %p2995_p7, %p2994_p5 }
  0x22   : > { %p2990_p3 = pneg %p2989_p0 }
  0x24   : > { %p2997_p10 = pnand %p2996_p9, %p2990_p3 }
  0x26   : > { %3000 = shalt.err (!%p2997_p10)
}
  0x27   : > { %s3871_s22 = smov 128   ;;  %s3872_s25 = smov 8  }
  0x28   : > { %s3894_s2 = sld [smem:[#allocation24_spill]]  ;;  %s3012_s29 = scalar_lea.vmem %s404_s26, 512 }
  0x29   : > { %p3013_p13 = scmp.ne.s32.totalorder %s404_s26, %s3012_s29  ;;  %p3020_p3 = scmp.lt.s32.totalorder %s404_s26, %s404_s26 }
  0x2a   : > { %p3021_p10 = scmp.lt.s32.totalorder %s3012_s29, %s3012_s29 }
  0x2b   : > { %p3015_p0 = pnand %p3013_p13, %p2977_p12 }
  0x2c   : > { %p3022_p7 = por %p3021_p10, %p3020_p3 }
  0x2d   : > { %p3016_p5 = pneg %p3015_p0 }
  0x2e   : > { %2874 = dma.hbm_to_vmem [thread:$0]  (!%p3331_p11), %s3894_s2, 512, %s382_s23, [#allocation6], %s3871_s22, %s3871_s22, %s3872_s25  }
  0x2f   : > { %p3023_p9 = pnand %p3022_p7, %p3016_p5 }
  0x31   : > { %3026 = shalt.err (!%p3023_p9)
}
  0x32   : > { %s3895_s6 = sld [smem:[#allocation25_spill]]  ;;  %s3038_s20 = scalar_lea.vmem %s432_s28, 512 }
  0x33   : > { %p3039_p1 = scmp.ne.s32.totalorder %s432_s28, %s3038_s20  ;;  %p3046_p3 = scmp.lt.s32.totalorder %s432_s28, %s432_s28 }
  0x34   : > { %p3047_p5 = scmp.lt.s32.totalorder %s3038_s20, %s3038_s20 }
  0x35   : > { %p3041_p13 = pnand %p3039_p1, %p2977_p12 }
  0x36   : > { %p3048_p10 = por %p3047_p5, %p3046_p3 }
  0x37   : > { %p3042_p0 = pneg %p3041_p13 }
  0x38   : > { %2877 = dma.hbm_to_vmem [thread:$0]  (!%p3331_p11), %s3895_s6, 512, %s404_s26, [#allocation9], %s3871_s22, %s3871_s22, %s3872_s25  }
  0x39   : > { %p3049_p7 = pnand %p3048_p10, %p3042_p0 }
  0x3b   : > { %3052 = shalt.err (!%p3049_p7)
}
  0x3c   : > { %s3896_s12 = sld [smem:[#allocation26_spill]]  ;;  %s3371_s23 = sadd.s32 1, %s3185_s16  }
  0x3d   : > { %3897 = sst [smem:[#allocation20_spill]] %s3371_s23  ;;  %s38_s24 = ssub.s32 %s3185_s16, %s3371_s23 }
  0x3e   : > { %s41_s26 = sadd.s32 1, %s3181_s15  ;;  %p39_p1 = scmp.eq.s32.totalorder %s38_s24, 0 }
  0x3f   : > { %p48_p12 = scmp.ne.s32.totalorder %s3181_s15, %s3177_s30  ;;  %p49_p9 = scmp.eq.s32.totalorder %s3185_s16, 0 }
  0x40   : > { %p2895_p13 = scmp.lt.s32.totalorder %s3185_s16, 2  ;;  %s3390_s20 = sand.u32 1, %s3181_s15  }
  0x41   : > { %s3381_s27 = scalar_select %p39_p1, %s3181_s15, %s41_s26  }
  0x42   : > { %2880 = dma.hbm_to_vmem [thread:$0]  (!%p3331_p11), %s3896_s12, 512, %s432_s28, [#allocation9], %s3871_s22, %s3871_s22, %s3872_s25  }
  0x43   : > { %3898 = sst [smem:[#allocation21_spill]] %s3381_s27  ;;  %p50_p0 = por %p49_p9, %p48_p12 }
  0x44   : > { %p3385_p3 = por %p356_p2, %p48_p12  ;;  %s2723_s28 = sshll.u32 %s3185_s16, 8 }
  0x45   : > { %s2666_s14 = sshll.u32 %s3390_s20, 4  ;;  %s3901_s0 = sld [smem:[#allocation23_spill]] }
  0x46   : > { %s3899_s18 = scalar_select %p3385_p3, 1, 0 }
  0x47   : > { %s452_s26 = scalar_lea.vmem [#allocation2], %s2666_s14  ;;  %p3399_p2 = pnand %p2895_p13, %p50_p0 }
  0x48   : > { %3900 = sst [smem:[#allocation22_spill]] %s3899_s18  ;;  %s459_s25 = sshll.u32 %s452_s26, 4  ;;  %s3403_s25 = int_to_ptr.vmem [resolvable:$true] %s459_s25 }
  0x49   : > { %p3055_p5 = pneg %p3399_p2 }
  0x4b   : > { %s3397_s24 = scalar_lea.hbm %s3901_s0, %s2723_s28  ;;  %s3058_s14 = scalar_lea.hbm %s3901_s0, 512 }
  0x4c   : > { %s3053_s27 = scalar_lea.hbm %s3397_s24, 256  ;;  %p3059_p1 = scmp.lt.s32.totalorder %s3397_s24, %s3901_s0 }
  0x4d   : > { %p3054_p11 = scmp.ne.s32.totalorder %s3397_s24, %s3053_s27  ;;  %p3060_p12 = scmp.lt.s32.totalorder %s3058_s14, %s3053_s27 }
  0x4f   : > { %p3056_p10 = pnand %p3055_p5, %p3054_p11  ;;  %p3061_p9 = por %p3060_p12, %p3059_p1 }
  0x51   : > { %p3057_p7 = pneg %p3056_p10 }
  0x53   : > { %p3062_p13 = pnand %p3061_p9, %p3057_p7 }
  0x55   : > { %3065 = shalt.err (!%p3062_p13)
}
  0x56   : > { %s3066_s6 = scalar_lea.vmem %s3403_s25, 256  ;;  %s3192_s22 = smov [#allocation2]  }
  0x57   : > { %p3067_p0 = scmp.ne.s32.totalorder %s3403_s25, %s3066_s6  ;;  %s3071_s28 = sshll.u32 %s3192_s22, 4  ;;  %s3072_s28 = int_to_ptr.vmem [resolvable:$false] %s3071_s28 }
  0x58   : > { %s3073_s12 = scalar_lea.vmem %s3072_s28, 512  ;;  %p3074_p6 = scmp.lt.s32.totalorder %s3403_s25, %s3072_s28 }
  0x59   : > { %p3069_p11 = pnand %p3067_p0, %p3055_p5  ;;  %p3075_p3 = scmp.lt.s32.totalorder %s3073_s12, %s3066_s6 }
  0x5b   : > { %p3070_p10 = pneg %p3069_p11  ;;  %p3076_p4 = por %p3075_p3, %p3074_p6 }
  0x5d   : > { %p3077_p1 = pnand %p3076_p4, %p3070_p10 }
  0x5f   : > { %3080 = shalt.err (!%p3077_p1)
}
  0x60   : > { %s3903_s27 = smov 8   ;;  %s3904_s14 = smov 128  }
  0x61   : > { %s3905_s29 = scalar_lea.sflag [#allocation3], %s3390_s20  ;;  %s2669_s26 = sshll.u32 %s3390_s20, 3 }
  0x62   : > { %2884 = dma.hbm_to_vmem [thread:$0]  (!%p3399_p2), %s3397_s24, 256, %s3403_s25, %s3905_s29, %s3904_s14, %s3904_s14, %s3903_s27  }
  0x63   : > { %s2670_s22 = sshll.u32 %s3185_s16, 7  ;;  %s473_s0 = scalar_lea.vmem [#allocation5], %s2669_s26 }
  0x64   : > { %s3441_s28 = scalar_lea.hbm %s3853_s1, %s2670_s22  ;;  %s480_s15 = sshll.u32 %s473_s0, 4  ;;  %s481_s15 = int_to_ptr.vmem [resolvable:$true] %s480_s15 }
  0x65   : > { %s3906_s23 = sand.u32 1, %s3185_s16   ;;  %s3081_s18 = scalar_lea.hbm %s3441_s28, 128 }
  0x66   : > { %s470_s13 = scalar_lea.sflag [#allocation6], %s3906_s23  ;;  %p3082_p4 = scmp.ne.s32.totalorder %s3441_s28, %s3081_s18 }
  0x67   : > { %s3086_s24 = scalar_lea.hbm %s3853_s1, 256  ;;  %p3087_p7 = scmp.lt.s32.totalorder %s3441_s28, %s3853_s1 }
  0x68   : > { %p3084_p6 = pnand %p3082_p4, %p3055_p5  ;;  %p3088_p12 = scmp.lt.s32.totalorder %s3086_s24, %s3081_s18 }
  0x6a   : > { %p3085_p3 = pneg %p3084_p6  ;;  %p3089_p9 = por %p3088_p12, %p3087_p7 }
  0x6c   : > { %p3090_p13 = pnand %p3089_p9, %p3085_p3 }
  0x6e   : > { %3093 = shalt.err (!%p3090_p13)
}
  0x6f   : > { %s3094_s0 = scalar_lea.vmem %s481_s15, 128  ;;  %s3193_s23 = smov [#allocation5]  }
  0x70   : > { %p3095_p0 = scmp.ne.s32.totalorder %s481_s15, %s3094_s0  ;;  %s3099_s29 = sshll.u32 %s3193_s23, 4  ;;  %s3100_s29 = int_to_ptr.vmem [resolvable:$false] %s3099_s29 }
  0x71   : > { %s3101_s26 = scalar_lea.vmem %s3100_s29, 256  ;;  %p3102_p1 = scmp.lt.s32.totalorder %s481_s15, %s3100_s29 }
  0x72   : > { %p3097_p11 = pnand %p3095_p0, %p3055_p5  ;;  %p3103_p4 = scmp.lt.s32.totalorder %s3101_s26, %s3094_s0 }
  0x74   : > { %p3098_p10 = pneg %p3097_p11  ;;  %p3104_p6 = por %p3103_p4, %p3102_p1 }
  0x76   : > { %p3105_p8 = pnand %p3104_p6, %p3098_p10 }
  0x78   : > { %3108 = shalt.err (!%p3105_p8)
}
  0x79   : > { %2887 = dma.hbm_to_vmem [thread:$0]  (!%p3399_p2), %s3441_s28, 128, %s481_s15, %s470_s13  }
  0x7a   : > { %p3907_p3 = scmp.ne.s32.totalorder %s3892_s21, 0 }
  0x7b   : > { %s3466_s18 = sand.u32 (!%p3907_p3), 1, %s3177_s30   ;;  %p3908_p5 = scmp.ne.s32.totalorder (!%p3907_p3), %s3889_s19, 0 }
  0x7c   : > { %489 = sbr.rel (%p3907_p3) target bundleno = 1872 (0x750), region = 76  ;;  %s2672_s22 = sshll.u32 (!%p3907_p3), %s3466_s18, 4 }
  0x7d   : > { %s492_s6 = scalar_lea.sflag (!%p3907_p3), [#allocation3], %s3466_s18  ;;  %s3470_s12 = scalar_lea.vmem (!%p3907_p3), [#allocation2], %s2672_s22 }
  0x81   : > { %3152 = dma.done.wait (%p3908_p5), %s492_s6, 256  }
  0x82   : > { %3154 = vsyncadd (%p3908_p5), %s492_s6, 4294967040  ;;  %s500_s2 = sand.u32 1, %s3303_s17   ;;  %s2673_s13 = sshll.u32 %s3466_s18, 3 }
  0x83   : > { %s501_s15 = scalar_lea.sflag [#allocation6], %s500_s2  ;;  %s504_s21 = scalar_lea.vmem [#allocation5], %s2673_s13 }
  0x84   : > { %3156 = dma.done.wait (%p3908_p5), %s501_s15, 128  }
  0x85   : > { %3158 = vsyncadd (%p3908_p5), %s501_s15, 4294967168  ;;  %p3909_p8 = scmp.eq.s32.totalorder %s3303_s17, 0 }
  0x87   : > { %3160 = dma.done.wait (%p3909_p8), [#allocation6], 512   ;;  %p3910_p2 = pmov %p3909_p8 }
  0x89   : > { %3162 = vsyncadd (%p3910_p2), [#allocation6], 4294966784  ;;  %p3911_p7 = pmov %p3910_p2 }
  0x8a   : > { %p3912_p12 = pmov %p3910_p2 }
  0x8b   : > { %3164 = dma.done.wait (%p3911_p7), [#allocation9], 1024  }
  0x8c   : > { %3166 = vsyncadd (%p3912_p12), [#allocation9], 4294966272  ;;  %v3194_v0 = vmov 0.0   ;;  %vm3195_vm0 = vmmov 0   ;;  %v573_v1 = vld [vmem:[#allocation7 + $0x18] sm:$0xff]  ;;  %v572_v3 = vld [vmem:[#allocation7 + $0x10] sm:$0xff] }
  0x8d   : > { %2764 = vmatprep.subr.mxu0 %v3194_v0  ;;  %2772 = vmatprep.mubr.msk.f32.mxu0 %vm3195_vm0, %v3194_v0  ;;  %v688_v2 = vld [vmem:[#allocation8 + $0x18] sm:$0xff]  ;;  %v687_v4 = vld [vmem:[#allocation8 + $0x10] sm:$0xff]  ;;  %v571_v5 = vld [vmem:[#allocation7 + $0x8] sm:$0xff]  ;;  %vm581_vm1 = vcmask 261120   ;;  %s3196_s24 = smov 96   ;;  %s3198_s2 = smov 112  }
  0x8e   : > { %2765 = vmatpush3.msra.mxu0 %v573_v1  ;;  %2775 = vmatprep.subr.mxu1 %v688_v2  ;;  %v686_v6 = vld [vmem:[#allocation8 + $0x8] sm:$0xff]  ;;  %v570_v7 = vld [vmem:[#allocation7] sm:$0xff]  ;;  %v569_v9 = vld [vmem:[%s504_s21] sm:$0xff]  ;;  %s3199_s15 = smov 104   ;;  %vm1634_vm2 = vcmask 64512   ;;  %s3202_s20 = smov 32  }
  0x8f   : > { %2766 = vmatprep.subr.mxu0 %v3194_v0  ;;  %2776 = vmatpush3.msra.mxu1 %v688_v2  ;;  %v685_v8 = vld [vmem:[#allocation8] sm:$0xff]  ;;  %v568_v11 = vld [vmem:[%s3470_s12 + $0x8] sm:$0xff]  ;;  %v2678_v12 = vld [vmem:[%s3855_s3] ss:$0 sm:$0xff]  ;;  %vm1951_vm3 = vcmask 130048   ;;  %s3204_s27 = smov 8  }
  0x90   : > { %2767 = vmatpush3.msra.mxu0 %v572_v3  ;;  %2777 = vmatprep.subr.mxu1 %v687_v4  ;;  %v567_v10 = vld [vmem:[%s3470_s12] sm:$0xff]  ;;  %s3197_s12 = smov 120   ;;  %s3205_s14 = smov 24   ;;  %vm2438_vm4 = vcmask 195584  }
  0x91   : > { %2768 = vmatprep.subr.mxu0 %v3194_v0  ;;  %2778 = vmatpush3.msra.mxu1 %v687_v4  ;;  %v2682_v14 = vld [vmem:[%s3859_s7] ss:$0 sm:$0xff]  ;;  %s3913_s0 = sld [smem:[#allocation22_spill]]  ;;  %s2720_s22 = sshll.u32 %s3303_s17, 7 }
  0x92   : > { %2769 = vmatpush3.msra.mxu0 %v571_v5  ;;  %2779 = vmatprep.subr.mxu1 %v686_v6  ;;  %v2680_v55 = vld [vmem:[%s3856_s4] ss:$0 sm:$0xff]  ;;  %s3914_s26 = sld [smem:[#allocation27_spill]]  ;;  %s565_s6 = scalar_lea.vmem [#allocation11], %s2673_s13 }
  0x93   : > { %2770 = vmatprep.subr.mxu0 %v3194_v0  ;;  %2780 = vmatpush3.msra.mxu1 %v686_v6  ;;  %v2685_v57 = vld [vmem:[%s3860_s8] ss:$0 sm:$0xff]  ;;  %s3915_s21 = sld [smem:[#allocation28_spill]]  ;;  %s2526_s28 = scalar_lea.sflag [#allocation4], %s3466_s18 }
  0x94   : > { %2771 = vmatpush3.msra.mxu0 %v570_v7  ;;  %2781 = vmatprep.subr.mxu1 %v685_v8  ;;  %v2686_v61 = vld [vmem:[%s3861_s9] ss:$0 sm:$0xff]  ;;  %s3206_s17 = smov [#allocation11]  }
  0x95   : > { %2773 = vmatmul.mubr.msk.f32.vlgmr.msra.gmra.mxu0 %vm581_vm1, %v569_v9  ;;  %2782 = vmatpush3.msra.mxu1 %v685_v8  ;;  %v2681_v63 = vld [vmem:[%s3857_s5] ss:$0 sm:$0xff]  ;;  %v3200_v9 = vmov 1983009808   ;;  %s3113_s13 = sshll.u32 %s3206_s17, 4  ;;  %s3114_s13 = int_to_ptr.vmem [resolvable:$false] %s3113_s13 }
  0x96   : > { %2783 = vmatprep.mubr.msk.f32.mxu1 %vm581_vm1, %v567_v10  ;;  %2786 = vmatprep.subr.mxu0 %v3194_v0  ;;  %v899_v10 = vunpack.c.l.s4 %v3200_v9 }
  0x97   : > { %2784 = vmatmul.mubr.msk.f32.vlgmr.msra.gmra.mxu1 %vm581_vm1, %v568_v11  ;;  %2793 = vmatprep.subr.mxu1 %v3194_v0  ;;  %p3916_p13 = scmp.ne.s32.totalorder %s3913_s0, 0 }
  0x98   : > { %2790 = vmatprep.mubr.msk.f32.mxu0 %vm3195_vm0, %v3194_v0  ;;  %2797 = vmatprep.mubr.msk.f32.mxu1 %vm3195_vm0, %v3194_v0 }
  0x99   : > { %s3814_s19 = scalar_lea.hbm %s3915_s21, %s2720_s22 }
 0x155   : > { %v651_v13 = vpop.f32.mrf.mxu0 }
 0x156   : > { %v652_v15 = vadd.f32 %v2678_v12, %v651_v13  ;;  %v901_v13 = vlaneseq }
 0x157   : > { %v2785_v16 = vpop.f32.mrf.mxu1  ;;  %v2774_v17 = vpop.f32.mrf.mxu0 }
 0x158   : > { %v3515_v18 = vadd.f32 %v2785_v16, %v2682_v14  ;;  %v657_v19 = vsel %vm581_vm1, %v652_v15, 0.0 }
 0x159   : > { %v768_v20 = vpop.f32.mrf.mxu1  ;;  %658 = vadd.xlane.f32.xlu1 %v657_v19  ;;  %v3201_v19 = vmov 1934713408  }
 0x15a   : > { %v3518_v21 = vadd.f32 %v2682_v14, %v768_v20  ;;  %v782_v22 = vsel %vm581_vm1, %v3515_v18, 0.0  ;;  %v931_v20 = vunpack.c.l.s4 %v3201_v19 }
 0x15b   : > { %783 = vadd.xlane.f32.xlu0 %v782_v22 }
 0x15c   : > { %v779_v23 = vsel %vm581_vm1, %v3518_v21, 0.0 }
 0x15f   : > { %780 = vadd.xlane.f32.xlu0 %v779_v23  ;;  %v900_v23 = vunpack.c.0.s8 %v899_v10 }
 0x1e2   : > { %v659_v24 = vpop.xlane.xlu1 %658 }
 0x1e3   : > { %v661_v25 = vmul.f32 0.03125, %v659_v24 }
 0x1e4   : > { %v784_v26 = vpop.xlane.xlu0 %783 }
 0x1e5   : > { %v662_v27 = vsub.f32 %v652_v15, %v661_v25  ;;  %v786_v28 = vmul.f32 0.03125, %v784_v26 }
 0x1e7   : > { %v788_v29 = vsub.f32 %v3515_v18, %v786_v28  ;;  %v663_v30 = vmul.f32 %v662_v27, %v662_v27 }
 0x1e8   : > { %v781_v31 = vpop.xlane.xlu0 %780 }
 0x1e9   : > { %v785_v32 = vmul.f32 0.03125, %v781_v31  ;;  %v664_v33 = vsel %vm581_vm1, %v663_v30, 0.0  ;;  %v790_v34 = vmul.f32 %v788_v29, %v788_v29 }
 0x1ea   : > { %665 = vadd.xlane.f32.xlu1 %v664_v33 }
 0x1eb   : > { %v787_v35 = vsub.f32 %v3518_v21, %v785_v32  ;;  %v794_v36 = vsel %vm581_vm1, %v790_v34, 0.0 }
 0x1ed   : > { %v789_v37 = vmul.f32 %v787_v35, %v787_v35 }
 0x1ee   : > { %795 = vadd.xlane.f32.xlu1 %v794_v36 }
 0x1ef   : > { %v791_v38 = vsel %vm581_vm1, %v789_v37, 0.0 }
 0x1f0   : > { %792 = vadd.xlane.f32.xlu0 %v791_v38 }
 0x1ff   : > { %825 = vrot.lane.b32.xlu1 %v3518_v21, %s3196_s24 }
 0x206   : > { %827 = vrot.lane.b32.xlu0 %v3515_v18, %s3196_s24 }
 0x273   : > { %v666_v39 = vpop.xlane.xlu1 %665 }
 0x274   : > { %v667_v40 = vmul.f32 0.03125, %v666_v39 }
 0x276   : > { %v668_v41 = vadd.f32 1e-05, %v667_v40 }
 0x277   : > { %v796_v42 = vpop.xlane.xlu1 %795 }
 0x278   : > { %2949 = vrsqrt.f32 %v668_v41  ;;  %v798_v43 = vmul.f32 0.03125, %v796_v42 }
 0x279   : > { %v793_v44 = vpop.xlane.xlu0 %792 }
 0x27a   : > { %v800_v45 = vadd.f32 1e-05, %v798_v43  ;;  %v797_v46 = vmul.f32 0.03125, %v793_v44 }
 0x27b   : > { %v826_v47 = vpop.permute.xlu1 %825 }
 0x27c   : > { %2951 = vrsqrt.f32 %v800_v45  ;;  %v799_v48 = vadd.f32 1e-05, %v797_v46  ;;  %v831_v49 = vsel %vm581_vm1, %v826_v47, 0.0 }
 0x27d   : > { %v828_v50 = vpop.permute.xlu0 %827  ;;  %832 = vadd.xlane.f32.xlu0 %v831_v49 }
 0x27e   : > { %2953 = vrsqrt.f32 %v799_v48  ;;  %v834_v51 = vsel %vm581_vm1, %v828_v50, 0.0 }
 0x27f   : > { %835 = vadd.xlane.f32.xlu1 %v834_v51 }
 0x285   : > { %v2950_v52 = vpop.eup %2949 }
 0x286   : > { %v670_v53 = vmul.f32 %v2950_v52, %v662_v27 }
 0x288   : > { %v677_v60 = vmul.f32 %v2680_v55, %v670_v53 }
 0x289   : > { %v2952_v54 = vpop.eup %2951 }
 0x28a   : > { %v804_v56 = vmul.f32 %v2952_v54, %v788_v29  ;;  %v684_v3 = vadd.f32 %v2681_v63, %v677_v60 }
 0x28b   : > { %v2954_v58 = vpop.eup %2953 }
 0x28c   : > { %v803_v59 = vmul.f32 %v2954_v58, %v787_v35  ;;  %v812_v62 = vmul.f32 %v2685_v57, %v804_v56  ;;  %v3552_v5 = vmul.f32 0.35355338, %v684_v3 }
 0x28e   : > { %v811_v1 = vmul.f32 %v2685_v57, %v803_v59  ;;  %v820_v4 = vadd.f32 %v2686_v61, %v812_v62 }
 0x290   : > { %v3547_v2 = vadd.f32 %v2686_v61, %v811_v1 }
 0x292   : > { %1034 = vrot.lane.b32.xlu1 %v3547_v2, %s3197_s12 }
 0x293   : > { %1036 = vrot.lane.b32.xlu0 %v820_v4, %s3197_s12 }
 0x296   : > { %887 = vrot.lane.b32.xlu1 %v3552_v5, %s3197_s12 }
 0x297   : > { %1042 = vrot.lane.b32.xlu0 %v820_v4, %s3198_s2 }
 0x29a   : > { %890 = vrot.lane.b32.xlu1 %v3552_v5, %s3198_s2 }
 0x29b   : > { %1048 = vrot.lane.b32.xlu0 %v820_v4, %s3199_s15 }
 0x29e   : > { %1046 = vrot.lane.b32.xlu1 %v3547_v2, %s3199_s15 }
 0x29f   : > { %1040 = vrot.lane.b32.xlu0 %v3547_v2, %s3198_s2 }
 0x2a2   : > { %893 = vrot.lane.b32.xlu1 %v3552_v5, %s3199_s15 }
 0x306   : > { %v833_v6 = vpop.xlane.xlu0 %832 }
 0x307   : > { %v837_v7 = vmul.f32 0.03125, %v833_v6 }
 0x308   : > { %v836_v8 = vpop.xlane.xlu1 %835 }
 0x309   : > { %v3567_v11 = vsub.f32 %v3518_v21, %v837_v7  ;;  %v838_v12 = vmul.f32 0.03125, %v836_v8  ;;  %v902_v21 = vshrl.u32 %v901_v13, 7 }
 0x30a   : > { %v1037_v14 = vpop.permute.xlu0 %1036 }
 0x30b   : > { %v3570_v15 = vsub.f32 %v3515_v18, %v838_v12  ;;  %v841_v16 = vmul.f32 %v3567_v11, %v3567_v11  ;;  %v932_v18 = vunpack.c.0.s8 %v931_v20  ;;  %v3580_v26 = vsub.s32 %v900_v23, %v902_v21 }
 0x30c   : > { %v1035_v17 = vpop.permute.xlu1 %1034 }
 0x30d   : > { %845 = vrot.lane.b32.xlu0 %v841_v16, %s3196_s24  ;;  %v842_v22 = vmul.f32 %v3570_v15, %v3570_v15  ;;  %v3582_v32 = vsub.s32 %v932_v18, %v902_v21 }
 0x30e   : > { %v1043_v24 = vpop.permute.xlu0 %1042 }
 0x30f   : > { %847 = vrot.lane.b32.xlu1 %v842_v22, %s3196_s24  ;;  %v1120_v27 = vcombine.low %v820_v4, %v1043_v24  ;;  %v1121_v28 = vcombine.high %v820_v4, %v1043_v24 }
 0x310   : > { %v3578_v25 = vpop.permute.xlu1 %887 }
 0x311   : > { %v1128_v34 = vrot.slane %v1120_v27, %v3580_v26  ;;  %v1135_v35 = vrot.slane %v1121_v28, %v3580_v26 }
 0x312   : > { %v1049_v29 = vpop.permute.xlu0 %1048 }
 0x313   : > { %v1136_v30 = vcombine.low %v1037_v14, %v1049_v29  ;;  %v1137_v31 = vcombine.high %v1037_v14, %v1049_v29 }
 0x314   : > { %v891_v33 = vpop.permute.xlu1 %890 }
 0x315   : > { %v1144_v36 = vrot.slane %v1136_v30, %v3580_v26  ;;  %v1151_v37 = vrot.slane %v1137_v31, %v3580_v26  ;;  %v896_v43 = vcombine.low %v3552_v5, %v891_v33  ;;  %v897_v44 = vcombine.high %v3552_v5, %v891_v33 }
 0x316   : > { %v1041_v38 = vpop.permute.xlu0 %1040 }
 0x317   : > { %v1152_v39 = vcombine.low %v1128_v34, %v1144_v36  ;;  %v1153_v40 = vcombine.high %v1128_v34, %v1144_v36  ;;  %v1168_v41 = vcombine.low %v1135_v35, %v1151_v37  ;;  %v1169_v42 = vcombine.high %v1135_v35, %v1151_v37 }
 0x318   : > { %v1052_v45 = vcombine.low %v3547_v2, %v1041_v38  ;;  %v1053_v46 = vcombine.high %v3547_v2, %v1041_v38  ;;  %v1047_v47 = vpop.permute.xlu1 %1046  ;;  %v904_v10 = vrot.slane %v896_v43, %v3580_v26  ;;  %v911_v12 = vrot.slane %v897_v44, %v3580_v26 }
 0x319   : > { %v1160_v48 = vrot.slane %v1152_v39, %v3582_v32  ;;  %v1167_v49 = vrot.slane %v1153_v40, %v3582_v32  ;;  %v1176_v50 = vrot.slane %v1168_v41, %v3582_v32  ;;  %v1183_v51 = vrot.slane %v1169_v42, %v3582_v32 }
 0x31a   : > { %v1060_v52 = vrot.slane %v1052_v45, %v3580_v26  ;;  %v1067_v53 = vrot.slane %v1053_v46, %v3580_v26  ;;  %v1068_v54 = vcombine.low %v1035_v17, %v1047_v47  ;;  %v1069_v55 = vcombine.high %v1035_v17, %v1047_v47 }
 0x31b   : > { %v1256_v56 = vcombine.low %v1160_v48, %v1167_v49  ;;  %v2693_v57 = vcombine.high %v1160_v48, %v1167_v49  ;;  %v1272_v58 = vcombine.low %v1176_v50, %v1183_v51  ;;  %v2694_v59 = vcombine.high %v1176_v50, %v1183_v51 }
 0x31c   : > { %v1076_v60 = vrot.slane %v1068_v54, %v3580_v26  ;;  %v1083_v61 = vrot.slane %v1069_v55, %v3580_v26  ;;  %v894_v7 = vpop.permute.xlu1 %893 }
 0x31d   : > { %v3601_v62 = vrot.slane %v1256_v56, %v3580_v26  ;;  %v3604_v63 = vrot.slane %v2693_v57, %v3580_v26  ;;  %v3607_v1 = vrot.slane %v1272_v58, %v3580_v26  ;;  %v3610_v2 = vrot.slane %v2694_v59, %v3580_v26 }
 0x31e   : > { %v1084_v3 = vcombine.low %v1060_v52, %v1076_v60  ;;  %v1085_v4 = vcombine.high %v1060_v52, %v1076_v60  ;;  %v1100_v5 = vcombine.low %v1067_v53, %v1083_v61  ;;  %v1101_v6 = vcombine.high %v1067_v53, %v1083_v61 }
 0x31f   : > { %v1288_v8 = vcombine.low %v3601_v62, %v3604_v63  ;;  %v1304_v9 = vcombine.low %v3607_v1, %v3610_v2  ;;  %v912_v19 = vcombine.low %v3578_v25, %v894_v7  ;;  %v913_v20 = vcombine.high %v3578_v25, %v894_v7 }
 0x320   : > { %v1092_v13 = vrot.slane %v1084_v3, %v3582_v32  ;;  %v1099_v14 = vrot.slane %v1085_v4, %v3582_v32  ;;  %v1108_v16 = vrot.slane %v1100_v5, %v3582_v32  ;;  %v1115_v17 = vrot.slane %v1101_v6, %v3582_v32 }
 0x321   : > { %v1296_v22 = vrot.slane %v1288_v8, %v3582_v32  ;;  %v1312_v23 = vrot.slane %v1304_v9, %v3582_v32  ;;  %v920_v28 = vrot.slane %v912_v19, %v3580_v26  ;;  %v927_v29 = vrot.slane %v913_v20, %v3580_v26 }
 0x322   : > { %v1188_v21 = vcombine.low %v1092_v13, %v1099_v14  ;;  %v2691_v24 = vcombine.high %v1092_v13, %v1099_v14  ;;  %v1204_v18 = vcombine.low %v1108_v16, %v1115_v17  ;;  %v2692_v27 = vcombine.high %v1108_v16, %v1115_v17 }
 0x323   : > { %v1320_v30 = vcombine.low %v1296_v22, %v1312_v23  ;;  %v1321_v31 = vcombine.high %v1296_v22, %v1312_v23  ;;  %v928_v36 = vcombine.low %v904_v10, %v920_v28  ;;  %v929_v37 = vcombine.high %v904_v10, %v920_v28  ;;  %v2687_v28 = vld [vmem:[%s3862_s10] ss:$0 sm:$0xff] }
 0x324   : > { %v1195_v33 = vrot.slane %v1188_v21, %v3580_v26  ;;  %v1203_v34 = vrot.slane %v2691_v24, %v3580_v26  ;;  %v1211_v25 = vrot.slane %v1204_v18, %v3580_v26  ;;  %v1219_v35 = vrot.slane %v2692_v27, %v3580_v26  ;;  %v2688_v27 = vld [vmem:[%s3863_s11] ss:$0 sm:$0xff] }
 0x325   : > { %v944_v38 = vcombine.low %v911_v12, %v927_v29  ;;  %v945_v39 = vcombine.high %v911_v12, %v927_v29  ;;  %2787 = vmatpush3.xpose.msk.msra.mxu0 %vm1634_vm2, %v1320_v30  ;;  %2794 = vmatpush3.xpose.msk.msra.mxu1 %vm1634_vm2, %v1321_v31  ;;  %v936_v42 = vrot.slane %v928_v36, %v3582_v32 }
 0x326   : > { %v1220_v40 = vcombine.low %v1195_v33, %v1203_v34  ;;  %v1236_v41 = vcombine.low %v1211_v25, %v1219_v35  ;;  %v943_v43 = vrot.slane %v929_v37, %v3582_v32  ;;  %2788 = vmatprep.subr.mxu0 %v3194_v0  ;;  %2795 = vmatprep.subr.mxu1 %v3194_v0 }
 0x327   : > { %v952_v44 = vrot.slane %v944_v38, %v3582_v32  ;;  %v959_v45 = vrot.slane %v945_v39, %v3582_v32  ;;  %v1289_v52 = vcombine.high %v3601_v62, %v3604_v63  ;;  %v1305_v53 = vcombine.high %v3607_v1, %v3610_v2 }
 0x328   : > { %v1228_v46 = vrot.slane %v1220_v40, %v3582_v32  ;;  %v1244_v47 = vrot.slane %v1236_v41, %v3582_v32  ;;  %v964_v48 = vcombine.low %v936_v42, %v943_v43  ;;  %v2689_v49 = vcombine.high %v936_v42, %v943_v43 }
 0x329   : > { %v980_v50 = vcombine.low %v952_v44, %v959_v45  ;;  %v2690_v51 = vcombine.high %v952_v44, %v959_v45  ;;  %v1221_v62 = vcombine.high %v1195_v33, %v1203_v34  ;;  %v1237_v63 = vcombine.high %v1211_v25, %v1219_v35 }
 0x32a   : > { %v1252_v54 = vcombine.low %v1228_v46, %v1244_v47  ;;  %v1253_v55 = vcombine.high %v1228_v46, %v1244_v47  ;;  %v971_v56 = vrot.slane %v964_v48, %v3580_v26  ;;  %v979_v57 = vrot.slane %v2689_v49, %v3580_v26 }
 0x32b   : > { %v987_v58 = vrot.slane %v980_v50, %v3580_v26  ;;  %v995_v59 = vrot.slane %v2690_v51, %v3580_v26  ;;  %v1303_v1 = vrot.slane %v1289_v52, %v3582_v32  ;;  %v1319_v2 = vrot.slane %v1305_v53, %v3582_v32 }
 0x32c   : > { %2789 = vmatpush3.xpose.msk.msra.mxu0 %vm1634_vm2, %v1252_v54  ;;  %2796 = vmatpush3.xpose.msk.msra.mxu1 %vm1634_vm2, %v1253_v55  ;;  %v996_v60 = vcombine.low %v971_v56, %v979_v57  ;;  %v997_v5 = vcombine.high %v971_v56, %v979_v57  ;;  %v1235_v12 = vrot.slane %v1221_v62, %v3582_v32 }
 0x32d   : > { %v1012_v61 = vcombine.low %v987_v58, %v995_v59  ;;  %2800 = vmatprep.subr.mxu0 %v3194_v0  ;;  %2807 = vmatprep.subr.mxu1 %v3194_v0  ;;  %v1013_v6 = vcombine.high %v987_v58, %v995_v59  ;;  %v1322_v9 = vcombine.low %v1303_v1, %v1319_v2 }
 0x32e   : > { %v1004_v3 = vrot.slane %v996_v60, %v3582_v32  ;;  %v1323_v10 = vcombine.high %v1303_v1, %v1319_v2  ;;  %v1251_v13 = vrot.slane %v1237_v63, %v3582_v32  ;;  %v1011_v14 = vrot.slane %v997_v5, %v3582_v32 }
 0x32f   : > { %v1020_v4 = vrot.slane %v1012_v61, %v3582_v32  ;;  %v1027_v16 = vrot.slane %v1013_v6, %v3582_v32 }
 0x330   : > { %v1254_v17 = vcombine.low %v1235_v12, %v1251_v13  ;;  %v1255_v19 = vcombine.high %v1235_v12, %v1251_v13 }
 0x331   : > { %v1028_v7 = vcombine.low %v1004_v3, %v1020_v4  ;;  %v1029_v8 = vcombine.high %v1004_v3, %v1020_v4  ;;  %v1030_v20 = vcombine.low %v1011_v14, %v1027_v16  ;;  %v1031_v22 = vcombine.high %v1011_v14, %v1027_v16 }
 0x333   : > { %2791 = vmatmul.mubr.msk.f32.vlgmr.msra.gmra.mxu0 %vm1634_vm2, %v1028_v7  ;;  %2798 = vmatmul.mubr.msk.f32.vlgmr.msra.gmra.mxu1 %vm1634_vm2, %v1029_v8 }
 0x334   : > { %2801 = vmatpush3.xpose.msk.msra.mxu0 %vm1634_vm2, %v1322_v9  ;;  %2808 = vmatpush3.xpose.msk.msra.mxu1 %vm1634_vm2, %v1323_v10 }
 0x335   : > { %2802 = vmatprep.subr.mxu0 %v3194_v0  ;;  %2809 = vmatprep.subr.mxu1 %v3194_v0 }
 0x336   : > { %2804 = vmatprep.mubr.msk.f32.mxu0 %vm3195_vm0, %v3194_v0  ;;  %2811 = vmatprep.mubr.msk.f32.mxu1 %vm3195_vm0, %v3194_v0 }
 0x338   : > { %2803 = vmatpush3.xpose.msk.msra.mxu0 %vm1634_vm2, %v1254_v17  ;;  %2810 = vmatpush3.xpose.msk.msra.mxu1 %vm1634_vm2, %v1255_v19 }
 0x339   : > { %2814 = vmatprep.subr.mxu1 %v3194_v0  ;;  %2828 = vmatprep.subr.mxu0 %v3194_v0 }
 0x33b   : > { %2805 = vmatmul.mubr.msk.f32.vlgmr.msra.gmra.mxu0 %vm1634_vm2, %v1030_v20  ;;  %2812 = vmatmul.mubr.msk.f32.vlgmr.msra.gmra.mxu1 %vm1634_vm2, %v1031_v22 }
 0x33c   : > { %2818 = vmatprep.mubr.msk.f32.mxu1 %vm3195_vm0, %v3194_v0  ;;  %2832 = vmatprep.mubr.msk.f32.mxu0 %vm3195_vm0, %v3194_v0 }
 0x37f   : > { %v846_v23 = vpop.permute.xlu0 %845 }
 0x380   : > { %v851_v21 = vsel %vm581_vm1, %v846_v23, 0.0 }
 0x381   : > { %v848_v24 = vpop.permute.xlu1 %847  ;;  %852 = vadd.xlane.f32.xlu0 %v851_v21 }
 0x382   : > { %v854_v18 = vsel %vm581_vm1, %v848_v24, 0.0 }
 0x383   : > { %855 = vadd.xlane.f32.xlu1 %v854_v18 }
 0x394   : > { %880 = vrot.lane.b32.xlu1 %v2688_v27, %s3202_s20 }
 0x397   : > { %870 = vrot.lane.b32.xlu0 %v2687_v28, %s3202_s20  ;;  %s3115_s20 = scalar_lea.vmem %s3114_s13, 256 }
 0x3f3   : > { %v3690_v29 = vpop.f32.mrf.mxu0  ;;  %v1789_v30 = vpop.f32.mrf.mxu1 }
 0x3f4   : > { %v1952_v54 = vsel %vm1951_vm3, %v3690_v29, -inf }
 0x3f5   : > { %v2792_v31 = vpop.f32.mrf.mxu0  ;;  %v2799_v33 = vpop.f32.mrf.mxu1 }
 0x3fb   : > { %v1868_v34 = vpop.f32.mrf.mxu0  ;;  %v1947_v25 = vpop.f32.mrf.mxu1 }
 0x3fc   : > { %v1961_v53 = vsel %vm1951_vm3, %v1947_v25, -inf }
 0x3fd   : > { %v2806_v35 = vpop.f32.mrf.mxu0  ;;  %v2813_v36 = vpop.f32.mrf.mxu1 }
 0x40a   : > { %v853_v37 = vpop.xlane.xlu0 %852 }
 0x40b   : > { %v857_v38 = vmul.f32 0.03125, %v853_v37 }
 0x40c   : > { %v856_v39 = vpop.xlane.xlu1 %855 }
 0x40d   : > { %v859_v40 = vadd.f32 1e-05, %v857_v38  ;;  %v858_v41 = vmul.f32 0.03125, %v856_v39 }
 0x40e   : > { %v871_v45 = vpop.permute.xlu0 %870 }
 0x40f   : > { %2955 = vrsqrt.f32 %v859_v40  ;;  %v860_v42 = vadd.f32 1e-05, %v858_v41 }
 0x410   : > { %v881_v48 = vpop.permute.xlu1 %880 }
 0x411   : > { %2957 = vrsqrt.f32 %v860_v42 }
 0x41c   : > { %v2956_v43 = vpop.eup %2955 }
 0x41d   : > { %v863_v46 = vmul.f32 %v2956_v43, %v3567_v11  ;;  %v1955_v11 = vsel %vm1951_vm3, %v1789_v30, -inf }
 0x41e   : > { %v2958_v44 = vpop.eup %2957 }
 0x41f   : > { %v864_v47 = vmul.f32 %v2958_v44, %v3570_v15  ;;  %v873_v50 = vmul.f32 %v871_v45, %v863_v46  ;;  %v1958_v15 = vsel %vm1951_vm3, %v1868_v34, -inf }
 0x421   : > { %v874_v49 = vmul.f32 %v871_v45, %v864_v47  ;;  %v883_v52 = vadd.f32 %v881_v48, %v873_v50 }
 0x423   : > { %v884_v51 = vadd.f32 %v881_v48, %v874_v49 }
 0x425   : > { %1332 = vrot.lane.b32.xlu0 %v884_v51, %s3198_s2  ;;  %1328 = vrot.lane.b32.xlu1 %v884_v51, %s3197_s12 }
 0x429   : > { %1336 = vrot.lane.b32.xlu1 %v884_v51, %s3199_s15  ;;  %1326 = vrot.lane.b32.xlu0 %v883_v52, %s3197_s12  ;;  %s2539_s12 = sshll.u32 %s565_s6, 4  ;;  %s2540_s12 = int_to_ptr.vmem [resolvable:$true] %s2539_s12 }
 0x42a   : > { %s3109_s25 = scalar_lea.vmem %s2540_s12, 128  ;;  %p3116_p10 = scmp.lt.s32.totalorder %s2540_s12, %s3114_s13 }
 0x42b   : > { %p3110_p9 = scmp.ne.s32.totalorder %s2540_s12, %s3109_s25  ;;  %p3117_p1 = scmp.lt.s32.totalorder %s3115_s20, %s3109_s25 }
 0x42d   : > { %1340 = vrot.lane.b32.xlu1 %v884_v51, %s3196_s24  ;;  %1334 = vrot.lane.b32.xlu0 %v883_v52, %s3199_s15  ;;  %p3111_p0 = pnand %p3110_p9, %p3916_p13  ;;  %p3118_p4 = por %p3117_p1, %p3116_p10 }
 0x42f   : > { %p3112_p11 = pneg %p3111_p0 }
 0x431   : > { %1330 = vrot.lane.b32.xlu1 %v883_v52, %s3198_s2  ;;  %p3119_p6 = pnand %p3118_p4, %p3112_p11 }
 0x435   : > { %1338 = vrot.lane.b32.xlu1 %v883_v52, %s3196_s24 }
 0x44c   : > { %1956 = vmax.xlane.f32.xlu0 %v1955_v11 }
 0x450   : > { %1959 = vmax.xlane.f32.xlu0 %v1958_v15 }
 0x454   : > { %1962 = vmax.xlane.f32.xlu0 %v1961_v53 }
 0x459   : > { %1953 = vmax.xlane.f32.xlu1 %v1952_v54 }
 0x497   : > { %v1333_v55 = vpop.permute.xlu0 %1332  ;;  %v1329_v56 = vpop.permute.xlu1 %1328 }
 0x498   : > { %1348 = vrot.lane.b32.xlu1 %v1333_v55, %s3196_s24  ;;  %1344 = vrot.lane.b32.xlu0 %v1329_v56, %s3196_s24 }
 0x49b   : > { %v1337_v57 = vpop.permute.xlu1 %1336  ;;  %v1327_v58 = vpop.permute.xlu0 %1326 }
 0x49c   : > { %1352 = vrot.lane.b32.xlu1 %v1337_v57, %s3196_s24  ;;  %1342 = vrot.lane.b32.xlu0 %v1327_v58, %s3196_s24 }
 0x49f   : > { %v1341_v59 = vpop.permute.xlu1 %1340  ;;  %v1335_v60 = vpop.permute.xlu0 %1334 }
 0x4a0   : > { %1350 = vrot.lane.b32.xlu0 %v1335_v60, %s3196_s24 }
 0x4a3   : > { %v1331_v61 = vpop.permute.xlu1 %1330 }
 0x4a4   : > { %1346 = vrot.lane.b32.xlu1 %v1331_v61, %s3196_s24  ;;  %s3203_s24 = smov 16  }
 0x4a7   : > { %v1339_v6 = vpop.permute.xlu1 %1338 }
 0x4d5   : > { %v1957_v62 = vpop.xlane.xlu0 %1956 }
 0x4d6   : > { %v1965_v63 = vsub.f32 %v1789_v30, %v1957_v62 }
 0x4d8   : > { %v1970_v1 = vmul.f32 1.442695, %v1965_v63 }
 0x4d9   : > { %v1960_v2 = vpop.xlane.xlu0 %1959 }
 0x4da   : > { %2959 = vpow2.f32 %v1970_v1  ;;  %v1966_v3 = vsub.f32 %v1868_v34, %v1960_v2 }
 0x4dc   : > { %v1972_v4 = vmul.f32 1.442695, %v1966_v3 }
 0x4dd   : > { %v1963_v5 = vpop.xlane.xlu0 %1962 }
 0x4de   : > { %2961 = vpow2.f32 %v1972_v4  ;;  %v1967_v7 = vsub.f32 %v1947_v25, %v1963_v5 }
 0x4e0   : > { %v1974_v8 = vmul.f32 1.442695, %v1967_v7 }
 0x4e2   : > { %2963 = vpow2.f32 %v1974_v8  ;;  %v1954_v9 = vpop.xlane.xlu1 %1953 }
 0x4e3   : > { %v1964_v10 = vsub.f32 %v3690_v29, %v1954_v9 }
 0x4e5   : > { %v1968_v12 = vmul.f32 1.442695, %v1964_v10 }
 0x4e7   : > { %v3714_v13 = vpop.eup %2959  ;;  %2965 = vpow2.f32 %v1968_v12 }
 0x4e8   : > { %v1979_v14 = vsel %vm1951_vm3, %v3714_v13, 0.0 }
 0x4e9   : > { %1980 = vadd.xlane.f32.xlu0 %v1979_v14 }
 0x4eb   : > { %v3718_v16 = vpop.eup %2961 }
 0x4ec   : > { %v1982_v17 = vsel %vm1951_vm3, %v3718_v16, 0.0 }
 0x4ed   : > { %1983 = vadd.xlane.f32.xlu0 %v1982_v17 }
 0x4ef   : > { %v3722_v19 = vpop.eup %2963 }
 0x4f0   : > { %v1985_v20 = vsel %vm1951_vm3, %v3722_v19, 0.0 }
 0x4f1   : > { %1986 = vadd.xlane.f32.xlu0 %v1985_v20 }
 0x4f4   : > { %v3726_v22 = vpop.eup %2965 }
 0x4f5   : > { %v1976_v23 = vsel %vm1951_vm3, %v3726_v22, 0.0 }
 0x4f6   : > { %1977 = vadd.xlane.f32.xlu1 %v1976_v23 }
 0x50a   : > { %v1349_v21 = vpop.permute.xlu1 %1348  ;;  %v1345_v24 = vpop.permute.xlu0 %1344 }
 0x50b   : > { %v1430_v18 = vcombine.low %v1341_v59, %v1349_v21  ;;  %v1431_v27 = vcombine.high %v1341_v59, %v1349_v21 }
 0x50d   : > { %v1438_v33 = vrot.slane %v1430_v18, %v3580_v26  ;;  %v1445_v34 = vrot.slane %v1431_v27, %v3580_v26 }
 0x50e   : > { %v1353_v28 = vpop.permute.xlu1 %1352  ;;  %v1343_v29 = vpop.permute.xlu0 %1342 }
 0x50f   : > { %v1446_v30 = vcombine.low %v1345_v24, %v1353_v28  ;;  %v1447_v31 = vcombine.high %v1345_v24, %v1353_v28 }
 0x511   : > { %v1454_v25 = vrot.slane %v1446_v30, %v3580_v26  ;;  %v1461_v35 = vrot.slane %v1447_v31, %v3580_v26 }
 0x512   : > { %v1351_v40 = vpop.permute.xlu0 %1350 }
 0x513   : > { %v1462_v36 = vcombine.low %v1438_v33, %v1454_v25  ;;  %v1463_v37 = vcombine.high %v1438_v33, %v1454_v25  ;;  %v1478_v38 = vcombine.low %v1445_v34, %v1461_v35  ;;  %v1479_v39 = vcombine.high %v1445_v34, %v1461_v35 }
 0x514   : > { %v1378_v45 = vcombine.low %v1343_v29, %v1351_v40  ;;  %v1379_v46 = vcombine.high %v1343_v29, %v1351_v40 }
 0x515   : > { %v1470_v41 = vrot.slane %v1462_v36, %v3582_v32  ;;  %v1477_v42 = vrot.slane %v1463_v37, %v3582_v32  ;;  %v1486_v43 = vrot.slane %v1478_v38, %v3582_v32  ;;  %v1493_v44 = vrot.slane %v1479_v39, %v3582_v32 }
 0x516   : > { %v1347_v47 = vpop.permute.xlu1 %1346  ;;  %v1386_v56 = vrot.slane %v1378_v45, %v3580_v26  ;;  %v1393_v57 = vrot.slane %v1379_v46, %v3580_v26 }
 0x517   : > { %v1566_v48 = vcombine.low %v1470_v41, %v1477_v42  ;;  %v2697_v49 = vcombine.high %v1470_v41, %v1477_v42  ;;  %v1582_v50 = vcombine.low %v1486_v43, %v1493_v44  ;;  %v2698_v51 = vcombine.high %v1486_v43, %v1493_v44 }
 0x518   : > { %v1362_v52 = vcombine.low %v1339_v6, %v1347_v47  ;;  %v1363_v11 = vcombine.high %v1339_v6, %v1347_v47 }
 0x519   : > { %v1573_v15 = vrot.slane %v1566_v48, %v3580_v26  ;;  %v1581_v53 = vrot.slane %v2697_v49, %v3580_v26  ;;  %v1589_v54 = vrot.slane %v1582_v50, %v3580_v26  ;;  %v1597_v55 = vrot.slane %v2698_v51, %v3580_v26 }
 0x51a   : > { %v1370_v58 = vrot.slane %v1362_v52, %v3580_v26  ;;  %v1377_v59 = vrot.slane %v1363_v11, %v3580_v26 }
 0x51b   : > { %v1598_v60 = vcombine.low %v1573_v15, %v1581_v53  ;;  %v1614_v61 = vcombine.low %v1589_v54, %v1597_v55  ;;  %v1599_v62 = vcombine.high %v1573_v15, %v1581_v53  ;;  %v1615_v63 = vcombine.high %v1589_v54, %v1597_v55 }
 0x51c   : > { %v1394_v1 = vcombine.low %v1370_v58, %v1386_v56  ;;  %v1395_v2 = vcombine.high %v1370_v58, %v1386_v56  ;;  %v1410_v3 = vcombine.low %v1377_v59, %v1393_v57  ;;  %v1411_v4 = vcombine.high %v1377_v59, %v1393_v57 }
 0x51d   : > { %v1606_v5 = vrot.slane %v1598_v60, %v3582_v32  ;;  %v1622_v6 = vrot.slane %v1614_v61, %v3582_v32  ;;  %v1613_v7 = vrot.slane %v1599_v62, %v3582_v32  ;;  %v1629_v8 = vrot.slane %v1615_v63, %v3582_v32 }
 0x51e   : > { %v1402_v9 = vrot.slane %v1394_v1, %v3582_v32  ;;  %v1409_v10 = vrot.slane %v1395_v2, %v3582_v32  ;;  %v1418_v12 = vrot.slane %v1410_v3, %v3582_v32  ;;  %v1425_v14 = vrot.slane %v1411_v4, %v3582_v32 }
 0x51f   : > { %v1630_v17 = vcombine.low %v1606_v5, %v1622_v6  ;;  %v1632_v20 = vcombine.low %v1613_v7, %v1629_v8  ;;  %v1631_v41 = vcombine.high %v1606_v5, %v1622_v6  ;;  %v1633_v43 = vcombine.high %v1613_v7, %v1629_v8 }
 0x520   : > { %v1498_v23 = vcombine.low %v1402_v9, %v1409_v10  ;;  %v2695_v21 = vcombine.high %v1402_v9, %v1409_v10  ;;  %v1514_v24 = vcombine.low %v1418_v12, %v1425_v14  ;;  %v2696_v18 = vcombine.high %v1418_v12, %v1425_v14  ;;  %v2442_v9 = vld [vmem:[#allocation10 + $0x10] sm:$0xff]  ;;  %v2441_v10 = vld [vmem:[#allocation10 + $0x8] sm:$0xff] }
 0x521   : > { %2815 = vmatpush3.msra.mxu1 %v1630_v17  ;;  %2829 = vmatpush3.msra.mxu0 %v1632_v20 }
 0x522   : > { %v1505_v27 = vrot.slane %v1498_v23, %v3580_v26  ;;  %v1513_v28 = vrot.slane %v2695_v21, %v3580_v26  ;;  %v1521_v29 = vrot.slane %v1514_v24, %v3580_v26  ;;  %v1529_v30 = vrot.slane %v2696_v18, %v3580_v26  ;;  %2816 = vmatprep.subr.mxu1 %v3194_v0 }
 0x523   : > { %2830 = vmatprep.subr.mxu0 %v3194_v0 }
 0x524   : > { %v1530_v31 = vcombine.low %v1505_v27, %v1513_v28  ;;  %v1546_v33 = vcombine.low %v1521_v29, %v1529_v30  ;;  %v1531_v34 = vcombine.high %v1505_v27, %v1513_v28  ;;  %v1547_v25 = vcombine.high %v1521_v29, %v1529_v30  ;;  %v2440_v27 = vld [vmem:[#allocation10] sm:$0xff] }
 0x526   : > { %v1538_v35 = vrot.slane %v1530_v31, %v3582_v32  ;;  %v1554_v36 = vrot.slane %v1546_v33, %v3582_v32  ;;  %v1545_v37 = vrot.slane %v1531_v34, %v3582_v32  ;;  %v1561_v38 = vrot.slane %v1547_v25, %v3582_v32 }
 0x528   : > { %v1562_v39 = vcombine.low %v1538_v35, %v1554_v36  ;;  %v1564_v40 = vcombine.low %v1545_v37, %v1561_v38  ;;  %v1563_v42 = vcombine.high %v1538_v35, %v1554_v36 }
 0x52a   : > { %2817 = vmatpush3.msra.mxu1 %v1562_v39  ;;  %2831 = vmatpush3.msra.mxu0 %v1564_v40 }
 0x52b   : > { %2819 = vmatmul.mubr.msk.f32.vlgmr.msra.gmra.mxu1 %vm1951_vm3, %v3726_v22  ;;  %2821 = vmatprep.subr.mxu1 %v3194_v0  ;;  %v1565_v22 = vcombine.high %v1545_v37, %v1561_v38 }
 0x52c   : > { %2833 = vmatmul.mubr.msk.f32.vlgmr.msra.gmra.mxu0 %vm1951_vm3, %v3718_v16  ;;  %2822 = vmatpush3.msra.mxu1 %v1631_v41  ;;  %v2443_v16 = vld [vmem:[#allocation10 + $0x18] sm:$0xff] }
 0x52d   : > { %2823 = vmatprep.subr.mxu1 %v3194_v0  ;;  %2825 = vmatprep.mubr.msk.f32.mxu1 %vm3195_vm0, %v3194_v0 }
 0x52e   : > { %2824 = vmatpush3.msra.mxu1 %v1563_v42  ;;  %2842 = vmatprep.subr.mxu0 %v3194_v0 }
 0x52f   : > { %2826 = vmatmul.mubr.msk.f32.vlgmr.msra.gmra.mxu1 %vm1951_vm3, %v3714_v13  ;;  %2835 = vmatprep.subr.mxu1 %v3194_v0 }
 0x530   : > { %2836 = vmatpush3.msra.mxu1 %v1633_v43  ;;  %2839 = vmatprep.mubr.msk.f32.mxu1 %vm3195_vm0, %v3194_v0 }
 0x531   : > { %2837 = vmatprep.subr.mxu1 %v3194_v0  ;;  %2850 = vmatprep.mubr.msk.f32.mxu0 %vm3195_vm0, %v3194_v0 }
 0x532   : > { %2838 = vmatpush3.msra.mxu1 %v1565_v22  ;;  %2843 = vmatpush3.msra.mxu0 %v2443_v16 }
 0x533   : > { %2840 = vmatmul.mubr.msk.f32.vlgmr.msra.gmra.mxu1 %vm1951_vm3, %v3722_v19  ;;  %2844 = vmatprep.subr.mxu0 %v3194_v0 }
 0x534   : > { %2845 = vmatpush3.msra.mxu0 %v2442_v9 }
 0x535   : > { %2846 = vmatprep.subr.mxu0 %v3194_v0 }
 0x536   : > { %2847 = vmatpush3.msra.mxu0 %v2441_v10 }
 0x537   : > { %2848 = vmatprep.subr.mxu0 %v3194_v0 }
 0x538   : > { %2849 = vmatpush3.msra.mxu0 %v2440_v27 }
 0x572   : > { %v1981_v13 = vpop.xlane.xlu0 %1980 }
 0x576   : > { %v1984_v44 = vpop.xlane.xlu0 %1983 }
 0x577   : > { %2967 = vrcp.f32 %v1984_v44  ;;  %v2717_v44 = vld [vmem:[%s3914_s26] ss:$0 sm:$0xff] }
 0x57a   : > { %v1987_v46 = vpop.xlane.xlu0 %1986 }
 0x57f   : > { %v1978_v45 = vpop.xlane.xlu1 %1977 }
 0x580   : > { %2969 = vrcp.f32 %v1978_v45 }
 0x581   : > { %2971 = vrcp.f32 %v1981_v13 }
 0x582   : > { %2973 = vrcp.f32 %v1987_v46 }
 0x584   : > { %v2968_v50 = vpop.eup %2967 }
 0x58d   : > { %v2970_v52 = vpop.eup %2969 }
 0x58e   : > { %v2972_v54 = vpop.eup %2971 }
 0x58f   : > { %v2974_v55 = vpop.eup %2973 }
 0x5eb   : > { %v2057_v47 = vpop.f32.mrf.mxu1 }
 0x5ec   : > { %v2203_v48 = vpop.f32.mrf.mxu0  ;;  %v2284_v19 = vmul.f32 %v2970_v52, %v2057_v47 }
 0x5ed   : > { %v2820_v49 = vpop.f32.mrf.mxu1  ;;  %v2286_v15 = vmul.f32 %v2968_v50, %v2203_v48 }
 0x5ee   : > { %v2834_v51 = vpop.f32.mrf.mxu0 }
 0x5ef   : > { %v2130_v11 = vpop.f32.mrf.mxu1  ;;  %v2288_v57 = vcombine.low %v2284_v19, %v2286_v15  ;;  %v2289_v58 = vcombine.high %v2284_v19, %v2286_v15 }
 0x5f0   : > { %v2285_v59 = vmul.f32 %v2972_v54, %v2130_v11 }
 0x5f1   : > { %v2827_v53 = vpop.f32.mrf.mxu1  ;;  %v2296_v1 = vrot.slane %v2288_v57, %v3580_v26  ;;  %v2303_v2 = vrot.slane %v2289_v58, %v3580_v26 }
 0x5f3   : > { %v2276_v56 = vpop.f32.mrf.mxu1 }
 0x5f4   : > { %v2287_v60 = vmul.f32 %v2974_v55, %v2276_v56 }
 0x5f5   : > { %v2841_v61 = vpop.f32.mrf.mxu1 }
 0x5f6   : > { %v2304_v62 = vcombine.low %v2285_v59, %v2287_v60  ;;  %v2305_v63 = vcombine.high %v2285_v59, %v2287_v60 }
 0x5f8   : > { %v2312_v3 = vrot.slane %v2304_v62, %v3580_v26  ;;  %v2319_v4 = vrot.slane %v2305_v63, %v3580_v26 }
 0x5fa   : > { %v2320_v5 = vcombine.low %v2296_v1, %v2312_v3  ;;  %v2321_v6 = vcombine.high %v2296_v1, %v2312_v3  ;;  %v2336_v7 = vcombine.low %v2303_v2, %v2319_v4  ;;  %v2337_v8 = vcombine.high %v2303_v2, %v2319_v4 }
 0x5fc   : > { %v2328_v12 = vrot.slane %v2320_v5, %v3582_v32  ;;  %v2335_v14 = vrot.slane %v2321_v6, %v3582_v32  ;;  %v2344_v17 = vrot.slane %v2336_v7, %v3582_v32  ;;  %v2351_v20 = vrot.slane %v2337_v8, %v3582_v32 }
 0x5fe   : > { %v2356_v23 = vcombine.low %v2328_v12, %v2335_v14  ;;  %v2715_v21 = vcombine.high %v2328_v12, %v2335_v14  ;;  %v2372_v24 = vcombine.low %v2344_v17, %v2351_v20  ;;  %v2716_v18 = vcombine.high %v2344_v17, %v2351_v20 }
 0x600   : > { %v2363_v28 = vrot.slane %v2356_v23, %v3580_v26  ;;  %v2371_v29 = vrot.slane %v2715_v21, %v3580_v26  ;;  %v2379_v30 = vrot.slane %v2372_v24, %v3580_v26  ;;  %v2387_v31 = vrot.slane %v2716_v18, %v3580_v26 }
 0x602   : > { %v2389_v33 = vcombine.high %v2363_v28, %v2371_v29  ;;  %v2405_v34 = vcombine.high %v2379_v30, %v2387_v31  ;;  %v2388_v25 = vcombine.low %v2363_v28, %v2371_v29  ;;  %v2404_v35 = vcombine.low %v2379_v30, %v2387_v31 }
 0x604   : > { %v2403_v36 = vrot.slane %v2389_v33, %v3582_v32  ;;  %v2419_v37 = vrot.slane %v2405_v34, %v3582_v32  ;;  %v2396_v0 = vrot.slane %v2388_v25, %v3582_v32  ;;  %v2412_v38 = vrot.slane %v2404_v35, %v3582_v32 }
 0x606   : > { %v2422_v39 = vcombine.low %v2403_v36, %v2419_v37  ;;  %v2421_v40 = vcombine.high %v2396_v0, %v2412_v38  ;;  %v2420_v41 = vcombine.low %v2396_v0, %v2412_v38  ;;  %v2423_v26 = vcombine.high %v2403_v36, %v2419_v37 }
 0x608   : > { %2429 = vrot.lane.b32.xlu0 %v2422_v39, %s3203_s24  ;;  %2425 = vrot.lane.b32.xlu1 %v2421_v40, %s3204_s27 }
 0x60c   : > { %2433 = vrot.lane.b32.xlu1 %v2423_v26, %s3205_s14 }
 0x67a   : > { %v2426_v42 = vpop.permute.xlu1 %2425  ;;  %v2430_v43 = vpop.permute.xlu0 %2429 }
 0x67b   : > { %v2436_v22 = vsel %vm1634_vm2, %v2420_v41, %v2426_v42 }
 0x67c   : > { %v2437_v32 = vsel %vm1951_vm3, %v2436_v22, %v2430_v43 }
 0x67e   : > { %v2434_v16 = vpop.permute.xlu1 %2433 }
 0x67f   : > { %v2439_v13 = vsel %vm2438_vm4, %v2437_v32, %v2434_v16 }
 0x680   : > { %2851 = vmatmul.mubr.msk.f32.vlgmr.msra.gmra.mxu0 %vm581_vm1, %v2439_v13 }
 0x740   : > { %v2520_v45 = vpop.f32.mrf.mxu0 }
 0x741   : > { %v2521_v46 = vadd.f32 %v2717_v44, %v2520_v45 }
 0x742   : > { %v2852_v47 = vpop.f32.mrf.mxu0 }
 0x743   : > { %2524 = vst.msk [vmem:[%s565_s6] sm:$0xff] %vm581_vm1, %v2521_v46 }
 0x744   : > { %3122 = shalt.err (!%p3119_p6)
}
 0x745   : > { %s3123_s24 = scalar_lea.hbm %s3814_s19, 128  ;;  %s3127_s14 = scalar_lea.hbm %s3915_s21, 256 }
 0x746   : > { %p3124_p3 = scmp.ne.s32.totalorder %s3814_s19, %s3123_s24  ;;  %p3128_p2 = scmp.lt.s32.totalorder %s3814_s19, %s3915_s21 }
 0x747   : > { %p3129_p7 = scmp.lt.s32.totalorder %s3127_s14, %s3123_s24 }
 0x748   : > { %p3125_p5 = pnand %p3124_p3, %p3916_p13 }
 0x749   : > { %p3130_p12 = por %p3129_p7, %p3128_p2 }
 0x74a   : > { %p3126_p8 = pneg %p3125_p5 }
 0x74c   : > { %p3131_p9 = pnand %p3130_p12, %p3126_p8 }
 0x74e   : > { %3134 = shalt.err (!%p3131_p9)
}
 0x74f   : > { %2869 = dma.vmem_to_hbm [thread:$0]  (%p3916_p13), %s2540_s12, 128, %s3814_s19, %s2526_s28  }
 0x750 PF: > { %s3917_s26 = sld [smem:[#allocation17_spill]]  ;;  %p3920_p11 = scmp.ge.s32.totalorder %s3185_s16, 2 }
 0x751   : > { %s3918_s22 = sld [smem:[#allocation19_spill]] }
 0x756   : > { %s2551_s6 = sand.u32 1, %s3917_s26  }
 0x757   : > { %p3919_p0 = scmp.ne.s32.totalorder %s3918_s22, 0  ;;  %s2552_s2 = scalar_lea.sflag [#allocation4], %s2551_s6 }
 0x759   : > { %p2889_p10 = pnand %p3920_p11, %p3919_p0 }
 0x75b   : > { %p2890_p1 = pneg %p2889_p10 }
 0x75d   : > { %3168 = dma.done.wait (%p2890_p1), %s2552_s2, 128  }
 0x75e   : > { %3170 = vsyncadd (%p2890_p1), %s2552_s2, 4294967168  ;;  %s3921_s16 = sld [smem:[#allocation20_spill]]  ;;  %s3924_s29 = smov %s3177_s30 }
 0x75f   : > { %s3922_s15 = sld [smem:[#allocation18_spill]] }
 0x760   : > { %s3923_s25 = sld [smem:[#allocation21_spill]] }
 0x764   : > { %p31_p4 = scmp.ge.s32.totalorder %s3921_s16, 4  }
 0x765   : > { %s3925_s30 = smov %s3922_s15 }
 0x766   : > { %s3926_s15 = smov %s3923_s25  ;;  %33 = sbr.rel (!%p31_p4) target bundleno = 15 (0xf), region = 146 }
 0x76b   :  { %2557 = vsyncpa [#allocation3], 1 }
 0x76c   :  { %2559 = vsyncpa [#allocation3 + $0x1], 1 }
 0x76d   :  { %2560 = vsyncpa [#allocation6], 1 }
 0x76e   :  { %2562 = vsyncpa [#allocation6 + $0x1], 1 }
 0x76f   :  { %2563 = vsyncpa [#allocation9], 1 }
 0x770   :  { %2564 = vsyncpa [#allocation4], 1 }
 0x771   :  { %2566 = vsyncpa [#allocation4 + $0x1], 1 }

// kernel: tpu_custom_call.1
= control target key start
LH: loop header
LB: loop body
LE: loop exit
PB: predicated region body
PF: predicated region fallthrough
CT: control target
= control target key end

     0   :  { %s3852_s0 = inlined_call_operand.hbm [shape: f32[32,32], index: 0, kind: input, shape index: {}]   ;;  %s3853_s1 = inlined_call_operand.hbm [shape: f32[16,32], index: 1, kind: input, shape index: {}]   ;;  %s3854_s2 = inlined_call_operand.hbm [shape: f32[32,32], index: 2, kind: input, shape index: {}]   ;;  %s3855_s3 = inlined_call_operand.vmem [shape: f32[1,32], index: 3, kind: input, shape index: {}]   ;;  %s3856_s4 = inlined_call_operand.vmem [shape: f32[1,32], index: 4, kind: input, shape index: {}]   ;;  %s3857_s5 = inlined_call_operand.vmem [shape: f32[1,32], index: 5, kind: input, shape index: {}]   ;;  %s3858_s6 = inlined_call_operand.hbm [shape: f32[32,64], index: 6, kind: input, shape index: {}]   ;;  %s3859_s7 = inlined_call_operand.vmem [shape: f32[1,64], index: 7, kind: input, shape index: {}]   ;;  %s3860_s8 = inlined_call_operand.vmem [shape: f32[1,32], index: 8, kind: input, shape index: {}]   ;;  %s3861_s9 = inlined_call_operand.vmem [shape: f32[1,32], index: 9, kind: input, shape index: {}]   ;;  %s3862_s10 = inlined_call_operand.vmem [shape: f32[1,32], index: 10, kind: input, shape index: {}]   ;;  %s3863_s11 = inlined_call_operand.vmem [shape: f32[1,32], index: 11, kind: input, shape index: {}]   ;;  %s3864_s12 = inlined_call_operand.hbm [shape: f32[32,32], index: 12, kind: input, shape index: {}]   ;;  %s3865_s13 = inlined_call_operand.vmem [shape: f32[1,32], index: 13, kind: input, shape index: {}]   ;;  %s3866_s14 = inlined_call_operand.hbm [shape: f32[16,32], index: 14, kind: output, shape index: {}]  }
   0x1   :  { %3881 = sst [smem:[#allocation23_spill]] %s3852_s0 }
   0x2   :  { %3882 = sst [smem:[#allocation24_spill]] %s3854_s2 }
   0x3   :  { %3883 = sst [smem:[#allocation25_spill]] %s3858_s6 }
   0x4   :  { %3884 = sst [smem:[#allocation26_spill]] %s3864_s12 }
   0x5   :  { %3885 = sst [smem:[#allocation27_spill]] %s3865_s13 }
   0x6   :  { %3886 = sst [smem:[#allocation28_spill]] %s3866_s14 }
   0x7   :  { %19 = vsyncpa [#allocation3], 0 }
   0x8   :  { %21 = vsyncpa [#allocation3 + $0x1], 0 }
   0x9   :  { %22 = vsyncpa [#allocation6], 0 }
   0xa   :  { %24 = vsyncpa [#allocation6 + $0x1], 0 }
   0xb   :  { %25 = vsyncpa [#allocation9], 0 }
   0xc   :  { %26 = vsyncpa [#allocation4], 0 }
   0xd   :  { %28 = vsyncpa [#allocation4 + $0x1], 0  ;;  %s3282_s29 = smov 0   ;;  %s3284_s30 = smov 0  }
   0xe   :  { %s3286_s15 = smov 0   ;;  %s3288_s16 = smov 0  }
   0xf LB: > { %3887 = sst [smem:[#allocation17_spill]] %s3173_s29  ;;  %s3303_s17 = sadd.s32 4294967295, %s3185_s16   ;;  %s3185_s16 = sphi %s3288_s16, %s3921_s16   ;;  %s3181_s15 = sphi %s3286_s15, %s3926_s15   ;;  %s3177_s30 = sphi %s3284_s30, %s3925_s30   ;;  %s3173_s29 = sphi %s3282_s29, %s3924_s29  }
  0x10   : > { %3888 = sst [smem:[#allocation18_spill]] %s3181_s15  ;;  %s2660_s18 = sadd.s32 4294967294, %s3185_s16  }
  0x11   : > { %p54_p0 = scmp.ne.s32.totalorder %s3177_s30, %s3173_s29  ;;  %p3870_p1 = scmp.eq.s32.totalorder %s3303_s17, 0 }
  0x12   : > { %p356_p2 = scmp.eq.s32.totalorder %s3303_s17, 1  ;;  %p362_p3 = scmp.eq.s32.totalorder %s2660_s18, 1 }
  0x13   : > { %p3312_p4 = por %p3870_p1, %p54_p0  ;;  %p2661_p5 = scmp.ge.s32.totalorder %s3185_s16, 1 }
  0x14   : > { %p3317_p6 = por %p362_p3, %p54_p0  ;;  %p369_p7 = scmp.lt.s32.totalorder %s3185_s16, 3 }
  0x15   : > { %s3889_s19 = scalar_select %p3312_p4, 1, 0 }
  0x16   : > { %s3890_s20 = scalar_select %p3317_p6, 1, 0 }
  0x17   : > { %p3322_p8 = pnand %p2661_p5, %p369_p7  ;;  %s3187_s22 = smov [#allocation7]  }
  0x18   : > { %3891 = sst [smem:[#allocation19_spill]] %s3890_s20  ;;  %s381_s23 = sshll.u32 %s3187_s22, 4  ;;  %s382_s23 = int_to_ptr.vmem [resolvable:$true] %s381_s23 }
  0x19   : > { %s3892_s21 = scalar_select %p3322_p8, 1, 0 }
  0x1a   : > { %p2871_p9 = pneg %p3322_p8  ;;  %s3188_s25 = smov [#allocation8]  }
  0x1b   : > { %s403_s26 = sshll.u32 %s3188_s25, 4  ;;  %s3189_s27 = smov [#allocation10]   ;;  %s404_s26 = int_to_ptr.vmem [resolvable:$true] %s403_s26 }
  0x1c   : > { %p3331_p11 = pnand %p2871_p9, %p3870_p1  ;;  %s431_s28 = sshll.u32 %s3189_s27, 4  ;;  %s432_s28 = int_to_ptr.vmem [resolvable:$true] %s431_s28 }
  0x1d   : > { %s2986_s18 = scalar_lea.vmem %s382_s23, 512  ;;  %p2994_p5 = scmp.lt.s32.totalorder %s382_s23, %s382_s23 }
  0x1e   : > { %p2977_p12 = pneg %p3331_p11  ;;  %p2987_p13 = scmp.ne.s32.totalorder %s382_s23, %s2986_s18 }
  0x1f   : > { %p2995_p7 = scmp.lt.s32.totalorder %s2986_s18, %s2986_s18 }
  0x20   : > { %p2989_p0 = pnand %p2987_p13, %p2977_p12 }
  0x21   : > { %p2996_p9 = por %p2995_p7, %p2994_p5 }
  0x22   : > { %p2990_p3 = pneg %p2989_p0 }
  0x24   : > { %p2997_p10 = pnand %p2996_p9, %p2990_p3 }
  0x26   : > { %3000 = shalt.err (!%p2997_p10)
}
  0x27   : > { %s3871_s22 = smov 128   ;;  %s3872_s25 = smov 8  }
  0x28   : > { %s3894_s2 = sld [smem:[#allocation24_spill]]  ;;  %s3012_s29 = scalar_lea.vmem %s404_s26, 512 }
  0x29   : > { %p3013_p13 = scmp.ne.s32.totalorder %s404_s26, %s3012_s29  ;;  %p3020_p3 = scmp.lt.s32.totalorder %s404_s26, %s404_s26 }
  0x2a   : > { %p3021_p10 = scmp.lt.s32.totalorder %s3012_s29, %s3012_s29 }
  0x2b   : > { %p3015_p0 = pnand %p3013_p13, %p2977_p12 }
  0x2c   : > { %p3022_p7 = por %p3021_p10, %p3020_p3 }
  0x2d   : > { %p3016_p5 = pneg %p3015_p0 }
  0x2e   : > { %2874 = dma.hbm_to_vmem [thread:$0]  (!%p3331_p11), %s3894_s2, 512, %s382_s23, [#allocation6], %s3871_s22, %s3871_s22, %s3872_s25  }
  0x2f   : > { %p3023_p9 = pnand %p3022_p7, %p3016_p5 }
  0x31   : > { %3026 = shalt.err (!%p3023_p9)
}
  0x32   : > { %s3895_s6 = sld [smem:[#allocation25_spill]]  ;;  %s3038_s20 = scalar_lea.vmem %s432_s28, 512 }
  0x33   : > { %p3039_p1 = scmp.ne.s32.totalorder %s432_s28, %s3038_s20  ;;  %p3046_p3 = scmp.lt.s32.totalorder %s432_s28, %s432_s28 }
  0x34   : > { %p3047_p5 = scmp.lt.s32.totalorder %s3038_s20, %s3038_s20 }
  0x35   : > { %p3041_p13 = pnand %p3039_p1, %p2977_p12 }
  0x36   : > { %p3048_p10 = por %p3047_p5, %p3046_p3 }
  0x37   : > { %p3042_p0 = pneg %p3041_p13 }
  0x38   : > { %2877 = dma.hbm_to_vmem [thread:$0]  (!%p3331_p11), %s3895_s6, 512, %s404_s26, [#allocation9], %s3871_s22, %s3871_s22, %s3872_s25  }
  0x39   : > { %p3049_p7 = pnand %p3048_p10, %p3042_p0 }
  0x3b   : > { %3052 = shalt.err (!%p3049_p7)
}
  0x3c   : > { %s3896_s12 = sld [smem:[#allocation26_spill]]  ;;  %s3371_s23 = sadd.s32 1, %s3185_s16  }
  0x3d   : > { %3897 = sst [smem:[#allocation20_spill]] %s3371_s23  ;;  %s38_s24 = ssub.s32 %s3185_s16, %s3371_s23 }
  0x3e   : > { %s41_s26 = sadd.s32 1, %s3181_s15  ;;  %p39_p1 = scmp.eq.s32.totalorder %s38_s24, 0 }
  0x3f   : > { %p48_p12 = scmp.ne.s32.totalorder %s3181_s15, %s3177_s30  ;;  %p49_p9 = scmp.eq.s32.totalorder %s3185_s16, 0 }
  0x40   : > { %p2895_p13 = scmp.lt.s32.totalorder %s3185_s16, 2  ;;  %s3390_s20 = sand.u32 1, %s3181_s15  }
  0x41   : > { %s3381_s27 = scalar_select %p39_p1, %s3181_s15, %s41_s26  }
  0x42   : > { %2880 = dma.hbm_to_vmem [thread:$0]  (!%p3331_p11), %s3896_s12, 512, %s432_s28, [#allocation9], %s3871_s22, %s3871_s22, %s3872_s25  }
  0x43   : > { %3898 = sst [smem:[#allocation21_spill]] %s3381_s27  ;;  %p50_p0 = por %p49_p9, %p48_p12 }
  0x44   : > { %p3385_p3 = por %p356_p2, %p48_p12  ;;  %s2723_s28 = sshll.u32 %s3185_s16, 8 }
  0x45   : > { %s2666_s14 = sshll.u32 %s3390_s20, 4  ;;  %s3901_s0 = sld [smem:[#allocation23_spill]] }
  0x46   : > { %s3899_s18 = scalar_select %p3385_p3, 1, 0 }
  0x47   : > { %s452_s26 = scalar_lea.vmem [#allocation2], %s2666_s14  ;;  %p3399_p2 = pnand %p2895_p13, %p50_p0 }
  0x48   : > { %3900 = sst [smem:[#allocation22_spill]] %s3899_s18  ;;  %s459_s25 = sshll.u32 %s452_s26, 4  ;;  %s3403_s25 = int_to_ptr.vmem [resolvable:$true] %s459_s25 }
  0x49   : > { %p3055_p5 = pneg %p3399_p2 }
  0x4b   : > { %s3397_s24 = scalar_lea.hbm %s3901_s0, %s2723_s28  ;;  %s3058_s14 = scalar_lea.hbm %s3901_s0, 512 }
  0x4c   : > { %s3053_s27 = scalar_lea.hbm %s3397_s24, 256  ;;  %p3059_p1 = scmp.lt.s32.totalorder %s3397_s24, %s3901_s0 }
  0x4d   : > { %p3054_p11 = scmp.ne.s32.totalorder %s3397_s24, %s3053_s27  ;;  %p3060_p12 = scmp.lt.s32.totalorder %s3058_s14, %s3053_s27 }
  0x4f   : > { %p3056_p10 = pnand %p3055_p5, %p3054_p11  ;;  %p3061_p9 = por %p3060_p12, %p3059_p1 }
  0x51   : > { %p3057_p7 = pneg %p3056_p10 }
  0x53   : > { %p3062_p13 = pnand %p3061_p9, %p3057_p7 }
  0x55   : > { %3065 = shalt.err (!%p3062_p13)
}
  0x56   : > { %s3066_s6 = scalar_lea.vmem %s3403_s25, 256  ;;  %s3192_s22 = smov [#allocation2]  }
  0x57   : > { %p3067_p0 = scmp.ne.s32.totalorder %s3403_s25, %s3066_s6  ;;  %s3071_s28 = sshll.u32 %s3192_s22, 4  ;;  %s3072_s28 = int_to_ptr.vmem [resolvable:$false] %s3071_s28 }
  0x58   : > { %s3073_s12 = scalar_lea.vmem %s3072_s28, 512  ;;  %p3074_p6 = scmp.lt.s32.totalorder %s3403_s25, %s3072_s28 }
  0x59   : > { %p3069_p11 = pnand %p3067_p0, %p3055_p5  ;;  %p3075_p3 = scmp.lt.s32.totalorder %s3073_s12, %s3066_s6 }
  0x5b   : > { %p3070_p10 = pneg %p3069_p11  ;;  %p3076_p4 = por %p3075_p3, %p3074_p6 }
  0x5d   : > { %p3077_p1 = pnand %p3076_p4, %p3070_p10 }
  0x5f   : > { %3080 = shalt.err (!%p3077_p1)
}
  0x60   : > { %s3903_s27 = smov 8   ;;  %s3904_s14 = smov 128  }
  0x61   : > { %s3905_s29 = scalar_lea.sflag [#allocation3], %s3390_s20  ;;  %s2669_s26 = sshll.u32 %s3390_s20, 3 }
  0x62   : > { %2884 = dma.hbm_to_vmem [thread:$0]  (!%p3399_p2), %s3397_s24, 256, %s3403_s25, %s3905_s29, %s3904_s14, %s3904_s14, %s3903_s27  }
  0x63   : > { %s2670_s22 = sshll.u32 %s3185_s16, 7  ;;  %s473_s0 = scalar_lea.vmem [#allocation5], %s2669_s26 }
  0x64   : > { %s3441_s28 = scalar_lea.hbm %s3853_s1, %s2670_s22  ;;  %s480_s15 = sshll.u32 %s473_s0, 4  ;;  %s481_s15 = int_to_ptr.vmem [resolvable:$true] %s480_s15 }
  0x65   : > { %s3906_s23 = sand.u32 1, %s3185_s16   ;;  %s3081_s18 = scalar_lea.hbm %s3441_s28, 128 }
  0x66   : > { %s470_s13 = scalar_lea.sflag [#allocation6], %s3906_s23  ;;  %p3082_p4 = scmp.ne.s32.totalorder %s3441_s28, %s3081_s18 }
  0x67   : > { %s3086_s24 = scalar_lea.hbm %s3853_s1, 256  ;;  %p3087_p7 = scmp.lt.s32.totalorder %s3441_s28, %s3853_s1 }
  0x68   : > { %p3084_p6 = pnand %p3082_p4, %p3055_p5  ;;  %p3088_p12 = scmp.lt.s32.totalorder %s3086_s24, %s3081_s18 }
  0x6a   : > { %p3085_p3 = pneg %p3084_p6  ;;  %p3089_p9 = por %p3088_p12, %p3087_p7 }
  0x6c   : > { %p3090_p13 = pnand %p3089_p9, %p3085_p3 }
  0x6e   : > { %3093 = shalt.err (!%p3090_p13)
}
  0x6f   : > { %s3094_s0 = scalar_lea.vmem %s481_s15, 128  ;;  %s3193_s23 = smov [#allocation5]  }
  0x70   : > { %p3095_p0 = scmp.ne.s32.totalorder %s481_s15, %s3094_s0  ;;  %s3099_s29 = sshll.u32 %s3193_s23, 4  ;;  %s3100_s29 = int_to_ptr.vmem [resolvable:$false] %s3099_s29 }
  0x71   : > { %s3101_s26 = scalar_lea.vmem %s3100_s29, 256  ;;  %p3102_p1 = scmp.lt.s32.totalorder %s481_s15, %s3100_s29 }
  0x72   : > { %p3097_p11 = pnand %p3095_p0, %p3055_p5  ;;  %p3103_p4 = scmp.lt.s32.totalorder %s3101_s26, %s3094_s0 }
  0x74   : > { %p3098_p10 = pneg %p3097_p11  ;;  %p3104_p6 = por %p3103_p4, %p3102_p1 }
  0x76   : > { %p3105_p8 = pnand %p3104_p6, %p3098_p10 }
  0x78   : > { %3108 = shalt.err (!%p3105_p8)
}
  0x79   : > { %2887 = dma.hbm_to_vmem [thread:$0]  (!%p3399_p2), %s3441_s28, 128, %s481_s15, %s470_s13  }
  0x7a   : > { %p3907_p3 = scmp.ne.s32.totalorder %s3892_s21, 0 }
  0x7b   : > { %s3466_s18 = sand.u32 (!%p3907_p3), 1, %s3177_s30   ;;  %p3908_p5 = scmp.ne.s32.totalorder (!%p3907_p3), %s3889_s19, 0 }
  0x7c   : > { %489 = sbr.rel (%p3907_p3) target bundleno = 1872 (0x750), region = 76  ;;  %s2672_s22 = sshll.u32 (!%p3907_p3), %s3466_s18, 4 }
  0x7d   : > { %s492_s6 = scalar_lea.sflag (!%p3907_p3), [#allocation3], %s3466_s18  ;;  %s3470_s12 = scalar_lea.vmem (!%p3907_p3), [#allocation2], %s2672_s22 }
  0x81   : > { %3152 = dma.done.wait (%p3908_p5), %s492_s6, 256  }
  0x82   : > { %3154 = vsyncadd (%p3908_p5), %s492_s6, 4294967040  ;;  %s500_s2 = sand.u32 1, %s3303_s17   ;;  %s2673_s13 = sshll.u32 %s3466_s18, 3 }
  0x83   : > { %s501_s15 = scalar_lea.sflag [#allocation6], %s500_s2  ;;  %s504_s21 = scalar_lea.vmem [#allocation5], %s2673_s13 }
  0x84   : > { %3156 = dma.done.wait (%p3908_p5), %s501_s15, 128  }
  0x85   : > { %3158 = vsyncadd (%p3908_p5), %s501_s15, 4294967168  ;;  %p3909_p8 = scmp.eq.s32.totalorder %s3303_s17, 0 }
  0x87   : > { %3160 = dma.done.wait (%p3909_p8), [#allocation6], 512   ;;  %p3910_p2 = pmov %p3909_p8 }
  0x89   : > { %3162 = vsyncadd (%p3910_p2), [#allocation6], 4294966784  ;;  %p3911_p7 = pmov %p3910_p2 }
  0x8a   : > { %p3912_p12 = pmov %p3910_p2 }
  0x8b   : > { %3164 = dma.done.wait (%p3911_p7), [#allocation9], 1024  }
  0x8c   : > { %3166 = vsyncadd (%p3912_p12), [#allocation9], 4294966272  ;;  %v3194_v0 = vmov 0.0   ;;  %vm3195_vm0 = vmmov 0   ;;  %v573_v1 = vld [vmem:[#allocation7 + $0x18] sm:$0xff]  ;;  %v572_v3 = vld [vmem:[#allocation7 + $0x10] sm:$0xff] }
  0x8d   : > { %2764 = vmatprep.subr.mxu0 %v3194_v0  ;;  %2772 = vmatprep.mubr.msk.f32.mxu0 %vm3195_vm0, %v3194_v0  ;;  %v688_v2 = vld [vmem:[#allocation8 + $0x18] sm:$0xff]  ;;  %v687_v4 = vld [vmem:[#allocation8 + $0x10] sm:$0xff]  ;;  %v571_v5 = vld [vmem:[#allocation7 + $0x8] sm:$0xff]  ;;  %vm581_vm1 = vcmask 261120   ;;  %s3196_s24 = smov 96   ;;  %s3198_s2 = smov 112  }
  0x8e   : > { %2765 = vmatpush3.msra.mxu0 %v573_v1  ;;  %2775 = vmatprep.subr.mxu1 %v688_v2  ;;  %v686_v6 = vld [vmem:[#allocation8 + $0x8] sm:$0xff]  ;;  %v570_v7 = vld [vmem:[#allocation7] sm:$0xff]  ;;  %v569_v9 = vld [vmem:[%s504_s21] sm:$0xff]  ;;  %s3199_s15 = smov 104   ;;  %vm1634_vm2 = vcmask 64512   ;;  %s3202_s20 = smov 32  }
  0x8f   : > { %2766 = vmatprep.subr.mxu0 %v3194_v0  ;;  %2776 = vmatpush3.msra.mxu1 %v688_v2  ;;  %v685_v8 = vld [vmem:[#allocation8] sm:$0xff]  ;;  %v568_v11 = vld [vmem:[%s3470_s12 + $0x8] sm:$0xff]  ;;  %v2678_v12 = vld [vmem:[%s3855_s3] ss:$0 sm:$0xff]  ;;  %vm1951_vm3 = vcmask 130048   ;;  %s3204_s27 = smov 8  }
  0x90   : > { %2767 = vmatpush3.msra.mxu0 %v572_v3  ;;  %2777 = vmatprep.subr.mxu1 %v687_v4  ;;  %v567_v10 = vld [vmem:[%s3470_s12] sm:$0xff]  ;;  %s3197_s12 = smov 120   ;;  %s3205_s14 = smov 24   ;;  %vm2438_vm4 = vcmask 195584  }
  0x91   : > { %2768 = vmatprep.subr.mxu0 %v3194_v0  ;;  %2778 = vmatpush3.msra.mxu1 %v687_v4  ;;  %v2682_v14 = vld [vmem:[%s3859_s7] ss:$0 sm:$0xff]  ;;  %s3913_s0 = sld [smem:[#allocation22_spill]]  ;;  %s2720_s22 = sshll.u32 %s3303_s17, 7 }
  0x92   : > { %2769 = vmatpush3.msra.mxu0 %v571_v5  ;;  %2779 = vmatprep.subr.mxu1 %v686_v6  ;;  %v2680_v55 = vld [vmem:[%s3856_s4] ss:$0 sm:$0xff]  ;;  %s3914_s26 = sld [smem:[#allocation27_spill]]  ;;  %s565_s6 = scalar_lea.vmem [#allocation11], %s2673_s13 }
  0x93   : > { %2770 = vmatprep.subr.mxu0 %v3194_v0  ;;  %2780 = vmatpush3.msra.mxu1 %v686_v6  ;;  %v2685_v57 = vld [vmem:[%s3860_s8] ss:$0 sm:$0xff]  ;;  %s3915_s21 = sld [smem:[#allocation28_spill]]  ;;  %s2526_s28 = scalar_lea.sflag [#allocation4], %s3466_s18 }
  0x94   : > { %2771 = vmatpush3.msra.mxu0 %v570_v7  ;;  %2781 = vmatprep.subr.mxu1 %v685_v8  ;;  %v2686_v61 = vld [vmem:[%s3861_s9] ss:$0 sm:$0xff]  ;;  %s3206_s17 = smov [#allocation11]  }
  0x95   : > { %2773 = vmatmul.mubr.msk.f32.vlgmr.msra.gmra.mxu0 %vm581_vm1, %v569_v9  ;;  %2782 = vmatpush3.msra.mxu1 %v685_v8  ;;  %v2681_v63 = vld [vmem:[%s3857_s5] ss:$0 sm:$0xff]  ;;  %v3200_v9 = vmov 1983009808   ;;  %s3113_s13 = sshll.u32 %s3206_s17, 4  ;;  %s3114_s13 = int_to_ptr.vmem [resolvable:$false] %s3113_s13 }
  0x96   : > { %2783 = vmatprep.mubr.msk.f32.mxu1 %vm581_vm1, %v567_v10  ;;  %2786 = vmatprep.subr.mxu0 %v3194_v0  ;;  %v899_v10 = vunpack.c.l.s4 %v3200_v9 }
  0x97   : > { %2784 = vmatmul.mubr.msk.f32.vlgmr.msra.gmra.mxu1 %vm581_vm1, %v568_v11  ;;  %2793 = vmatprep.subr.mxu1 %v3194_v0  ;;  %p3916_p13 = scmp.ne.s32.totalorder %s3913_s0, 0 }
  0x98   : > { %2790 = vmatprep.mubr.msk.f32.mxu0 %vm3195_vm0, %v3194_v0  ;;  %2797 = vmatprep.mubr.msk.f32.mxu1 %vm3195_vm0, %v3194_v0 }
  0x99   : > { %s3814_s19 = scalar_lea.hbm %s3915_s21, %s2720_s22 }
 0x155   : > { %v651_v13 = vpop.f32.mrf.mxu0 }
 0x156   : > { %v652_v15 = vadd.f32 %v2678_v12, %v651_v13  ;;  %v901_v13 = vlaneseq }
 0x157   : > { %v2785_v16 = vpop.f32.mrf.mxu1  ;;  %v2774_v17 = vpop.f32.mrf.mxu0 }
 0x158   : > { %v3515_v18 = vadd.f32 %v2785_v16, %v2682_v14  ;;  %v657_v19 = vsel %vm581_vm1, %v652_v15, 0.0 }
 0x159   : > { %v768_v20 = vpop.f32.mrf.mxu1  ;;  %658 = vadd.xlane.f32.xlu1 %v657_v19  ;;  %v3201_v19 = vmov 1934713408  }
 0x15a   : > { %v3518_v21 = vadd.f32 %v2682_v14, %v768_v20  ;;  %v782_v22 = vsel %vm581_vm1, %v3515_v18, 0.0  ;;  %v931_v20 = vunpack.c.l.s4 %v3201_v19 }
 0x15b   : > { %783 = vadd.xlane.f32.xlu0 %v782_v22 }
 0x15c   : > { %v779_v23 = vsel %vm581_vm1, %v3518_v21, 0.0 }
 0x15f   : > { %780 = vadd.xlane.f32.xlu0 %v779_v23  ;;  %v900_v23 = vunpack.c.0.s8 %v899_v10 }
 0x1e2   : > { %v659_v24 = vpop.xlane.xlu1 %658 }
 0x1e3   : > { %v661_v25 = vmul.f32 0.03125, %v659_v24 }
 0x1e4   : > { %v784_v26 = vpop.xlane.xlu0 %783 }
 0x1e5   : > { %v662_v27 = vsub.f32 %v652_v15, %v661_v25  ;;  %v786_v28 = vmul.f32 0.03125, %v784_v26 }
 0x1e7   : > { %v788_v29 = vsub.f32 %v3515_v18, %v786_v28  ;;  %v663_v30 = vmul.f32 %v662_v27, %v662_v27 }
 0x1e8   : > { %v781_v31 = vpop.xlane.xlu0 %780 }
 0x1e9   : > { %v785_v32 = vmul.f32 0.03125, %v781_v31  ;;  %v664_v33 = vsel %vm581_vm1, %v663_v30, 0.0  ;;  %v790_v34 = vmul.f32 %v788_v29, %v788_v29 }
 0x1ea   : > { %665 = vadd.xlane.f32.xlu1 %v664_v33 }
 0x1eb   : > { %v787_v35 = vsub.f32 %v3518_v21, %v785_v32  ;;  %v794_v36 = vsel %vm581_vm1, %v790_v34, 0.0 }
 0x1ed   : > { %v789_v37 = vmul.f32 %v787_v35, %v787_v35 }
 0x1ee   : > { %795 = vadd.xlane.f32.xlu1 %v794_v36 }
 0x1ef   : > { %v791_v38 = vsel %vm581_vm1, %v789_v37, 0.0 }
 0x1f0   : > { %792 = vadd.xlane.f32.xlu0 %v791_v38 }
 0x1ff   : > { %825 = vrot.lane.b32.xlu1 %v3518_v21, %s3196_s24 }
 0x206   : > { %827 = vrot.lane.b32.xlu0 %v3515_v18, %s3196_s24 }
 0x273   : > { %v666_v39 = vpop.xlane.xlu1 %665 }
 0x274   : > { %v667_v40 = vmul.f32 0.03125, %v666_v39 }
 0x276   : > { %v668_v41 = vadd.f32 1e-05, %v667_v40 }
 0x277   : > { %v796_v42 = vpop.xlane.xlu1 %795 }
 0x278   : > { %2949 = vrsqrt.f32 %v668_v41  ;;  %v798_v43 = vmul.f32 0.03125, %v796_v42 }
 0x279   : > { %v793_v44 = vpop.xlane.xlu0 %792 }
 0x27a   : > { %v800_v45 = vadd.f32 1e-05, %v798_v43  ;;  %v797_v46 = vmul.f32 0.03125, %v793_v44 }
 0x27b   : > { %v826_v47 = vpop.permute.xlu1 %825 }
 0x27c   : > { %2951 = vrsqrt.f32 %v800_v45  ;;  %v799_v48 = vadd.f32 1e-05, %v797_v46  ;;  %v831_v49 = vsel %vm581_vm1, %v826_v47, 0.0 }
 0x27d   : > { %v828_v50 = vpop.permute.xlu0 %827  ;;  %832 = vadd.xlane.f32.xlu0 %v831_v49 }
 0x27e   : > { %2953 = vrsqrt.f32 %v799_v48  ;;  %v834_v51 = vsel %vm581_vm1, %v828_v50, 0.0 }
 0x27f   : > { %835 = vadd.xlane.f32.xlu1 %v834_v51 }
 0x285   : > { %v2950_v52 = vpop.eup %2949 }
 0x286   : > { %v670_v53 = vmul.f32 %v2950_v52, %v662_v27 }
 0x288   : > { %v677_v60 = vmul.f32 %v2680_v55, %v670_v53 }
 0x289   : > { %v2952_v54 = vpop.eup %2951 }
 0x28a   : > { %v804_v56 = vmul.f32 %v2952_v54, %v788_v29  ;;  %v684_v3 = vadd.f32 %v2681_v63, %v677_v60 }
 0x28b   : > { %v2954_v58 = vpop.eup %2953 }
 0x28c   : > { %v803_v59 = vmul.f32 %v2954_v58, %v787_v35  ;;  %v812_v62 = vmul.f32 %v2685_v57, %v804_v56  ;;  %v3552_v5 = vmul.f32 0.35355338, %v684_v3 }
 0x28e   : > { %v811_v1 = vmul.f32 %v2685_v57, %v803_v59  ;;  %v820_v4 = vadd.f32 %v2686_v61, %v812_v62 }
 0x290   : > { %v3547_v2 = vadd.f32 %v2686_v61, %v811_v1 }
 0x292   : > { %1034 = vrot.lane.b32.xlu1 %v3547_v2, %s3197_s12 }
 0x293   : > { %1036 = vrot.lane.b32.xlu0 %v820_v4, %s3197_s12 }
 0x296   : > { %887 = vrot.lane.b32.xlu1 %v3552_v5, %s3197_s12 }
 0x297   : > { %1042 = vrot.lane.b32.xlu0 %v820_v4, %s3198_s2 }
 0x29a   : > { %890 = vrot.lane.b32.xlu1 %v3552_v5, %s3198_s2 }
 0x29b   : > { %1048 = vrot.lane.b32.xlu0 %v820_v4, %s3199_s15 }
 0x29e   : > { %1046 = vrot.lane.b32.xlu1 %v3547_v2, %s3199_s15 }
 0x29f   : > { %1040 = vrot.lane.b32.xlu0 %v3547_v2, %s3198_s2 }
 0x2a2   : > { %893 = vrot.lane.b32.xlu1 %v3552_v5, %s3199_s15 }
 0x306   : > { %v833_v6 = vpop.xlane.xlu0 %832 }
 0x307   : > { %v837_v7 = vmul.f32 0.03125, %v833_v6 }
 0x308   : > { %v836_v8 = vpop.xlane.xlu1 %835 }
 0x309   : > { %v3567_v11 = vsub.f32 %v3518_v21, %v837_v7  ;;  %v838_v12 = vmul.f32 0.03125, %v836_v8  ;;  %v902_v21 = vshrl.u32 %v901_v13, 7 }
 0x30a   : > { %v1037_v14 = vpop.permute.xlu0 %1036 }
 0x30b   : > { %v3570_v15 = vsub.f32 %v3515_v18, %v838_v12  ;;  %v841_v16 = vmul.f32 %v3567_v11, %v3567_v11  ;;  %v932_v18 = vunpack.c.0.s8 %v931_v20  ;;  %v3580_v26 = vsub.s32 %v900_v23, %v902_v21 }
 0x30c   : > { %v1035_v17 = vpop.permute.xlu1 %1034 }
 0x30d   : > { %845 = vrot.lane.b32.xlu0 %v841_v16, %s3196_s24  ;;  %v842_v22 = vmul.f32 %v3570_v15, %v3570_v15  ;;  %v3582_v32 = vsub.s32 %v932_v18, %v902_v21 }
 0x30e   : > { %v1043_v24 = vpop.permute.xlu0 %1042 }
 0x30f   : > { %847 = vrot.lane.b32.xlu1 %v842_v22, %s3196_s24  ;;  %v1120_v27 = vcombine.low %v820_v4, %v1043_v24  ;;  %v1121_v28 = vcombine.high %v820_v4, %v1043_v24 }
 0x310   : > { %v3578_v25 = vpop.permute.xlu1 %887 }
 0x311   : > { %v1128_v34 = vrot.slane %v1120_v27, %v3580_v26  ;;  %v1135_v35 = vrot.slane %v1121_v28, %v3580_v26 }
 0x312   : > { %v1049_v29 = vpop.permute.xlu0 %1048 }
 0x313   : > { %v1136_v30 = vcombine.low %v1037_v14, %v1049_v29  ;;  %v1137_v31 = vcombine.high %v1037_v14, %v1049_v29 }
 0x314   : > { %v891_v33 = vpop.permute.xlu1 %890 }
 0x315   : > { %v1144_v36 = vrot.slane %v1136_v30, %v3580_v26  ;;  %v1151_v37 = vrot.slane %v1137_v31, %v3580_v26  ;;  %v896_v43 = vcombine.low %v3552_v5, %v891_v33  ;;  %v897_v44 = vcombine.high %v3552_v5, %v891_v33 }
 0x316   : > { %v1041_v38 = vpop.permute.xlu0 %1040 }
 0x317   : > { %v1152_v39 = vcombine.low %v1128_v34, %v1144_v36  ;;  %v1153_v40 = vcombine.high %v1128_v34, %v1144_v36  ;;  %v1168_v41 = vcombine.low %v1135_v35, %v1151_v37  ;;  %v1169_v42 = vcombine.high %v1135_v35, %v1151_v37 }
 0x318   : > { %v1052_v45 = vcombine.low %v3547_v2, %v1041_v38  ;;  %v1053_v46 = vcombine.high %v3547_v2, %v1041_v38  ;;  %v1047_v47 = vpop.permute.xlu1 %1046  ;;  %v904_v10 = vrot.slane %v896_v43, %v3580_v26  ;;  %v911_v12 = vrot.slane %v897_v44, %v3580_v26 }
 0x319   : > { %v1160_v48 = vrot.slane %v1152_v39, %v3582_v32  ;;  %v1167_v49 = vrot.slane %v1153_v40, %v3582_v32  ;;  %v1176_v50 = vrot.slane %v1168_v41, %v3582_v32  ;;  %v1183_v51 = vrot.slane %v1169_v42, %v3582_v32 }
 0x31a   : > { %v1060_v52 = vrot.slane %v1052_v45, %v3580_v26  ;;  %v1067_v53 = vrot.slane %v1053_v46, %v3580_v26  ;;  %v1068_v54 = vcombine.low %v1035_v17, %v1047_v47  ;;  %v1069_v55 = vcombine.high %v1035_v17, %v1047_v47 }
 0x31b   : > { %v1256_v56 = vcombine.low %v1160_v48, %v1167_v49  ;;  %v2693_v57 = vcombine.high %v1160_v48, %v1167_v49  ;;  %v1272_v58 = vcombine.low %v1176_v50, %v1183_v51  ;;  %v2694_v59 = vcombine.high %v1176_v50, %v1183_v51 }
 0x31c   : > { %v1076_v60 = vrot.slane %v1068_v54, %v3580_v26  ;;  %v1083_v61 = vrot.slane %v1069_v55, %v3580_v26  ;;  %v894_v7 = vpop.permute.xlu1 %893 }
 0x31d   : > { %v3601_v62 = vrot.slane %v1256_v56, %v3580_v26  ;;  %v3604_v63 = vrot.slane %v2693_v57, %v3580_v26  ;;  %v3607_v1 = vrot.slane %v1272_v58, %v3580_v26  ;;  %v3610_v2 = vrot.slane %v2694_v59, %v3580_v26 }
 0x31e   : > { %v1084_v3 = vcombine.low %v1060_v52, %v1076_v60  ;;  %v1085_v4 = vcombine.high %v1060_v52, %v1076_v60  ;;  %v1100_v5 = vcombine.low %v1067_v53, %v1083_v61  ;;  %v1101_v6 = vcombine.high %v1067_v53, %v1083_v61 }
 0x31f   : > { %v1288_v8 = vcombine.low %v3601_v62, %v3604_v63  ;;  %v1304_v9 = vcombine.low %v3607_v1, %v3610_v2  ;;  %v912_v19 = vcombine.low %v3578_v25, %v894_v7  ;;  %v913_v20 = vcombine.high %v3578_v25, %v894_v7 }
 0x320   : > { %v1092_v13 = vrot.slane %v1084_v3, %v3582_v32  ;;  %v1099_v14 = vrot.slane %v1085_v4, %v3582_v32  ;;  %v1108_v16 = vrot.slane %v1100_v5, %v3582_v32  ;;  %v1115_v17 = vrot.slane %v1101_v6, %v3582_v32 }
 0x321   : > { %v1296_v22 = vrot.slane %v1288_v8, %v3582_v32  ;;  %v1312_v23 = vrot.slane %v1304_v9, %v3582_v32  ;;  %v920_v28 = vrot.slane %v912_v19, %v3580_v26  ;;  %v927_v29 = vrot.slane %v913_v20, %v3580_v26 }
 0x322   : > { %v1188_v21 = vcombine.low %v1092_v13, %v1099_v14  ;;  %v2691_v24 = vcombine.high %v1092_v13, %v1099_v14  ;;  %v1204_v18 = vcombine.low %v1108_v16, %v1115_v17  ;;  %v2692_v27 = vcombine.high %v1108_v16, %v1115_v17 }
 0x323   : > { %v1320_v30 = vcombine.low %v1296_v22, %v1312_v23  ;;  %v1321_v31 = vcombine.high %v1296_v22, %v1312_v23  ;;  %v928_v36 = vcombine.low %v904_v10, %v920_v28  ;;  %v929_v37 = vcombine.high %v904_v10, %v920_v28  ;;  %v2687_v28 = vld [vmem:[%s3862_s10] ss:$0 sm:$0xff] }
 0x324   : > { %v1195_v33 = vrot.slane %v1188_v21, %v3580_v26  ;;  %v1203_v34 = vrot.slane %v2691_v24, %v3580_v26  ;;  %v1211_v25 = vrot.slane %v1204_v18, %v3580_v26  ;;  %v1219_v35 = vrot.slane %v2692_v27, %v3580_v26  ;;  %v2688_v27 = vld [vmem:[%s3863_s11] ss:$0 sm:$0xff] }
 0x325   : > { %v944_v38 = vcombine.low %v911_v12, %v927_v29  ;;  %v945_v39 = vcombine.high %v911_v12, %v927_v29  ;;  %2787 = vmatpush3.xpose.msk.msra.mxu0 %vm1634_vm2, %v1320_v30  ;;  %2794 = vmatpush3.xpose.msk.msra.mxu1 %vm1634_vm2, %v1321_v31  ;;  %v936_v42 = vrot.slane %v928_v36, %v3582_v32 }
 0x326   : > { %v1220_v40 = vcombine.low %v1195_v33, %v1203_v34  ;;  %v1236_v41 = vcombine.low %v1211_v25, %v1219_v35  ;;  %v943_v43 = vrot.slane %v929_v37, %v3582_v32  ;;  %2788 = vmatprep.subr.mxu0 %v3194_v0  ;;  %2795 = vmatprep.subr.mxu1 %v3194_v0 }
 0x327   : > { %v952_v44 = vrot.slane %v944_v38, %v3582_v32  ;;  %v959_v45 = vrot.slane %v945_v39, %v3582_v32  ;;  %v1289_v52 = vcombine.high %v3601_v62, %v3604_v63  ;;  %v1305_v53 = vcombine.high %v3607_v1, %v3610_v2 }
 0x328   : > { %v1228_v46 = vrot.slane %v1220_v40, %v3582_v32  ;;  %v1244_v47 = vrot.slane %v1236_v41, %v3582_v32  ;;  %v964_v48 = vcombine.low %v936_v42, %v943_v43  ;;  %v2689_v49 = vcombine.high %v936_v42, %v943_v43 }
 0x329   : > { %v980_v50 = vcombine.low %v952_v44, %v959_v45  ;;  %v2690_v51 = vcombine.high %v952_v44, %v959_v45  ;;  %v1221_v62 = vcombine.high %v1195_v33, %v1203_v34  ;;  %v1237_v63 = vcombine.high %v1211_v25, %v1219_v35 }
 0x32a   : > { %v1252_v54 = vcombine.low %v1228_v46, %v1244_v47  ;;  %v1253_v55 = vcombine.high %v1228_v46, %v1244_v47  ;;  %v971_v56 = vrot.slane %v964_v48, %v3580_v26  ;;  %v979_v57 = vrot.slane %v2689_v49, %v3580_v26 }
 0x32b   : > { %v987_v58 = vrot.slane %v980_v50, %v3580_v26  ;;  %v995_v59 = vrot.slane %v2690_v51, %v3580_v26  ;;  %v1303_v1 = vrot.slane %v1289_v52, %v3582_v32  ;;  %v1319_v2 = vrot.slane %v1305_v53, %v3582_v32 }
 0x32c   : > { %2789 = vmatpush3.xpose.msk.msra.mxu0 %vm1634_vm2, %v1252_v54  ;;  %2796 = vmatpush3.xpose.msk.msra.mxu1 %vm1634_vm2, %v1253_v55  ;;  %v996_v60 = vcombine.low %v971_v56, %v979_v57  ;;  %v997_v5 = vcombine.high %v971_v56, %v979_v57  ;;  %v1235_v12 = vrot.slane %v1221_v62, %v3582_v32 }
 0x32d   : > { %v1012_v61 = vcombine.low %v987_v58, %v995_v59  ;;  %2800 = vmatprep.subr.mxu0 %v3194_v0  ;;  %2807 = vmatprep.subr.mxu1 %v3194_v0  ;;  %v1013_v6 = vcombine.high %v987_v58, %v995_v59  ;;  %v1322_v9 = vcombine.low %v1303_v1, %v1319_v2 }
 0x32e   : > { %v1004_v3 = vrot.slane %v996_v60, %v3582_v32  ;;  %v1323_v10 = vcombine.high %v1303_v1, %v1319_v2  ;;  %v1251_v13 = vrot.slane %v1237_v63, %v3582_v32  ;;  %v1011_v14 = vrot.slane %v997_v5, %v3582_v32 }
 0x32f   : > { %v1020_v4 = vrot.slane %v1012_v61, %v3582_v32  ;;  %v1027_v16 = vrot.slane %v1013_v6, %v3582_v32 }
 0x330   : > { %v1254_v17 = vcombine.low %v1235_v12, %v1251_v13  ;;  %v1255_v19 = vcombine.high %v1235_v12, %v1251_v13 }
 0x331   : > { %v1028_v7 = vcombine.low %v1004_v3, %v1020_v4  ;;  %v1029_v8 = vcombine.high %v1004_v3, %v1020_v4  ;;  %v1030_v20 = vcombine.low %v1011_v14, %v1027_v16  ;;  %v1031_v22 = vcombine.high %v1011_v14, %v1027_v16 }
 0x333   : > { %2791 = vmatmul.mubr.msk.f32.vlgmr.msra.gmra.mxu0 %vm1634_vm2, %v1028_v7  ;;  %2798 = vmatmul.mubr.msk.f32.vlgmr.msra.gmra.mxu1 %vm1634_vm2, %v1029_v8 }
 0x334   : > { %2801 = vmatpush3.xpose.msk.msra.mxu0 %vm1634_vm2, %v1322_v9  ;;  %2808 = vmatpush3.xpose.msk.msra.mxu1 %vm1634_vm2, %v1323_v10 }
 0x335   : > { %2802 = vmatprep.subr.mxu0 %v3194_v0  ;;  %2809 = vmatprep.subr.mxu1 %v3194_v0 }
 0x336   : > { %2804 = vmatprep.mubr.msk.f32.mxu0 %vm3195_vm0, %v3194_v0  ;;  %2811 = vmatprep.mubr.msk.f32.mxu1 %vm3195_vm0, %v3194_v0 }
 0x338   : > { %2803 = vmatpush3.xpose.msk.msra.mxu0 %vm1634_vm2, %v1254_v17  ;;  %2810 = vmatpush3.xpose.msk.msra.mxu1 %vm1634_vm2, %v1255_v19 }
 0x339   : > { %2814 = vmatprep.subr.mxu1 %v3194_v0  ;;  %2828 = vmatprep.subr.mxu0 %v3194_v0 }
 0x33b   : > { %2805 = vmatmul.mubr.msk.f32.vlgmr.msra.gmra.mxu0 %vm1634_vm2, %v1030_v20  ;;  %2812 = vmatmul.mubr.msk.f32.vlgmr.msra.gmra.mxu1 %vm1634_vm2, %v1031_v22 }
 0x33c   : > { %2818 = vmatprep.mubr.msk.f32.mxu1 %vm3195_vm0, %v3194_v0  ;;  %2832 = vmatprep.mubr.msk.f32.mxu0 %vm3195_vm0, %v3194_v0 }
 0x37f   : > { %v846_v23 = vpop.permute.xlu0 %845 }
 0x380   : > { %v851_v21 = vsel %vm581_vm1, %v846_v23, 0.0 }
 0x381   : > { %v848_v24 = vpop.permute.xlu1 %847  ;;  %852 = vadd.xlane.f32.xlu0 %v851_v21 }
 0x382   : > { %v854_v18 = vsel %vm581_vm1, %v848_v24, 0.0 }
 0x383   : > { %855 = vadd.xlane.f32.xlu1 %v854_v18 }
 0x394   : > { %880 = vrot.lane.b32.xlu1 %v2688_v27, %s3202_s20 }
 0x397   : > { %870 = vrot.lane.b32.xlu0 %v2687_v28, %s3202_s20  ;;  %s3115_s20 = scalar_lea.vmem %s3114_s13, 256 }
 0x3f3   : > { %v3690_v29 = vpop.f32.mrf.mxu0  ;;  %v1789_v30 = vpop.f32.mrf.mxu1 }
 0x3f4   : > { %v1952_v54 = vsel %vm1951_vm3, %v3690_v29, -inf }
 0x3f5   : > { %v2792_v31 = vpop.f32.mrf.mxu0  ;;  %v2799_v33 = vpop.f32.mrf.mxu1 }
 0x3fb   : > { %v1868_v34 = vpop.f32.mrf.mxu0  ;;  %v1947_v25 = vpop.f32.mrf.mxu1 }
 0x3fc   : > { %v1961_v53 = vsel %vm1951_vm3, %v1947_v25, -inf }
 0x3fd   : > { %v2806_v35 = vpop.f32.mrf.mxu0  ;;  %v2813_v36 = vpop.f32.mrf.mxu1 }
 0x40a   : > { %v853_v37 = vpop.xlane.xlu0 %852 }
 0x40b   : > { %v857_v38 = vmul.f32 0.03125, %v853_v37 }
 0x40c   : > { %v856_v39 = vpop.xlane.xlu1 %855 }
 0x40d   : > { %v859_v40 = vadd.f32 1e-05, %v857_v38  ;;  %v858_v41 = vmul.f32 0.03125, %v856_v39 }
 0x40e   : > { %v871_v45 = vpop.permute.xlu0 %870 }
 0x40f   : > { %2955 = vrsqrt.f32 %v859_v40  ;;  %v860_v42 = vadd.f32 1e-05, %v858_v41 }
 0x410   : > { %v881_v48 = vpop.permute.xlu1 %880 }
 0x411   : > { %2957 = vrsqrt.f32 %v860_v42 }
 0x41c   : > { %v2956_v43 = vpop.eup %2955 }
 0x41d   : > { %v863_v46 = vmul.f32 %v2956_v43, %v3567_v11  ;;  %v1955_v11 = vsel %vm1951_vm3, %v1789_v30, -inf }
 0x41e   : > { %v2958_v44 = vpop.eup %2957 }
 0x41f   : > { %v864_v47 = vmul.f32 %v2958_v44, %v3570_v15  ;;  %v873_v50 = vmul.f32 %v871_v45, %v863_v46  ;;  %v1958_v15 = vsel %vm1951_vm3, %v1868_v34, -inf }
 0x421   : > { %v874_v49 = vmul.f32 %v871_v45, %v864_v47  ;;  %v883_v52 = vadd.f32 %v881_v48, %v873_v50 }
 0x423   : > { %v884_v51 = vadd.f32 %v881_v48, %v874_v49 }
 0x425   : > { %1332 = vrot.lane.b32.xlu0 %v884_v51, %s3198_s2  ;;  %1328 = vrot.lane.b32.xlu1 %v884_v51, %s3197_s12 }
 0x429   : > { %1336 = vrot.lane.b32.xlu1 %v884_v51, %s3199_s15  ;;  %1326 = vrot.lane.b32.xlu0 %v883_v52, %s3197_s12  ;;  %s2539_s12 = sshll.u32 %s565_s6, 4  ;;  %s2540_s12 = int_to_ptr.vmem [resolvable:$true] %s2539_s12 }
 0x42a   : > { %s3109_s25 = scalar_lea.vmem %s2540_s12, 128  ;;  %p3116_p10 = scmp.lt.s32.totalorder %s2540_s12, %s3114_s13 }
 0x42b   : > { %p3110_p9 = scmp.ne.s32.totalorder %s2540_s12, %s3109_s25  ;;  %p3117_p1 = scmp.lt.s32.totalorder %s3115_s20, %s3109_s25 }
 0x42d   : > { %1340 = vrot.lane.b32.xlu1 %v884_v51, %s3196_s24  ;;  %1334 = vrot.lane.b32.xlu0 %v883_v52, %s3199_s15  ;;  %p3111_p0 = pnand %p3110_p9, %p3916_p13  ;;  %p3118_p4 = por %p3117_p1, %p3116_p10 }
 0x42f   : > { %p3112_p11 = pneg %p3111_p0 }
 0x431   : > { %1330 = vrot.lane.b32.xlu1 %v883_v52, %s3198_s2  ;;  %p3119_p6 = pnand %p3118_p4, %p3112_p11 }
 0x435   : > { %1338 = vrot.lane.b32.xlu1 %v883_v52, %s3196_s24 }
 0x44c   : > { %1956 = vmax.xlane.f32.xlu0 %v1955_v11 }
 0x450   : > { %1959 = vmax.xlane.f32.xlu0 %v1958_v15 }
 0x454   : > { %1962 = vmax.xlane.f32.xlu0 %v1961_v53 }
 0x459   : > { %1953 = vmax.xlane.f32.xlu1 %v1952_v54 }
 0x497   : > { %v1333_v55 = vpop.permute.xlu0 %1332  ;;  %v1329_v56 = vpop.permute.xlu1 %1328 }
 0x498   : > { %1348 = vrot.lane.b32.xlu1 %v1333_v55, %s3196_s24  ;;  %1344 = vrot.lane.b32.xlu0 %v1329_v56, %s3196_s24 }
 0x49b   : > { %v1337_v57 = vpop.permute.xlu1 %1336  ;;  %v1327_v58 = vpop.permute.xlu0 %1326 }
 0x49c   : > { %1352 = vrot.lane.b32.xlu1 %v1337_v57, %s3196_s24  ;;  %1342 = vrot.lane.b32.xlu0 %v1327_v58, %s3196_s24 }
 0x49f   : > { %v1341_v59 = vpop.permute.xlu1 %1340  ;;  %v1335_v60 = vpop.permute.xlu0 %1334 }
 0x4a0   : > { %1350 = vrot.lane.b32.xlu0 %v1335_v60, %s3196_s24 }
 0x4a3   : > { %v1331_v61 = vpop.permute.xlu1 %1330 }
 0x4a4   : > { %1346 = vrot.lane.b32.xlu1 %v1331_v61, %s3196_s24  ;;  %s3203_s24 = smov 16  }
 0x4a7   : > { %v1339_v6 = vpop.permute.xlu1 %1338 }
 0x4d5   : > { %v1957_v62 = vpop.xlane.xlu0 %1956 }
 0x4d6   : > { %v1965_v63 = vsub.f32 %v1789_v30, %v1957_v62 }
 0x4d8   : > { %v1970_v1 = vmul.f32 1.442695, %v1965_v63 }
 0x4d9   : > { %v1960_v2 = vpop.xlane.xlu0 %1959 }
 0x4da   : > { %2959 = vpow2.f32 %v1970_v1  ;;  %v1966_v3 = vsub.f32 %v1868_v34, %v1960_v2 }
 0x4dc   : > { %v1972_v4 = vmul.f32 1.442695, %v1966_v3 }
 0x4dd   : > { %v1963_v5 = vpop.xlane.xlu0 %1962 }
 0x4de   : > { %2961 = vpow2.f32 %v1972_v4  ;;  %v1967_v7 = vsub.f32 %v1947_v25, %v1963_v5 }
 0x4e0   : > { %v1974_v8 = vmul.f32 1.442695, %v1967_v7 }
 0x4e2   : > { %2963 = vpow2.f32 %v1974_v8  ;;  %v1954_v9 = vpop.xlane.xlu1 %1953 }
 0x4e3   : > { %v1964_v10 = vsub.f32 %v3690_v29, %v1954_v9 }
 0x4e5   : > { %v1968_v12 = vmul.f32 1.442695, %v1964_v10 }
 0x4e7   : > { %v3714_v13 = vpop.eup %2959  ;;  %2965 = vpow2.f32 %v1968_v12 }
 0x4e8   : > { %v1979_v14 = vsel %vm1951_vm3, %v3714_v13, 0.0 }
 0x4e9   : > { %1980 = vadd.xlane.f32.xlu0 %v1979_v14 }
 0x4eb   : > { %v3718_v16 = vpop.eup %2961 }
 0x4ec   : > { %v1982_v17 = vsel %vm1951_vm3, %v3718_v16, 0.0 }
 0x4ed   : > { %1983 = vadd.xlane.f32.xlu0 %v1982_v17 }
 0x4ef   : > { %v3722_v19 = vpop.eup %2963 }
 0x4f0   : > { %v1985_v20 = vsel %vm1951_vm3, %v3722_v19, 0.0 }
 0x4f1   : > { %1986 = vadd.xlane.f32.xlu0 %v1985_v20 }
 0x4f4   : > { %v3726_v22 = vpop.eup %2965 }
 0x4f5   : > { %v1976_v23 = vsel %vm1951_vm3, %v3726_v22, 0.0 }
 0x4f6   : > { %1977 = vadd.xlane.f32.xlu1 %v1976_v23 }
 0x50a   : > { %v1349_v21 = vpop.permute.xlu1 %1348  ;;  %v1345_v24 = vpop.permute.xlu0 %1344 }
 0x50b   : > { %v1430_v18 = vcombine.low %v1341_v59, %v1349_v21  ;;  %v1431_v27 = vcombine.high %v1341_v59, %v1349_v21 }
 0x50d   : > { %v1438_v33 = vrot.slane %v1430_v18, %v3580_v26  ;;  %v1445_v34 = vrot.slane %v1431_v27, %v3580_v26 }
 0x50e   : > { %v1353_v28 = vpop.permute.xlu1 %1352  ;;  %v1343_v29 = vpop.permute.xlu0 %1342 }
 0x50f   : > { %v1446_v30 = vcombine.low %v1345_v24, %v1353_v28  ;;  %v1447_v31 = vcombine.high %v1345_v24, %v1353_v28 }
 0x511   : > { %v1454_v25 = vrot.slane %v1446_v30, %v3580_v26  ;;  %v1461_v35 = vrot.slane %v1447_v31, %v3580_v26 }
 0x512   : > { %v1351_v40 = vpop.permute.xlu0 %1350 }
 0x513   : > { %v1462_v36 = vcombine.low %v1438_v33, %v1454_v25  ;;  %v1463_v37 = vcombine.high %v1438_v33, %v1454_v25  ;;  %v1478_v38 = vcombine.low %v1445_v34, %v1461_v35  ;;  %v1479_v39 = vcombine.high %v1445_v34, %v1461_v35 }
 0x514   : > { %v1378_v45 = vcombine.low %v1343_v29, %v1351_v40  ;;  %v1379_v46 = vcombine.high %v1343_v29, %v1351_v40 }
 0x515   : > { %v1470_v41 = vrot.slane %v1462_v36, %v3582_v32  ;;  %v1477_v42 = vrot.slane %v1463_v37, %v3582_v32  ;;  %v1486_v43 = vrot.slane %v1478_v38, %v3582_v32  ;;  %v1493_v44 = vrot.slane %v1479_v39, %v3582_v32 }
 0x516   : > { %v1347_v47 = vpop.permute.xlu1 %1346  ;;  %v1386_v56 = vrot.slane %v1378_v45, %v3580_v26  ;;  %v1393_v57 = vrot.slane %v1379_v46, %v3580_v26 }
 0x517   : > { %v1566_v48 = vcombine.low %v1470_v41, %v1477_v42  ;;  %v2697_v49 = vcombine.high %v1470_v41, %v1477_v42  ;;  %v1582_v50 = vcombine.low %v1486_v43, %v1493_v44  ;;  %v2698_v51 = vcombine.high %v1486_v43, %v1493_v44 }
 0x518   : > { %v1362_v52 = vcombine.low %v1339_v6, %v1347_v47  ;;  %v1363_v11 = vcombine.high %v1339_v6, %v1347_v47 }
 0x519   : > { %v1573_v15 = vrot.slane %v1566_v48, %v3580_v26  ;;  %v1581_v53 = vrot.slane %v2697_v49, %v3580_v26  ;;  %v1589_v54 = vrot.slane %v1582_v50, %v3580_v26  ;;  %v1597_v55 = vrot.slane %v2698_v51, %v3580_v26 }
 0x51a   : > { %v1370_v58 = vrot.slane %v1362_v52, %v3580_v26  ;;  %v1377_v59 = vrot.slane %v1363_v11, %v3580_v26 }
 0x51b   : > { %v1598_v60 = vcombine.low %v1573_v15, %v1581_v53  ;;  %v1614_v61 = vcombine.low %v1589_v54, %v1597_v55  ;;  %v1599_v62 = vcombine.high %v1573_v15, %v1581_v53  ;;  %v1615_v63 = vcombine.high %v1589_v54, %v1597_v55 }
 0x51c   : > { %v1394_v1 = vcombine.low %v1370_v58, %v1386_v56  ;;  %v1395_v2 = vcombine.high %v1370_v58, %v1386_v56  ;;  %v1410_v3 = vcombine.low %v1377_v59, %v1393_v57  ;;  %v1411_v4 = vcombine.high %v1377_v59, %v1393_v57 }
 0x51d   : > { %v1606_v5 = vrot.slane %v1598_v60, %v3582_v32  ;;  %v1622_v6 = vrot.slane %v1614_v61, %v3582_v32  ;;  %v1613_v7 = vrot.slane %v1599_v62, %v3582_v32  ;;  %v1629_v8 = vrot.slane %v1615_v63, %v3582_v32 }
 0x51e   : > { %v1402_v9 = vrot.slane %v1394_v1, %v3582_v32  ;;  %v1409_v10 = vrot.slane %v1395_v2, %v3582_v32  ;;  %v1418_v12 = vrot.slane %v1410_v3, %v3582_v32  ;;  %v1425_v14 = vrot.slane %v1411_v4, %v3582_v32 }
 0x51f   : > { %v1630_v17 = vcombine.low %v1606_v5, %v1622_v6  ;;  %v1632_v20 = vcombine.low %v1613_v7, %v1629_v8  ;;  %v1631_v41 = vcombine.high %v1606_v5, %v1622_v6  ;;  %v1633_v43 = vcombine.high %v1613_v7, %v1629_v8 }
 0x520   : > { %v1498_v23 = vcombine.low %v1402_v9, %v1409_v10  ;;  %v2695_v21 = vcombine.high %v1402_v9, %v1409_v10  ;;  %v1514_v24 = vcombine.low %v1418_v12, %v1425_v14  ;;  %v2696_v18 = vcombine.high %v1418_v12, %v1425_v14  ;;  %v2442_v9 = vld [vmem:[#allocation10 + $0x10] sm:$0xff]  ;;  %v2441_v10 = vld [vmem:[#allocation10 + $0x8] sm:$0xff] }
 0x521   : > { %2815 = vmatpush3.msra.mxu1 %v1630_v17  ;;  %2829 = vmatpush3.msra.mxu0 %v1632_v20 }
 0x522   : > { %v1505_v27 = vrot.slane %v1498_v23, %v3580_v26  ;;  %v1513_v28 = vrot.slane %v2695_v21, %v3580_v26  ;;  %v1521_v29 = vrot.slane %v1514_v24, %v3580_v26  ;;  %v1529_v30 = vrot.slane %v2696_v18, %v3580_v26  ;;  %2816 = vmatprep.subr.mxu1 %v3194_v0 }
 0x523   : > { %2830 = vmatprep.subr.mxu0 %v3194_v0 }
 0x524   : > { %v1530_v31 = vcombine.low %v1505_v27, %v1513_v28  ;;  %v1546_v33 = vcombine.low %v1521_v29, %v1529_v30  ;;  %v1531_v34 = vcombine.high %v1505_v27, %v1513_v28  ;;  %v1547_v25 = vcombine.high %v1521_v29, %v1529_v30  ;;  %v2440_v27 = vld [vmem:[#allocation10] sm:$0xff] }
 0x526   : > { %v1538_v35 = vrot.slane %v1530_v31, %v3582_v32  ;;  %v1554_v36 = vrot.slane %v1546_v33, %v3582_v32  ;;  %v1545_v37 = vrot.slane %v1531_v34, %v3582_v32  ;;  %v1561_v38 = vrot.slane %v1547_v25, %v3582_v32 }
 0x528   : > { %v1562_v39 = vcombine.low %v1538_v35, %v1554_v36  ;;  %v1564_v40 = vcombine.low %v1545_v37, %v1561_v38  ;;  %v1563_v42 = vcombine.high %v1538_v35, %v1554_v36 }
 0x52a   : > { %2817 = vmatpush3.msra.mxu1 %v1562_v39  ;;  %2831 = vmatpush3.msra.mxu0 %v1564_v40 }
 0x52b   : > { %2819 = vmatmul.mubr.msk.f32.vlgmr.msra.gmra.mxu1 %vm1951_vm3, %v3726_v22  ;;  %2821 = vmatprep.subr.mxu1 %v3194_v0  ;;  %v1565_v22 = vcombine.high %v1545_v37, %v1561_v38 }
 0x52c   : > { %2833 = vmatmul.mubr.msk.f32.vlgmr.msra.gmra.mxu0 %vm1951_vm3, %v3718_v16  ;;  %2822 = vmatpush3.msra.mxu1 %v1631_v41  ;;  %v2443_v16 = vld [vmem:[#allocation10 + $0x18] sm:$0xff] }
 0x52d   : > { %2823 = vmatprep.subr.mxu1 %v3194_v0  ;;  %2825 = vmatprep.mubr.msk.f32.mxu1 %vm3195_vm0, %v3194_v0 }
 0x52e   : > { %2824 = vmatpush3.msra.mxu1 %v1563_v42  ;;  %2842 = vmatprep.subr.mxu0 %v3194_v0 }
 0x52f   : > { %2826 = vmatmul.mubr.msk.f32.vlgmr.msra.gmra.mxu1 %vm1951_vm3, %v3714_v13  ;;  %2835 = vmatprep.subr.mxu1 %v3194_v0 }
 0x530   : > { %2836 = vmatpush3.msra.mxu1 %v1633_v43  ;;  %2839 = vmatprep.mubr.msk.f32.mxu1 %vm3195_vm0, %v3194_v0 }
 0x531   : > { %2837 = vmatprep.subr.mxu1 %v3194_v0  ;;  %2850 = vmatprep.mubr.msk.f32.mxu0 %vm3195_vm0, %v3194_v0 }
 0x532   : > { %2838 = vmatpush3.msra.mxu1 %v1565_v22  ;;  %2843 = vmatpush3.msra.mxu0 %v2443_v16 }
 0x533   : > { %2840 = vmatmul.mubr.msk.f32.vlgmr.msra.gmra.mxu1 %vm1951_vm3, %v3722_v19  ;;  %2844 = vmatprep.subr.mxu0 %v3194_v0 }
 0x534   : > { %2845 = vmatpush3.msra.mxu0 %v2442_v9 }
 0x535   : > { %2846 = vmatprep.subr.mxu0 %v3194_v0 }
 0x536   : > { %2847 = vmatpush3.msra.mxu0 %v2441_v10 }
 0x537   : > { %2848 = vmatprep.subr.mxu0 %v3194_v0 }
 0x538   : > { %2849 = vmatpush3.msra.mxu0 %v2440_v27 }
 0x572   : > { %v1981_v13 = vpop.xlane.xlu0 %1980 }
 0x576   : > { %v1984_v44 = vpop.xlane.xlu0 %1983 }
 0x577   : > { %2967 = vrcp.f32 %v1984_v44  ;;  %v2717_v44 = vld [vmem:[%s3914_s26] ss:$0 sm:$0xff] }
 0x57a   : > { %v1987_v46 = vpop.xlane.xlu0 %1986 }
 0x57f   : > { %v1978_v45 = vpop.xlane.xlu1 %1977 }
 0x580   : > { %2969 = vrcp.f32 %v1978_v45 }
 0x581   : > { %2971 = vrcp.f32 %v1981_v13 }
 0x582   : > { %2973 = vrcp.f32 %v1987_v46 }
 0x584   : > { %v2968_v50 = vpop.eup %2967 }
 0x58d   : > { %v2970_v52 = vpop.eup %2969 }
 0x58e   : > { %v2972_v54 = vpop.eup %2971 }
 0x58f   : > { %v2974_v55 = vpop.eup %2973 }
 0x5eb   : > { %v2057_v47 = vpop.f32.mrf.mxu1 }
 0x5ec   : > { %v2203_v48 = vpop.f32.mrf.mxu0  ;;  %v2284_v19 = vmul.f32 %v2970_v52, %v2057_v47 }
 0x5ed   : > { %v2820_v49 = vpop.f32.mrf.mxu1  ;;  %v2286_v15 = vmul.f32 %v2968_v50, %v2203_v48 }
 0x5ee   : > { %v2834_v51 = vpop.f32.mrf.mxu0 }
 0x5ef   : > { %v2130_v11 = vpop.f32.mrf.mxu1  ;;  %v2288_v57 = vcombine.low %v2284_v19, %v2286_v15  ;;  %v2289_v58 = vcombine.high %v2284_v19, %v2286_v15 }
 0x5f0   : > { %v2285_v59 = vmul.f32 %v2972_v54, %v2130_v11 }
 0x5f1   : > { %v2827_v53 = vpop.f32.mrf.mxu1  ;;  %v2296_v1 = vrot.slane %v2288_v57, %v3580_v26  ;;  %v2303_v2 = vrot.slane %v2289_v58, %v3580_v26 }
 0x5f3   : > { %v2276_v56 = vpop.f32.mrf.mxu1 }
 0x5f4   : > { %v2287_v60 = vmul.f32 %v2974_v55, %v2276_v56 }
 0x5f5   : > { %v2841_v61 = vpop.f32.mrf.mxu1 }
 0x5f6   : > { %v2304_v62 = vcombine.low %v2285_v59, %v2287_v60  ;;  %v2305_v63 = vcombine.high %v2285_v59, %v2287_v60 }
 0x5f8   : > { %v2312_v3 = vrot.slane %v2304_v62, %v3580_v26  ;;  %v2319_v4 = vrot.slane %v2305_v63, %v3580_v26 }
 0x5fa   : > { %v2320_v5 = vcombine.low %v2296_v1, %v2312_v3  ;;  %v2321_v6 = vcombine.high %v2296_v1, %v2312_v3  ;;  %v2336_v7 = vcombine.low %v2303_v2, %v2319_v4  ;;  %v2337_v8 = vcombine.high %v2303_v2, %v2319_v4 }
 0x5fc   : > { %v2328_v12 = vrot.slane %v2320_v5, %v3582_v32  ;;  %v2335_v14 = vrot.slane %v2321_v6, %v3582_v32  ;;  %v2344_v17 = vrot.slane %v2336_v7, %v3582_v32  ;;  %v2351_v20 = vrot.slane %v2337_v8, %v3582_v32 }
 0x5fe   : > { %v2356_v23 = vcombine.low %v2328_v12, %v2335_v14  ;;  %v2715_v21 = vcombine.high %v2328_v12, %v2335_v14  ;;  %v2372_v24 = vcombine.low %v2344_v17, %v2351_v20  ;;  %v2716_v18 = vcombine.high %v2344_v17, %v2351_v20 }
 0x600   : > { %v2363_v28 = vrot.slane %v2356_v23, %v3580_v26  ;;  %v2371_v29 = vrot.slane %v2715_v21, %v3580_v26  ;;  %v2379_v30 = vrot.slane %v2372_v24, %v3580_v26  ;;  %v2387_v31 = vrot.slane %v2716_v18, %v3580_v26 }
 0x602   : > { %v2389_v33 = vcombine.high %v2363_v28, %v2371_v29  ;;  %v2405_v34 = vcombine.high %v2379_v30, %v2387_v31  ;;  %v2388_v25 = vcombine.low %v2363_v28, %v2371_v29  ;;  %v2404_v35 = vcombine.low %v2379_v30, %v2387_v31 }
 0x604   : > { %v2403_v36 = vrot.slane %v2389_v33, %v3582_v32  ;;  %v2419_v37 = vrot.slane %v2405_v34, %v3582_v32  ;;  %v2396_v0 = vrot.slane %v2388_v25, %v3582_v32  ;;  %v2412_v38 = vrot.slane %v2404_v35, %v3582_v32 }
 0x606   : > { %v2422_v39 = vcombine.low %v2403_v36, %v2419_v37  ;;  %v2421_v40 = vcombine.high %v2396_v0, %v2412_v38  ;;  %v2420_v41 = vcombine.low %v2396_v0, %v2412_v38  ;;  %v2423_v26 = vcombine.high %v2403_v36, %v2419_v37 }
 0x608   : > { %2429 = vrot.lane.b32.xlu0 %v2422_v39, %s3203_s24  ;;  %2425 = vrot.lane.b32.xlu1 %v2421_v40, %s3204_s27 }
 0x60c   : > { %2433 = vrot.lane.b32.xlu1 %v2423_v26, %s3205_s14 }
 0x67a   : > { %v2426_v42 = vpop.permute.xlu1 %2425  ;;  %v2430_v43 = vpop.permute.xlu0 %2429 }
 0x67b   : > { %v2436_v22 = vsel %vm1634_vm2, %v2420_v41, %v2426_v42 }
 0x67c   : > { %v2437_v32 = vsel %vm1951_vm3, %v2436_v22, %v2430_v43 }
 0x67e   : > { %v2434_v16 = vpop.permute.xlu1 %2433 }
 0x67f   : > { %v2439_v13 = vsel %vm2438_vm4, %v2437_v32, %v2434_v16 }
 0x680   : > { %2851 = vmatmul.mubr.msk.f32.vlgmr.msra.gmra.mxu0 %vm581_vm1, %v2439_v13 }
 0x740   : > { %v2520_v45 = vpop.f32.mrf.mxu0 }
 0x741   : > { %v2521_v46 = vadd.f32 %v2717_v44, %v2520_v45 }
 0x742   : > { %v2852_v47 = vpop.f32.mrf.mxu0 }
 0x743   : > { %2524 = vst.msk [vmem:[%s565_s6] sm:$0xff] %vm581_vm1, %v2521_v46 }
 0x744   : > { %3122 = shalt.err (!%p3119_p6)
}
 0x745   : > { %s3123_s24 = scalar_lea.hbm %s3814_s19, 128  ;;  %s3127_s14 = scalar_lea.hbm %s3915_s21, 256 }
 0x746   : > { %p3124_p3 = scmp.ne.s32.totalorder %s3814_s19, %s3123_s24  ;;  %p3128_p2 = scmp.lt.s32.totalorder %s3814_s19, %s3915_s21 }
 0x747   : > { %p3129_p7 = scmp.lt.s32.totalorder %s3127_s14, %s3123_s24 }
 0x748   : > { %p3125_p5 = pnand %p3124_p3, %p3916_p13 }
 0x749   : > { %p3130_p12 = por %p3129_p7, %p3128_p2 }
 0x74a   : > { %p3126_p8 = pneg %p3125_p5 }
 0x74c   : > { %p3131_p9 = pnand %p3130_p12, %p3126_p8 }
 0x74e   : > { %3134 = shalt.err (!%p3131_p9)
}
 0x74f   : > { %2869 = dma.vmem_to_hbm [thread:$0]  (%p3916_p13), %s2540_s12, 128, %s3814_s19, %s2526_s28  }
 0x750 PF: > { %s3917_s26 = sld [smem:[#allocation17_spill]]  ;;  %p3920_p11 = scmp.ge.s32.totalorder %s3185_s16, 2 }
 0x751   : > { %s3918_s22 = sld [smem:[#allocation19_spill]] }
 0x756   : > { %s2551_s6 = sand.u32 1, %s3917_s26  }
 0x757   : > { %p3919_p0 = scmp.ne.s32.totalorder %s3918_s22, 0  ;;  %s2552_s2 = scalar_lea.sflag [#allocation4], %s2551_s6 }
 0x759   : > { %p2889_p10 = pnand %p3920_p11, %p3919_p0 }
 0x75b   : > { %p2890_p1 = pneg %p2889_p10 }
 0x75d   : > { %3168 = dma.done.wait (%p2890_p1), %s2552_s2, 128  }
 0x75e   : > { %3170 = vsyncadd (%p2890_p1), %s2552_s2, 4294967168  ;;  %s3921_s16 = sld [smem:[#allocation20_spill]]  ;;  %s3924_s29 = smov %s3177_s30 }
 0x75f   : > { %s3922_s15 = sld [smem:[#allocation18_spill]] }
 0x760   : > { %s3923_s25 = sld [smem:[#allocation21_spill]] }
 0x764   : > { %p31_p4 = scmp.ge.s32.totalorder %s3921_s16, 4  }
 0x765   : > { %s3925_s30 = smov %s3922_s15 }
 0x766   : > { %s3926_s15 = smov %s3923_s25  ;;  %33 = sbr.rel (!%p31_p4) target bundleno = 15 (0xf), region = 146 }
 0x76b   :  { %2557 = vsyncpa [#allocation3], 1 }
 0x76c   :  { %2559 = vsyncpa [#allocation3 + $0x1], 1 }
 0x76d   :  { %2560 = vsyncpa [#allocation6], 1 }
 0x76e   :  { %2562 = vsyncpa [#allocation6 + $0x1], 1 }
 0x76f   :  { %2563 = vsyncpa [#allocation9], 1 }
 0x770   :  { %2564 = vsyncpa [#allocation4], 1 }
 0x771   :  { %2566 = vsyncpa [#allocation4 + $0x1], 1 }

// kernel: tpu_custom_call.1
= control target key start
LH: loop header
LB: loop body
LE: loop exit
PB: predicated region body
PF: predicated region fallthrough
CT: control target
= control target key end

     0   :  { %s2857_s0 = inlined_call_operand.hbm [shape: f32[32,32], index: 0, kind: input, shape index: {}]   ;;  %s2858_s1 = inlined_call_operand.hbm [shape: f32[16,32], index: 1, kind: input, shape index: {}]   ;;  %s2859_s2 = inlined_call_operand.hbm [shape: f32[32,32], index: 2, kind: input, shape index: {}]   ;;  %s2860_s3 = inlined_call_operand.vmem [shape: f32[1,32], index: 3, kind: input, shape index: {}]   ;;  %s2861_s4 = inlined_call_operand.vmem [shape: f32[1,32], index: 4, kind: input, shape index: {}]   ;;  %s2862_s5 = inlined_call_operand.vmem [shape: f32[1,32], index: 5, kind: input, shape index: {}]   ;;  %s2863_s6 = inlined_call_operand.hbm [shape: f32[32,64], index: 6, kind: input, shape index: {}]   ;;  %s2864_s7 = inlined_call_operand.vmem [shape: f32[1,64], index: 7, kind: input, shape index: {}]   ;;  %s2865_s8 = inlined_call_operand.vmem [shape: f32[1,32], index: 8, kind: input, shape index: {}]   ;;  %s2866_s9 = inlined_call_operand.vmem [shape: f32[1,32], index: 9, kind: input, shape index: {}]   ;;  %s2867_s10 = inlined_call_operand.vmem [shape: f32[1,32], index: 10, kind: input, shape index: {}]   ;;  %s2868_s11 = inlined_call_operand.vmem [shape: f32[1,32], index: 11, kind: input, shape index: {}]   ;;  %s2869_s12 = inlined_call_operand.hbm [shape: f32[32,32], index: 12, kind: input, shape index: {}]   ;;  %s2870_s13 = inlined_call_operand.vmem [shape: f32[1,32], index: 13, kind: input, shape index: {}]   ;;  %s2871_s14 = inlined_call_operand.hbm [shape: f32[16,32], index: 14, kind: output, shape index: {}]  }
   0x1   :  { %2886 = sst [smem:[#allocation23_spill]] %s2857_s0 }
   0x2   :  { %2887 = sst [smem:[#allocation24_spill]] %s2859_s2 }
   0x3   :  { %2888 = sst [smem:[#allocation25_spill]] %s2863_s6 }
   0x4   :  { %2889 = sst [smem:[#allocation26_spill]] %s2869_s12 }
   0x5   :  { %2890 = sst [smem:[#allocation27_spill]] %s2870_s13 }
   0x6   :  { %2891 = sst [smem:[#allocation28_spill]] %s2871_s14 }
   0x7   :  { %19 = vsyncpa [#allocation3], 0 }
   0x8   :  { %21 = vsyncpa [#allocation3 + $0x1], 0 }
   0x9   :  { %22 = vsyncpa [#allocation6], 0 }
   0xa   :  { %24 = vsyncpa [#allocation6 + $0x1], 0 }
   0xb   :  { %25 = vsyncpa [#allocation9], 0 }
   0xc   :  { %26 = vsyncpa [#allocation4], 0 }
   0xd   :  { %28 = vsyncpa [#allocation4 + $0x1], 0  ;;  %s2429_s29 = smov 0   ;;  %s2431_s30 = smov 0  }
   0xe   :  { %s2433_s15 = smov 0   ;;  %s2435_s16 = smov 0  }
   0xf LB: > { %2892 = sst [smem:[#allocation17_spill]] %s2322_s29  ;;  %s2450_s17 = sadd.s32 4294967295, %s2334_s16   ;;  %s2334_s16 = sphi %s2435_s16, %s2926_s16   ;;  %s2330_s15 = sphi %s2433_s15, %s2931_s15   ;;  %s2326_s30 = sphi %s2431_s30, %s2930_s30   ;;  %s2322_s29 = sphi %s2429_s29, %s2929_s29  }
  0x10   : > { %2893 = sst [smem:[#allocation18_spill]] %s2330_s15  ;;  %s1823_s18 = sadd.s32 4294967294, %s2334_s16  }
  0x11   : > { %p54_p0 = scmp.ne.s32.totalorder %s2326_s30, %s2322_s29  ;;  %p2875_p1 = scmp.eq.s32.totalorder %s2450_s17, 0 }
  0x12   : > { %p356_p2 = scmp.eq.s32.totalorder %s2450_s17, 1  ;;  %p362_p3 = scmp.eq.s32.totalorder %s1823_s18, 1 }
  0x13   : > { %p2459_p4 = por %p2875_p1, %p54_p0  ;;  %p1824_p5 = scmp.ge.s32.totalorder %s2334_s16, 1 }
  0x14   : > { %p2464_p6 = por %p362_p3, %p54_p0  ;;  %p369_p7 = scmp.lt.s32.totalorder %s2334_s16, 3 }
  0x15   : > { %s2894_s19 = scalar_select %p2459_p4, 1, 0 }
  0x16   : > { %s2895_s20 = scalar_select %p2464_p6, 1, 0 }
  0x17   : > { %p2469_p8 = pnand %p1824_p5, %p369_p7  ;;  %s2336_s22 = smov [#allocation7]  }
  0x18   : > { %2896 = sst [smem:[#allocation19_spill]] %s2895_s20  ;;  %s381_s23 = sshll.u32 %s2336_s22, 4  ;;  %s382_s23 = int_to_ptr.vmem [resolvable:$true] %s381_s23 }
  0x19   : > { %s2897_s21 = scalar_select %p2469_p8, 1, 0 }
  0x1a   : > { %p2022_p9 = pneg %p2469_p8  ;;  %s2337_s25 = smov [#allocation8]  }
  0x1b   : > { %s403_s26 = sshll.u32 %s2337_s25, 4  ;;  %s2338_s27 = smov [#allocation10]   ;;  %s404_s26 = int_to_ptr.vmem [resolvable:$true] %s403_s26 }
  0x1c   : > { %p2478_p11 = pnand %p2022_p9, %p2875_p1  ;;  %s431_s28 = sshll.u32 %s2338_s27, 4  ;;  %s432_s28 = int_to_ptr.vmem [resolvable:$true] %s431_s28 }
  0x1d   : > { %s2135_s18 = scalar_lea.vmem %s382_s23, 512  ;;  %p2143_p5 = scmp.lt.s32.totalorder %s382_s23, %s382_s23 }
  0x1e   : > { %p2126_p12 = pneg %p2478_p11  ;;  %p2136_p13 = scmp.ne.s32.totalorder %s382_s23, %s2135_s18 }
  0x1f   : > { %p2144_p7 = scmp.lt.s32.totalorder %s2135_s18, %s2135_s18 }
  0x20   : > { %p2138_p0 = pnand %p2136_p13, %p2126_p12 }
  0x21   : > { %p2145_p9 = por %p2144_p7, %p2143_p5 }
  0x22   : > { %p2139_p3 = pneg %p2138_p0 }
  0x24   : > { %p2146_p10 = pnand %p2145_p9, %p2139_p3 }
  0x26   : > { %2149 = shalt.err (!%p2146_p10)
}
  0x27   : > { %s2876_s22 = smov 128   ;;  %s2877_s25 = smov 8  }
  0x28   : > { %s2899_s2 = sld [smem:[#allocation24_spill]]  ;;  %s2161_s29 = scalar_lea.vmem %s404_s26, 512 }
  0x29   : > { %p2162_p13 = scmp.ne.s32.totalorder %s404_s26, %s2161_s29  ;;  %p2169_p3 = scmp.lt.s32.totalorder %s404_s26, %s404_s26 }
  0x2a   : > { %p2170_p10 = scmp.lt.s32.totalorder %s2161_s29, %s2161_s29 }
  0x2b   : > { %p2164_p0 = pnand %p2162_p13, %p2126_p12 }
  0x2c   : > { %p2171_p7 = por %p2170_p10, %p2169_p3 }
  0x2d   : > { %p2165_p5 = pneg %p2164_p0 }
  0x2e   : > { %2025 = dma.hbm_to_vmem [thread:$0]  (!%p2478_p11), %s2899_s2, 512, %s382_s23, [#allocation6], %s2876_s22, %s2876_s22, %s2877_s25  }
  0x2f   : > { %p2172_p9 = pnand %p2171_p7, %p2165_p5 }
  0x31   : > { %2175 = shalt.err (!%p2172_p9)
}
  0x32   : > { %s2900_s6 = sld [smem:[#allocation25_spill]]  ;;  %s2187_s20 = scalar_lea.vmem %s432_s28, 512 }
  0x33   : > { %p2188_p1 = scmp.ne.s32.totalorder %s432_s28, %s2187_s20  ;;  %p2195_p3 = scmp.lt.s32.totalorder %s432_s28, %s432_s28 }
  0x34   : > { %p2196_p5 = scmp.lt.s32.totalorder %s2187_s20, %s2187_s20 }
  0x35   : > { %p2190_p13 = pnand %p2188_p1, %p2126_p12 }
  0x36   : > { %p2197_p10 = por %p2196_p5, %p2195_p3 }
  0x37   : > { %p2191_p0 = pneg %p2190_p13 }
  0x38   : > { %2028 = dma.hbm_to_vmem [thread:$0]  (!%p2478_p11), %s2900_s6, 512, %s404_s26, [#allocation9], %s2876_s22, %s2876_s22, %s2877_s25  }
  0x39   : > { %p2198_p7 = pnand %p2197_p10, %p2191_p0 }
  0x3b   : > { %2201 = shalt.err (!%p2198_p7)
}
  0x3c   : > { %s2901_s12 = sld [smem:[#allocation26_spill]]  ;;  %s2518_s23 = sadd.s32 1, %s2334_s16  }
  0x3d   : > { %2902 = sst [smem:[#allocation20_spill]] %s2518_s23  ;;  %s38_s24 = ssub.s32 %s2334_s16, %s2518_s23 }
  0x3e   : > { %s41_s26 = sadd.s32 1, %s2330_s15  ;;  %p39_p1 = scmp.eq.s32.totalorder %s38_s24, 0 }
  0x3f   : > { %p48_p12 = scmp.ne.s32.totalorder %s2330_s15, %s2326_s30  ;;  %p49_p9 = scmp.eq.s32.totalorder %s2334_s16, 0 }
  0x40   : > { %p2046_p13 = scmp.lt.s32.totalorder %s2334_s16, 2  ;;  %s2537_s20 = sand.u32 1, %s2330_s15  }
  0x41   : > { %s2528_s27 = scalar_select %p39_p1, %s2330_s15, %s41_s26  }
  0x42   : > { %2031 = dma.hbm_to_vmem [thread:$0]  (!%p2478_p11), %s2901_s12, 512, %s432_s28, [#allocation9], %s2876_s22, %s2876_s22, %s2877_s25  }
  0x43   : > { %2903 = sst [smem:[#allocation21_spill]] %s2528_s27  ;;  %p50_p0 = por %p49_p9, %p48_p12 }
  0x44   : > { %p2532_p3 = por %p356_p2, %p48_p12  ;;  %s1874_s28 = sshll.u32 %s2334_s16, 8 }
  0x45   : > { %s1829_s14 = sshll.u32 %s2537_s20, 4  ;;  %s2906_s0 = sld [smem:[#allocation23_spill]] }
  0x46   : > { %s2904_s18 = scalar_select %p2532_p3, 1, 0 }
  0x47   : > { %s452_s26 = scalar_lea.vmem [#allocation2], %s1829_s14  ;;  %p2546_p2 = pnand %p2046_p13, %p50_p0 }
  0x48   : > { %2905 = sst [smem:[#allocation22_spill]] %s2904_s18  ;;  %s459_s25 = sshll.u32 %s452_s26, 4  ;;  %s2550_s25 = int_to_ptr.vmem [resolvable:$true] %s459_s25 }
  0x49   : > { %p2204_p5 = pneg %p2546_p2 }
  0x4b   : > { %s2544_s24 = scalar_lea.hbm %s2906_s0, %s1874_s28  ;;  %s2207_s14 = scalar_lea.hbm %s2906_s0, 512 }
  0x4c   : > { %s2202_s27 = scalar_lea.hbm %s2544_s24, 256  ;;  %p2208_p1 = scmp.lt.s32.totalorder %s2544_s24, %s2906_s0 }
  0x4d   : > { %p2203_p11 = scmp.ne.s32.totalorder %s2544_s24, %s2202_s27  ;;  %p2209_p12 = scmp.lt.s32.totalorder %s2207_s14, %s2202_s27 }
  0x4f   : > { %p2205_p10 = pnand %p2204_p5, %p2203_p11  ;;  %p2210_p9 = por %p2209_p12, %p2208_p1 }
  0x51   : > { %p2206_p7 = pneg %p2205_p10 }
  0x53   : > { %p2211_p13 = pnand %p2210_p9, %p2206_p7 }
  0x55   : > { %2214 = shalt.err (!%p2211_p13)
}
  0x56   : > { %s2215_s6 = scalar_lea.vmem %s2550_s25, 256  ;;  %s2341_s22 = smov [#allocation2]  }
  0x57   : > { %p2216_p0 = scmp.ne.s32.totalorder %s2550_s25, %s2215_s6  ;;  %s2220_s28 = sshll.u32 %s2341_s22, 4  ;;  %s2221_s28 = int_to_ptr.vmem [resolvable:$false] %s2220_s28 }
  0x58   : > { %s2222_s12 = scalar_lea.vmem %s2221_s28, 512  ;;  %p2223_p6 = scmp.lt.s32.totalorder %s2550_s25, %s2221_s28 }
  0x59   : > { %p2218_p11 = pnand %p2216_p0, %p2204_p5  ;;  %p2224_p3 = scmp.lt.s32.totalorder %s2222_s12, %s2215_s6 }
  0x5b   : > { %p2219_p10 = pneg %p2218_p11  ;;  %p2225_p4 = por %p2224_p3, %p2223_p6 }
  0x5d   : > { %p2226_p1 = pnand %p2225_p4, %p2219_p10 }
  0x5f   : > { %2229 = shalt.err (!%p2226_p1)
}
  0x60   : > { %s2908_s27 = smov 8   ;;  %s2909_s14 = smov 128  }
  0x61   : > { %s2910_s29 = scalar_lea.sflag [#allocation3], %s2537_s20  ;;  %s1832_s26 = sshll.u32 %s2537_s20, 3 }
  0x62   : > { %2035 = dma.hbm_to_vmem [thread:$0]  (!%p2546_p2), %s2544_s24, 256, %s2550_s25, %s2910_s29, %s2909_s14, %s2909_s14, %s2908_s27  }
  0x63   : > { %s1833_s22 = sshll.u32 %s2334_s16, 7  ;;  %s473_s0 = scalar_lea.vmem [#allocation5], %s1832_s26 }
  0x64   : > { %s2588_s28 = scalar_lea.hbm %s2858_s1, %s1833_s22  ;;  %s480_s15 = sshll.u32 %s473_s0, 4  ;;  %s481_s15 = int_to_ptr.vmem [resolvable:$true] %s480_s15 }
  0x65   : > { %s2911_s23 = sand.u32 1, %s2334_s16   ;;  %s2230_s18 = scalar_lea.hbm %s2588_s28, 128 }
  0x66   : > { %s470_s13 = scalar_lea.sflag [#allocation6], %s2911_s23  ;;  %p2231_p4 = scmp.ne.s32.totalorder %s2588_s28, %s2230_s18 }
  0x67   : > { %s2235_s24 = scalar_lea.hbm %s2858_s1, 256  ;;  %p2236_p7 = scmp.lt.s32.totalorder %s2588_s28, %s2858_s1 }
  0x68   : > { %p2233_p6 = pnand %p2231_p4, %p2204_p5  ;;  %p2237_p12 = scmp.lt.s32.totalorder %s2235_s24, %s2230_s18 }
  0x6a   : > { %p2234_p3 = pneg %p2233_p6  ;;  %p2238_p9 = por %p2237_p12, %p2236_p7 }
  0x6c   : > { %p2239_p13 = pnand %p2238_p9, %p2234_p3 }
  0x6e   : > { %2242 = shalt.err (!%p2239_p13)
}
  0x6f   : > { %s2243_s0 = scalar_lea.vmem %s481_s15, 128  ;;  %s2342_s23 = smov [#allocation5]  }
  0x70   : > { %p2244_p0 = scmp.ne.s32.totalorder %s481_s15, %s2243_s0  ;;  %s2248_s29 = sshll.u32 %s2342_s23, 4  ;;  %s2249_s29 = int_to_ptr.vmem [resolvable:$false] %s2248_s29 }
  0x71   : > { %s2250_s26 = scalar_lea.vmem %s2249_s29, 256  ;;  %p2251_p1 = scmp.lt.s32.totalorder %s481_s15, %s2249_s29 }
  0x72   : > { %p2246_p11 = pnand %p2244_p0, %p2204_p5  ;;  %p2252_p4 = scmp.lt.s32.totalorder %s2250_s26, %s2243_s0 }
  0x74   : > { %p2247_p10 = pneg %p2246_p11  ;;  %p2253_p6 = por %p2252_p4, %p2251_p1 }
  0x76   : > { %p2254_p8 = pnand %p2253_p6, %p2247_p10 }
  0x78   : > { %2257 = shalt.err (!%p2254_p8)
}
  0x79   : > { %2038 = dma.hbm_to_vmem [thread:$0]  (!%p2546_p2), %s2588_s28, 128, %s481_s15, %s470_s13  }
  0x7a   : > { %p2912_p3 = scmp.ne.s32.totalorder %s2897_s21, 0 }
  0x7b   : > { %s2613_s18 = sand.u32 (!%p2912_p3), 1, %s2326_s30   ;;  %p2913_p5 = scmp.ne.s32.totalorder (!%p2912_p3), %s2894_s19, 0 }
  0x7c   : > { %489 = sbr.rel (%p2912_p3) target bundleno = 1824 (0x720), region = 76  ;;  %s1835_s22 = sshll.u32 (!%p2912_p3), %s2613_s18, 4 }
  0x7d   : > { %s492_s6 = scalar_lea.sflag (!%p2912_p3), [#allocation3], %s2613_s18  ;;  %s2617_s12 = scalar_lea.vmem (!%p2912_p3), [#allocation2], %s1835_s22 }
  0x81   : > { %2301 = dma.done.wait (%p2913_p5), %s492_s6, 256  }
  0x82   : > { %2303 = vsyncadd (%p2913_p5), %s492_s6, 4294967040  ;;  %s500_s2 = sand.u32 1, %s2450_s17   ;;  %s1836_s13 = sshll.u32 %s2613_s18, 3 }
  0x83   : > { %s501_s15 = scalar_lea.sflag [#allocation6], %s500_s2  ;;  %s504_s21 = scalar_lea.vmem [#allocation5], %s1836_s13 }
  0x84   : > { %2305 = dma.done.wait (%p2913_p5), %s501_s15, 128  }
  0x85   : > { %2307 = vsyncadd (%p2913_p5), %s501_s15, 4294967168  ;;  %p2914_p8 = scmp.eq.s32.totalorder %s2450_s17, 0 }
  0x87   : > { %2309 = dma.done.wait (%p2914_p8), [#allocation6], 512   ;;  %p2915_p2 = pmov %p2914_p8 }
  0x89   : > { %2311 = vsyncadd (%p2915_p2), [#allocation6], 4294966784  ;;  %p2916_p7 = pmov %p2915_p2 }
  0x8a   : > { %p2917_p12 = pmov %p2915_p2 }
  0x8b   : > { %2313 = dma.done.wait (%p2916_p7), [#allocation9], 1024  }
  0x8c   : > { %2315 = vsyncadd (%p2917_p12), [#allocation9], 4294966272  ;;  %v2343_v0 = vmov 0.0   ;;  %vm2344_vm0 = vmmov 0   ;;  %v573_v1 = vld [vmem:[#allocation7 + $0x18] sm:$0xff]  ;;  %v572_v3 = vld [vmem:[#allocation7 + $0x10] sm:$0xff] }
  0x8d   : > { %1915 = vmatprep.subr.mxu0 %v2343_v0  ;;  %1923 = vmatprep.mubr.msk.f32.mxu0 %vm2344_vm0, %v2343_v0  ;;  %v688_v2 = vld [vmem:[#allocation8 + $0x18] sm:$0xff]  ;;  %v687_v4 = vld [vmem:[#allocation8 + $0x10] sm:$0xff]  ;;  %v571_v5 = vld [vmem:[#allocation7 + $0x8] sm:$0xff]  ;;  %vm581_vm1 = vcmask 261120   ;;  %s2345_s24 = smov 96   ;;  %vm921_vm2 = vcmask 64512  }
  0x8e   : > { %1916 = vmatpush3.msra.mxu0 %v573_v1  ;;  %1926 = vmatprep.subr.mxu1 %v688_v2  ;;  %v686_v6 = vld [vmem:[#allocation8 + $0x8] sm:$0xff]  ;;  %v570_v7 = vld [vmem:[#allocation7] sm:$0xff]  ;;  %v569_v9 = vld [vmem:[%s504_s21] sm:$0xff]  ;;  %s2347_s2 = smov 104   ;;  %s2348_s15 = smov 112   ;;  %vm1226_vm3 = vcmask 130048  }
  0x8f   : > { %1917 = vmatprep.subr.mxu0 %v2343_v0  ;;  %1927 = vmatpush3.msra.mxu1 %v688_v2  ;;  %v685_v8 = vld [vmem:[#allocation8] sm:$0xff]  ;;  %v568_v11 = vld [vmem:[%s2617_s12 + $0x8] sm:$0xff]  ;;  %v1841_v12 = vld [vmem:[%s2860_s3] ss:$0 sm:$0xff]  ;;  %s2349_s28 = smov 32   ;;  %s2351_s27 = smov 16  }
  0x90   : > { %1918 = vmatpush3.msra.mxu0 %v572_v3  ;;  %1928 = vmatprep.subr.mxu1 %v687_v4  ;;  %v567_v10 = vld [vmem:[%s2617_s12] sm:$0xff]  ;;  %s2346_s12 = smov 120   ;;  %s2352_s14 = smov 24   ;;  %vm1601_vm4 = vcmask 195584  }
  0x91   : > { %1919 = vmatprep.subr.mxu0 %v2343_v0  ;;  %1929 = vmatpush3.msra.mxu1 %v687_v4  ;;  %v1845_v14 = vld [vmem:[%s2864_s7] ss:$0 sm:$0xff]  ;;  %s2918_s0 = sld [smem:[#allocation22_spill]]  ;;  %s1871_s22 = sshll.u32 %s2450_s17, 7 }
  0x92   : > { %1920 = vmatpush3.msra.mxu0 %v571_v5  ;;  %1930 = vmatprep.subr.mxu1 %v686_v6  ;;  %v1848_v53 = vld [vmem:[%s2865_s8] ss:$0 sm:$0xff]  ;;  %s2919_s26 = sld [smem:[#allocation27_spill]]  ;;  %s565_s6 = scalar_lea.vmem [#allocation11], %s1836_s13 }
  0x93   : > { %1921 = vmatprep.subr.mxu0 %v2343_v0  ;;  %1931 = vmatpush3.msra.mxu1 %v686_v6  ;;  %v1849_v55 = vld [vmem:[%s2866_s9] ss:$0 sm:$0xff]  ;;  %s2920_s21 = sld [smem:[#allocation28_spill]]  ;;  %s2353_s17 = smov [#allocation11]  }
  0x94   : > { %1922 = vmatpush3.msra.mxu0 %v570_v7  ;;  %1932 = vmatprep.subr.mxu1 %v685_v8  ;;  %v1843_v58 = vld [vmem:[%s2861_s4] ss:$0 sm:$0xff]  ;;  %s2262_s13 = sshll.u32 %s2353_s17, 4  ;;  %s2263_s13 = int_to_ptr.vmem [resolvable:$false] %s2262_s13 }
  0x95   : > { %1924 = vmatmul.mubr.msk.f32.vlgmr.msra.gmra.mxu0 %vm581_vm1, %v569_v9  ;;  %1933 = vmatpush3.msra.mxu1 %v685_v8  ;;  %v1844_v63 = vld [vmem:[%s2862_s5] ss:$0 sm:$0xff]  ;;  %s2264_s20 = scalar_lea.vmem %s2263_s13, 256 }
  0x96   : > { %1934 = vmatprep.mubr.msk.f32.mxu1 %vm581_vm1, %v567_v10  ;;  %1937 = vmatprep.subr.mxu0 %v2343_v0 }
  0x97   : > { %1935 = vmatmul.mubr.msk.f32.vlgmr.msra.gmra.mxu1 %vm581_vm1, %v568_v11  ;;  %1941 = vmatprep.mubr.msk.f32.mxu0 %vm2344_vm0, %v2343_v0  ;;  %p2921_p13 = scmp.ne.s32.totalorder %s2918_s0, 0 }
  0x98   : > { %1944 = vmatprep.subr.mxu1 %v2343_v0  ;;  %1948 = vmatprep.mubr.msk.f32.mxu1 %vm2344_vm0, %v2343_v0 }
  0x99   : > { %s2819_s19 = scalar_lea.hbm %s2920_s21, %s1871_s22 }
 0x155   : > { %v651_v13 = vpop.f32.mrf.mxu0 }
 0x156   : > { %v652_v15 = vadd.f32 %v1841_v12, %v651_v13 }
 0x157   : > { %v1936_v16 = vpop.f32.mrf.mxu1  ;;  %v1925_v17 = vpop.f32.mrf.mxu0 }
 0x158   : > { %v2662_v18 = vadd.f32 %v1936_v16, %v1845_v14  ;;  %v657_v19 = vsel %vm581_vm1, %v652_v15, 0.0 }
 0x159   : > { %v768_v20 = vpop.f32.mrf.mxu1  ;;  %658 = vadd.xlane.f32.xlu1 %v657_v19 }
 0x15a   : > { %v2665_v21 = vadd.f32 %v1845_v14, %v768_v20  ;;  %v782_v22 = vsel %vm581_vm1, %v2662_v18, 0.0 }
 0x15b   : > { %783 = vadd.xlane.f32.xlu0 %v782_v22 }
 0x15c   : > { %v779_v23 = vsel %vm581_vm1, %v2665_v21, 0.0 }
 0x15f   : > { %780 = vadd.xlane.f32.xlu0 %v779_v23 }
 0x1e2   : > { %v659_v24 = vpop.xlane.xlu1 %658 }
 0x1e3   : > { %v661_v25 = vmul.f32 0.03125, %v659_v24 }
 0x1e4   : > { %v784_v26 = vpop.xlane.xlu0 %783 }
 0x1e5   : > { %v786_v27 = vmul.f32 0.03125, %v784_v26  ;;  %v662_v28 = vsub.f32 %v652_v15, %v661_v25 }
 0x1e7   : > { %v788_v29 = vsub.f32 %v2662_v18, %v786_v27  ;;  %v663_v35 = vmul.f32 %v662_v28, %v662_v28 }
 0x1e8   : > { %v781_v30 = vpop.xlane.xlu0 %780 }
 0x1e9   : > { %v785_v31 = vmul.f32 0.03125, %v781_v30  ;;  %v790_v32 = vmul.f32 %v788_v29, %v788_v29  ;;  %v664_v37 = vsel %vm581_vm1, %v663_v35, 0.0  ;;  %v1850_v30 = vld [vmem:[%s2867_s10] ss:$0 sm:$0xff] }
 0x1eb   : > { %v787_v33 = vsub.f32 %v2665_v21, %v785_v31  ;;  %v794_v34 = vsel %vm581_vm1, %v790_v32, 0.0 }
 0x1ec   : > { %795 = vadd.xlane.f32.xlu1 %v794_v34 }
 0x1ed   : > { %v789_v36 = vmul.f32 %v787_v33, %v787_v33 }
 0x1ef   : > { %v791_v38 = vsel %vm581_vm1, %v789_v36, 0.0 }
 0x1f0   : > { %665 = vadd.xlane.f32.xlu1 %v664_v37  ;;  %792 = vadd.xlane.f32.xlu0 %v791_v38 }
 0x201   : > { %825 = vrot.lane.b32.xlu1 %v2665_v21, %s2345_s24 }
 0x206   : > { %827 = vrot.lane.b32.xlu0 %v2662_v18, %s2345_s24 }
 0x275   : > { %v796_v39 = vpop.xlane.xlu1 %795 }
 0x276   : > { %v798_v40 = vmul.f32 0.03125, %v796_v39 }
 0x278   : > { %v800_v41 = vadd.f32 1e-05, %v798_v40 }
 0x279   : > { %v666_v42 = vpop.xlane.xlu1 %665  ;;  %v793_v43 = vpop.xlane.xlu0 %792 }
 0x27a   : > { %2098 = vrsqrt.f32 %v800_v41  ;;  %v667_v44 = vmul.f32 0.03125, %v666_v42  ;;  %v797_v45 = vmul.f32 0.03125, %v793_v43 }
 0x27c   : > { %v668_v46 = vadd.f32 1e-05, %v667_v44  ;;  %v799_v47 = vadd.f32 1e-05, %v797_v45 }
 0x27d   : > { %v826_v48 = vpop.permute.xlu1 %825  ;;  %v828_v49 = vpop.permute.xlu0 %827 }
 0x27e   : > { %2100 = vrsqrt.f32 %v668_v46  ;;  %v831_v50 = vsel %vm581_vm1, %v826_v48, 0.0  ;;  %v834_v51 = vsel %vm581_vm1, %v828_v49, 0.0 }
 0x27f   : > { %2102 = vrsqrt.f32 %v799_v47  ;;  %832 = vadd.xlane.f32.xlu0 %v831_v50  ;;  %835 = vadd.xlane.f32.xlu1 %v834_v51 }
 0x287   : > { %v2099_v52 = vpop.eup %2098 }
 0x288   : > { %v804_v54 = vmul.f32 %v2099_v52, %v788_v29  ;;  %v1851_v29 = vld [vmem:[%s2868_s11] ss:$0 sm:$0xff] }
 0x28a   : > { %v812_v56 = vmul.f32 %v1848_v53, %v804_v54 }
 0x28b   : > { %v2101_v57 = vpop.eup %2100 }
 0x28c   : > { %v2103_v59 = vpop.eup %2102  ;;  %v820_v60 = vadd.f32 %v1849_v55, %v812_v56  ;;  %v670_v61 = vmul.f32 %v2101_v57, %v662_v28 }
 0x28d   : > { %v803_v62 = vmul.f32 %v2103_v59, %v787_v33 }
 0x28e   : > { %1938 = vmatpush3.xpose.msk.msra.mxu0 %vm921_vm2, %v820_v60  ;;  %v677_v1 = vmul.f32 %v1843_v58, %v670_v61 }
 0x28f   : > { %1939 = vmatprep.subr.mxu0 %v2343_v0  ;;  %v811_v2 = vmul.f32 %v1848_v53, %v803_v62 }
 0x290   : > { %897 = vrot.lane.b32.xlu1 %v820_v60, %s2346_s12  ;;  %v684_v3 = vadd.f32 %v1844_v63, %v677_v1 }
 0x291   : > { %v819_v4 = vadd.f32 %v1849_v55, %v811_v2 }
 0x292   : > { %v885_v5 = vmul.f32 0.35355338, %v684_v3 }
 0x293   : > { %1940 = vmatpush3.xpose.msk.msra.mxu0 %vm921_vm2, %v819_v4 }
 0x294   : > { %887 = vrot.lane.b32.xlu1 %v885_v5, %s2346_s12  ;;  %1951 = vmatprep.subr.mxu0 %v2343_v0 }
 0x295   : > { %895 = vrot.lane.b32.xlu0 %v819_v4, %s2346_s12 }
 0x296   : > { %1942 = vmatmul.mubr.msk.f32.vlgmr.msra.gmra.mxu0 %vm921_vm2, %v885_v5 }
 0x297   : > { %1955 = vmatprep.mubr.msk.f32.mxu0 %vm2344_vm0, %v2343_v0 }
 0x298   : > { %905 = vrot.lane.b32.xlu1 %v820_v60, %s2347_s2 }
 0x299   : > { %901 = vrot.lane.b32.xlu0 %v820_v60, %s2348_s15 }
 0x29c   : > { %899 = vrot.lane.b32.xlu1 %v819_v4, %s2348_s15 }
 0x29d   : > { %903 = vrot.lane.b32.xlu0 %v819_v4, %s2347_s2 }
 0x2a0   : > { %889 = vrot.lane.b32.xlu1 %v885_v5, %s2348_s15 }
 0x2a1   : > { %891 = vrot.lane.b32.xlu0 %v885_v5, %s2347_s2 }
 0x308   : > { %v836_v6 = vpop.xlane.xlu1 %835  ;;  %v833_v7 = vpop.xlane.xlu0 %832 }
 0x309   : > { %v838_v8 = vmul.f32 0.03125, %v836_v6  ;;  %v837_v9 = vmul.f32 0.03125, %v833_v7 }
 0x30b   : > { %v2711_v10 = vsub.f32 %v2662_v18, %v838_v8  ;;  %v2714_v11 = vsub.f32 %v2665_v21, %v837_v9 }
 0x30c   : > { %v898_v12 = vpop.permute.xlu1 %897  ;;  %v896_v13 = vpop.permute.xlu0 %895 }
 0x30d   : > { %1945 = vmatpush3.xpose.msk.msra.mxu1 %vm921_vm2, %v898_v12  ;;  %v842_v14 = vmul.f32 %v2711_v10, %v2711_v10  ;;  %v841_v15 = vmul.f32 %v2714_v11, %v2714_v11 }
 0x30e   : > { %1946 = vmatprep.subr.mxu1 %v2343_v0 }
 0x30f   : > { %847 = vrot.lane.b32.xlu1 %v842_v14, %s2345_s24  ;;  %845 = vrot.lane.b32.xlu0 %v841_v15, %s2345_s24 }
 0x310   : > { %v888_v16 = vpop.permute.xlu1 %887  ;;  %v902_v17 = vpop.permute.xlu0 %901 }
 0x311   : > { %1947 = vmatpush3.xpose.msk.msra.mxu1 %vm921_vm2, %v896_v13  ;;  %1952 = vmatpush3.xpose.msk.msra.mxu0 %vm921_vm2, %v902_v17 }
 0x312   : > { %1958 = vmatprep.subr.mxu1 %v2343_v0  ;;  %1953 = vmatprep.subr.mxu0 %v2343_v0 }
 0x314   : > { %v906_v18 = vpop.permute.xlu1 %905  ;;  %1949 = vmatmul.mubr.msk.f32.vlgmr.msra.gmra.mxu1 %vm921_vm2, %v888_v16  ;;  %v904_v19 = vpop.permute.xlu0 %903 }
 0x315   : > { %1959 = vmatpush3.xpose.msk.msra.mxu1 %vm921_vm2, %v906_v18  ;;  %1962 = vmatprep.mubr.msk.f32.mxu1 %vm2344_vm0, %v2343_v0 }
 0x316   : > { %1960 = vmatprep.subr.mxu1 %v2343_v0 }
 0x318   : > { %v900_v20 = vpop.permute.xlu1 %899  ;;  %v892_v21 = vpop.permute.xlu0 %891 }
 0x319   : > { %1954 = vmatpush3.xpose.msk.msra.mxu0 %vm921_vm2, %v900_v20  ;;  %1961 = vmatpush3.xpose.msk.msra.mxu1 %vm921_vm2, %v904_v19 }
 0x31a   : > { %1965 = vmatprep.subr.mxu1 %v2343_v0  ;;  %1979 = vmatprep.subr.mxu0 %v2343_v0 }
 0x31c   : > { %v890_v22 = vpop.permute.xlu1 %889  ;;  %1963 = vmatmul.mubr.msk.f32.vlgmr.msra.gmra.mxu1 %vm921_vm2, %v892_v21 }
 0x31d   : > { %1956 = vmatmul.mubr.msk.f32.vlgmr.msra.gmra.mxu0 %vm921_vm2, %v890_v22  ;;  %1969 = vmatprep.mubr.msk.f32.mxu1 %vm2344_vm0, %v2343_v0 }
 0x31e   : > { %1983 = vmatprep.mubr.msk.f32.mxu0 %vm2344_vm0, %v2343_v0 }
 0x356   : > { %v2743_v23 = vpop.f32.mrf.mxu0 }
 0x357   : > { %v1227_v54 = vsel %vm1226_vm3, %v2743_v23, -inf }
 0x358   : > { %v1943_v24 = vpop.f32.mrf.mxu0 }
 0x381   : > { %v848_v25 = vpop.permute.xlu1 %847  ;;  %v846_v26 = vpop.permute.xlu0 %845 }
 0x382   : > { %v854_v27 = vsel %vm581_vm1, %v848_v25, 0.0  ;;  %v851_v28 = vsel %vm581_vm1, %v846_v26, 0.0 }
 0x383   : > { %855 = vadd.xlane.f32.xlu1 %v854_v27  ;;  %852 = vadd.xlane.f32.xlu0 %v851_v28 }
 0x394   : > { %880 = vrot.lane.b32.xlu1 %v1851_v29, %s2349_s28 }
 0x399   : > { %870 = vrot.lane.b32.xlu0 %v1850_v30, %s2349_s28  ;;  %s1689_s28 = scalar_lea.sflag [#allocation4], %s2613_s18 }
 0x3d4   : > { %v1070_v31 = vpop.f32.mrf.mxu1 }
 0x3d5   : > { %v1230_v53 = vsel %vm1226_vm3, %v1070_v31, -inf }
 0x3d6   : > { %v1950_v32 = vpop.f32.mrf.mxu1 }
 0x3dc   : > { %v2753_v33 = vpop.f32.mrf.mxu1 }
 0x3dd   : > { %v2755_v34 = vpop.f32.mrf.mxu0  ;;  %v1236_v56 = vsel %vm1226_vm3, %v2753_v33, -inf }
 0x3de   : > { %v1964_v35 = vpop.f32.mrf.mxu1  ;;  %v1233_v55 = vsel %vm1226_vm3, %v2755_v34, -inf }
 0x3df   : > { %v1957_v36 = vpop.f32.mrf.mxu0  ;;  %v1604_v35 = vld [vmem:[#allocation10 + $0x8] sm:$0xff] }
 0x3e0   : > { %v1603_v36 = vld [vmem:[#allocation10] sm:$0xff] }
 0x40c   : > { %v856_v37 = vpop.xlane.xlu1 %855  ;;  %v853_v38 = vpop.xlane.xlu0 %852 }
 0x40d   : > { %v858_v39 = vmul.f32 0.03125, %v856_v37  ;;  %v857_v40 = vmul.f32 0.03125, %v853_v38 }
 0x40f   : > { %v860_v41 = vadd.f32 1e-05, %v858_v39  ;;  %v859_v42 = vadd.f32 1e-05, %v857_v40 }
 0x410   : > { %v871_v44 = vpop.permute.xlu0 %870  ;;  %v881_v48 = vpop.permute.xlu1 %880 }
 0x411   : > { %2104 = vrsqrt.f32 %v860_v41 }
 0x412   : > { %2106 = vrsqrt.f32 %v859_v42 }
 0x41e   : > { %v2105_v43 = vpop.eup %2104 }
 0x41f   : > { %v2107_v45 = vpop.eup %2106  ;;  %v864_v46 = vmul.f32 %v2105_v43, %v2711_v10 }
 0x420   : > { %v863_v47 = vmul.f32 %v2107_v45, %v2714_v11 }
 0x421   : > { %v874_v49 = vmul.f32 %v871_v44, %v864_v46 }
 0x422   : > { %v873_v50 = vmul.f32 %v871_v44, %v863_v47 }
 0x423   : > { %v884_v51 = vadd.f32 %v881_v48, %v874_v49 }
 0x424   : > { %v883_v52 = vadd.f32 %v881_v48, %v873_v50 }
 0x425   : > { %919 = vrot.lane.b32.xlu0 %v884_v51, %s2347_s2  ;;  %911 = vrot.lane.b32.xlu1 %v884_v51, %s2346_s12 }
 0x429   : > { %915 = vrot.lane.b32.xlu1 %v884_v51, %s2348_s15  ;;  %909 = vrot.lane.b32.xlu0 %v883_v52, %s2346_s12  ;;  %s1702_s12 = sshll.u32 %s565_s6, 4  ;;  %s1703_s12 = int_to_ptr.vmem [resolvable:$true] %s1702_s12 }
 0x42a   : > { %s2258_s25 = scalar_lea.vmem %s1703_s12, 128  ;;  %p2265_p10 = scmp.lt.s32.totalorder %s1703_s12, %s2263_s13 }
 0x42b   : > { %p2259_p9 = scmp.ne.s32.totalorder %s1703_s12, %s2258_s25  ;;  %p2266_p1 = scmp.lt.s32.totalorder %s2264_s20, %s2258_s25 }
 0x42d   : > { %913 = vrot.lane.b32.xlu1 %v883_v52, %s2348_s15  ;;  %917 = vrot.lane.b32.xlu0 %v883_v52, %s2347_s2  ;;  %p2260_p0 = pnand %p2259_p9, %p2921_p13  ;;  %p2267_p4 = por %p2266_p1, %p2265_p10 }
 0x42f   : > { %p2261_p11 = pneg %p2260_p0 }
 0x431   : > { %1263 = vrot.lane.b32.xlu0 %v883_v52, %s2345_s24  ;;  %p2268_p6 = pnand %p2267_p4, %p2261_p11 }
 0x450   : > { %1231 = vmax.xlane.f32.xlu0 %v1230_v53 }
 0x451   : > { %1228 = vmax.xlane.f32.xlu1 %v1227_v54 }
 0x454   : > { %1234 = vmax.xlane.f32.xlu0 %v1233_v55 }
 0x458   : > { %1237 = vmax.xlane.f32.xlu0 %v1236_v56 }
 0x462   : > { %1265 = vrot.lane.b32.xlu1 %v884_v51, %s2345_s24 }
 0x497   : > { %v920_v57 = vpop.permute.xlu0 %919  ;;  %v912_v58 = vpop.permute.xlu1 %911 }
 0x498   : > { %1344 = vrot.lane.b32.xlu1 %v912_v58, %s2345_s24  ;;  %1502 = vrot.lane.b32.xlu0 %v920_v57, %s2345_s24  ;;  %v1868_v57 = vld [vmem:[%s2919_s26] ss:$0 sm:$0xff] }
 0x49b   : > { %v916_v59 = vpop.permute.xlu1 %915  ;;  %v910_v60 = vpop.permute.xlu0 %909 }
 0x49c   : > { %1423 = vrot.lane.b32.xlu1 %v916_v59, %s2345_s24 }
 0x49f   : > { %v918_v61 = vpop.permute.xlu0 %917  ;;  %v914_v62 = vpop.permute.xlu1 %913 }
 0x4a0   : > { %1342 = vrot.lane.b32.xlu1 %v910_v60, %s2345_s24  ;;  %1500 = vrot.lane.b32.xlu0 %v918_v61, %s2345_s24 }
 0x4a3   : > { %v1264_v63 = vpop.permute.xlu0 %1263 }
 0x4a4   : > { %1421 = vrot.lane.b32.xlu1 %v914_v62, %s2345_s24  ;;  %s2350_s24 = smov 8  }
 0x4d9   : > { %v1232_v1 = vpop.xlane.xlu0 %1231 }
 0x4da   : > { %v1240_v2 = vsub.f32 %v1070_v31, %v1232_v1  ;;  %v1229_v3 = vpop.xlane.xlu1 %1228 }
 0x4db   : > { %v1239_v4 = vsub.f32 %v2743_v23, %v1229_v3 }
 0x4dc   : > { %v1245_v5 = vmul.f32 1.442695, %v1240_v2 }
 0x4dd   : > { %v1243_v6 = vmul.f32 1.442695, %v1239_v4  ;;  %v1235_v7 = vpop.xlane.xlu0 %1234 }
 0x4de   : > { %2108 = vpow2.f32 %v1245_v5  ;;  %v1241_v8 = vsub.f32 %v2755_v34, %v1235_v7  ;;  %v1266_v9 = vpop.permute.xlu1 %1265  ;;  %v1605_v34 = vld [vmem:[#allocation10 + $0x10] sm:$0xff] }
 0x4df   : > { %2110 = vpow2.f32 %v1243_v6  ;;  %1966 = vmatpush3.msra.mxu1 %v1266_v9 }
 0x4e0   : > { %v1247_v10 = vmul.f32 1.442695, %v1241_v8  ;;  %1967 = vmatprep.subr.mxu1 %v2343_v0 }
 0x4e1   : > { %1968 = vmatpush3.msra.mxu1 %v1264_v63  ;;  %v1238_v11 = vpop.xlane.xlu0 %1237 }
 0x4e2   : > { %2112 = vpow2.f32 %v1247_v10  ;;  %v1242_v12 = vsub.f32 %v2753_v33, %v1238_v11  ;;  %1972 = vmatprep.subr.mxu1 %v2343_v0  ;;  %v1606_v33 = vld [vmem:[#allocation10 + $0x18] sm:$0xff] }
 0x4e4   : > { %v1249_v13 = vmul.f32 1.442695, %v1242_v12 }
 0x4e6   : > { %2114 = vpow2.f32 %v1249_v13 }
 0x4eb   : > { %v2109_v14 = vpop.eup %2108 }
 0x4ec   : > { %v2111_v15 = vpop.eup %2110  ;;  %v1254_v16 = vsel %vm1226_vm3, %v2109_v14, 0.0 }
 0x4ed   : > { %1970 = vmatmul.mubr.msk.f32.vlgmr.msra.gmra.mxu1 %vm1226_vm3, %v2111_v15  ;;  %1255 = vadd.xlane.f32.xlu1 %v1254_v16  ;;  %v1251_v21 = vsel %vm1226_vm3, %v2111_v15, 0.0 }
 0x4ee   : > { %1976 = vmatprep.mubr.msk.f32.mxu1 %vm2344_vm0, %v2343_v0 }
 0x4ef   : > { %v2113_v17 = vpop.eup %2112 }
 0x4f0   : > { %v1257_v18 = vsel %vm1226_vm3, %v2113_v17, 0.0 }
 0x4f1   : > { %1258 = vadd.xlane.f32.xlu0 %v1257_v18 }
 0x4f3   : > { %v2115_v19 = vpop.eup %2114 }
 0x4f4   : > { %v1260_v20 = vsel %vm1226_vm3, %v2115_v19, 0.0 }
 0x4f5   : > { %1261 = vadd.xlane.f32.xlu0 %v1260_v20 }
 0x4f9   : > { %1252 = vadd.xlane.f32.xlu0 %v1251_v21 }
 0x50a   : > { %v1345_v22 = vpop.permute.xlu1 %1344  ;;  %v1503_v24 = vpop.permute.xlu0 %1502 }
 0x50b   : > { %1973 = vmatpush3.msra.mxu1 %v1345_v22 }
 0x50c   : > { %1974 = vmatprep.subr.mxu1 %v2343_v0 }
 0x50e   : > { %v1424_v23 = vpop.permute.xlu1 %1423 }
 0x50f   : > { %1980 = vmatpush3.msra.mxu0 %v1424_v23 }
 0x510   : > { %1981 = vmatprep.subr.mxu0 %v2343_v0 }
 0x512   : > { %v1343_v25 = vpop.permute.xlu1 %1342  ;;  %v1501_v26 = vpop.permute.xlu0 %1500 }
 0x513   : > { %1975 = vmatpush3.msra.mxu1 %v1343_v25 }
 0x514   : > { %1977 = vmatmul.mubr.msk.f32.vlgmr.msra.gmra.mxu1 %vm1226_vm3, %v2109_v14  ;;  %1986 = vmatprep.subr.mxu1 %v2343_v0 }
 0x515   : > { %1987 = vmatpush3.msra.mxu1 %v1503_v24  ;;  %1990 = vmatprep.mubr.msk.f32.mxu1 %vm2344_vm0, %v2343_v0 }
 0x516   : > { %v1422_v27 = vpop.permute.xlu1 %1421  ;;  %1988 = vmatprep.subr.mxu1 %v2343_v0 }
 0x517   : > { %1982 = vmatpush3.msra.mxu0 %v1422_v27  ;;  %1989 = vmatpush3.msra.mxu1 %v1501_v26 }
 0x518   : > { %1984 = vmatmul.mubr.msk.f32.vlgmr.msra.gmra.mxu0 %vm1226_vm3, %v2113_v17  ;;  %1991 = vmatmul.mubr.msk.f32.vlgmr.msra.gmra.mxu1 %vm1226_vm3, %v2115_v19 }
 0x519   : > { %1993 = vmatprep.subr.mxu0 %v2343_v0  ;;  %2001 = vmatprep.mubr.msk.f32.mxu0 %vm2344_vm0, %v2343_v0 }
 0x51a   : > { %1994 = vmatpush3.msra.mxu0 %v1606_v33 }
 0x51b   : > { %1995 = vmatprep.subr.mxu0 %v2343_v0 }
 0x51c   : > { %1996 = vmatpush3.msra.mxu0 %v1605_v34 }
 0x51d   : > { %1997 = vmatprep.subr.mxu0 %v2343_v0 }
 0x51e   : > { %1998 = vmatpush3.msra.mxu0 %v1604_v35 }
 0x51f   : > { %1999 = vmatprep.subr.mxu0 %v2343_v0 }
 0x520   : > { %2000 = vmatpush3.msra.mxu0 %v1603_v36 }
 0x576   : > { %v1256_v31 = vpop.xlane.xlu1 %1255 }
 0x577   : > { %2116 = vrcp.f32 %v1256_v31 }
 0x57a   : > { %v1259_v30 = vpop.xlane.xlu0 %1258 }
 0x57b   : > { %2118 = vrcp.f32 %v1259_v30 }
 0x57e   : > { %v1262_v32 = vpop.xlane.xlu0 %1261 }
 0x57f   : > { %2120 = vrcp.f32 %v1262_v32 }
 0x582   : > { %v1253_v0 = vpop.xlane.xlu0 %1252 }
 0x583   : > { %2122 = vrcp.f32 %v1253_v0 }
 0x584   : > { %v2117_v37 = vpop.eup %2116 }
 0x588   : > { %v2119_v41 = vpop.eup %2118 }
 0x58c   : > { %v2121_v42 = vpop.eup %2120 }
 0x590   : > { %v2123_v50 = vpop.eup %2122 }
 0x5ad   : > { %v1338_v28 = vpop.f32.mrf.mxu1 }
 0x5ae   : > { %v1583_v51 = vmul.f32 %v2123_v50, %v1338_v28 }
 0x5af   : > { %v1971_v29 = vpop.f32.mrf.mxu1 }
 0x5d4   : > { %v1417_v38 = vpop.f32.mrf.mxu1 }
 0x5d5   : > { %v1584_v39 = vmul.f32 %v2117_v37, %v1417_v38 }
 0x5d6   : > { %v1978_v40 = vpop.f32.mrf.mxu1 }
 0x5d7   : > { %1588 = vrot.lane.b32.xlu1 %v1584_v39, %s2350_s24 }
 0x5d8   : > { %v1496_v43 = vpop.f32.mrf.mxu0  ;;  %v1575_v44 = vpop.f32.mrf.mxu1 }
 0x5d9   : > { %v1585_v45 = vmul.f32 %v2119_v41, %v1496_v43  ;;  %v1586_v46 = vmul.f32 %v2121_v42, %v1575_v44 }
 0x5da   : > { %v1985_v47 = vpop.f32.mrf.mxu0  ;;  %v1992_v48 = vpop.f32.mrf.mxu1 }
 0x5db   : > { %1592 = vrot.lane.b32.xlu0 %v1585_v45, %s2351_s27  ;;  %1596 = vrot.lane.b32.xlu1 %v1586_v46, %s2352_s14 }
 0x649   : > { %v1589_v49 = vpop.permute.xlu1 %1588 }
 0x64a   : > { %v1599_v52 = vsel %vm921_vm2, %v1583_v51, %v1589_v49 }
 0x64d   : > { %v1597_v53 = vpop.permute.xlu1 %1596  ;;  %v1593_v54 = vpop.permute.xlu0 %1592 }
 0x64e   : > { %v1600_v55 = vsel %vm1226_vm3, %v1599_v52, %v1593_v54 }
 0x64f   : > { %v1602_v56 = vsel %vm1601_vm4, %v1600_v55, %v1597_v53 }
 0x650   : > { %2002 = vmatmul.mubr.msk.f32.vlgmr.msra.gmra.mxu0 %vm581_vm1, %v1602_v56 }
 0x710   : > { %v1683_v58 = vpop.f32.mrf.mxu0 }
 0x711   : > { %v1684_v59 = vadd.f32 %v1868_v57, %v1683_v58 }
 0x712   : > { %v2003_v60 = vpop.f32.mrf.mxu0 }
 0x713   : > { %1687 = vst.msk [vmem:[%s565_s6] sm:$0xff] %vm581_vm1, %v1684_v59 }
 0x714   : > { %2271 = shalt.err (!%p2268_p6)
}
 0x715   : > { %s2272_s24 = scalar_lea.hbm %s2819_s19, 128  ;;  %s2276_s14 = scalar_lea.hbm %s2920_s21, 256 }
 0x716   : > { %p2273_p3 = scmp.ne.s32.totalorder %s2819_s19, %s2272_s24  ;;  %p2277_p2 = scmp.lt.s32.totalorder %s2819_s19, %s2920_s21 }
 0x717   : > { %p2278_p7 = scmp.lt.s32.totalorder %s2276_s14, %s2272_s24 }
 0x718   : > { %p2274_p5 = pnand %p2273_p3, %p2921_p13 }
 0x719   : > { %p2279_p12 = por %p2278_p7, %p2277_p2 }
 0x71a   : > { %p2275_p8 = pneg %p2274_p5 }
 0x71c   : > { %p2280_p9 = pnand %p2279_p12, %p2275_p8 }
 0x71e   : > { %2283 = shalt.err (!%p2280_p9)
}
 0x71f   : > { %2020 = dma.vmem_to_hbm [thread:$0]  (%p2921_p13), %s1703_s12, 128, %s2819_s19, %s1689_s28  }
 0x720 PF: > { %s2922_s26 = sld [smem:[#allocation17_spill]]  ;;  %p2925_p11 = scmp.ge.s32.totalorder %s2334_s16, 2 }
 0x721   : > { %s2923_s22 = sld [smem:[#allocation19_spill]] }
 0x726   : > { %s1714_s6 = sand.u32 1, %s2922_s26  }
 0x727   : > { %p2924_p0 = scmp.ne.s32.totalorder %s2923_s22, 0  ;;  %s1715_s2 = scalar_lea.sflag [#allocation4], %s1714_s6 }
 0x729   : > { %p2040_p10 = pnand %p2925_p11, %p2924_p0 }
 0x72b   : > { %p2041_p1 = pneg %p2040_p10 }
 0x72d   : > { %2317 = dma.done.wait (%p2041_p1), %s1715_s2, 128  }
 0x72e   : > { %2319 = vsyncadd (%p2041_p1), %s1715_s2, 4294967168  ;;  %s2926_s16 = sld [smem:[#allocation20_spill]]  ;;  %s2929_s29 = smov %s2326_s30 }
 0x72f   : > { %s2927_s15 = sld [smem:[#allocation18_spill]] }
 0x730   : > { %s2928_s25 = sld [smem:[#allocation21_spill]] }
 0x734   : > { %p31_p4 = scmp.ge.s32.totalorder %s2926_s16, 4  }
 0x735   : > { %s2930_s30 = smov %s2927_s15 }
 0x736   : > { %s2931_s15 = smov %s2928_s25  ;;  %33 = sbr.rel (!%p31_p4) target bundleno = 15 (0xf), region = 146 }
 0x73b   :  { %1720 = vsyncpa [#allocation3], 1 }
 0x73c   :  { %1722 = vsyncpa [#allocation3 + $0x1], 1 }
 0x73d   :  { %1723 = vsyncpa [#allocation6], 1 }
 0x73e   :  { %1725 = vsyncpa [#allocation6 + $0x1], 1 }
 0x73f   :  { %1726 = vsyncpa [#allocation9], 1 }
 0x740   :  { %1727 = vsyncpa [#allocation4], 1 }
 0x741   :  { %1729 = vsyncpa [#allocation4 + $0x1], 1 }

// kernel: tpu_custom_call.1
= control target key start
LH: loop header
LB: loop body
LE: loop exit
PB: predicated region body
PF: predicated region fallthrough
CT: control target
= control target key end

     0   :  { %s2857_s0 = inlined_call_operand.hbm [shape: f32[32,32], index: 0, kind: input, shape index: {}]   ;;  %s2858_s1 = inlined_call_operand.hbm [shape: f32[16,32], index: 1, kind: input, shape index: {}]   ;;  %s2859_s2 = inlined_call_operand.hbm [shape: f32[32,32], index: 2, kind: input, shape index: {}]   ;;  %s2860_s3 = inlined_call_operand.vmem [shape: f32[1,32], index: 3, kind: input, shape index: {}]   ;;  %s2861_s4 = inlined_call_operand.vmem [shape: f32[1,32], index: 4, kind: input, shape index: {}]   ;;  %s2862_s5 = inlined_call_operand.vmem [shape: f32[1,32], index: 5, kind: input, shape index: {}]   ;;  %s2863_s6 = inlined_call_operand.hbm [shape: f32[32,64], index: 6, kind: input, shape index: {}]   ;;  %s2864_s7 = inlined_call_operand.vmem [shape: f32[1,64], index: 7, kind: input, shape index: {}]   ;;  %s2865_s8 = inlined_call_operand.vmem [shape: f32[1,32], index: 8, kind: input, shape index: {}]   ;;  %s2866_s9 = inlined_call_operand.vmem [shape: f32[1,32], index: 9, kind: input, shape index: {}]   ;;  %s2867_s10 = inlined_call_operand.vmem [shape: f32[1,32], index: 10, kind: input, shape index: {}]   ;;  %s2868_s11 = inlined_call_operand.vmem [shape: f32[1,32], index: 11, kind: input, shape index: {}]   ;;  %s2869_s12 = inlined_call_operand.hbm [shape: f32[32,32], index: 12, kind: input, shape index: {}]   ;;  %s2870_s13 = inlined_call_operand.vmem [shape: f32[1,32], index: 13, kind: input, shape index: {}]   ;;  %s2871_s14 = inlined_call_operand.hbm [shape: f32[16,32], index: 14, kind: output, shape index: {}]  }
   0x1   :  { %2886 = sst [smem:[#allocation23_spill]] %s2857_s0 }
   0x2   :  { %2887 = sst [smem:[#allocation24_spill]] %s2859_s2 }
   0x3   :  { %2888 = sst [smem:[#allocation25_spill]] %s2863_s6 }
   0x4   :  { %2889 = sst [smem:[#allocation26_spill]] %s2869_s12 }
   0x5   :  { %2890 = sst [smem:[#allocation27_spill]] %s2870_s13 }
   0x6   :  { %2891 = sst [smem:[#allocation28_spill]] %s2871_s14 }
   0x7   :  { %19 = vsyncpa [#allocation3], 0 }
   0x8   :  { %21 = vsyncpa [#allocation3 + $0x1], 0 }
   0x9   :  { %22 = vsyncpa [#allocation6], 0 }
   0xa   :  { %24 = vsyncpa [#allocation6 + $0x1], 0 }
   0xb   :  { %25 = vsyncpa [#allocation9], 0 }
   0xc   :  { %26 = vsyncpa [#allocation4], 0 }
   0xd   :  { %28 = vsyncpa [#allocation4 + $0x1], 0  ;;  %s2429_s29 = smov 0   ;;  %s2431_s30 = smov 0  }
   0xe   :  { %s2433_s15 = smov 0   ;;  %s2435_s16 = smov 0  }
   0xf LB: > { %2892 = sst [smem:[#allocation17_spill]] %s2322_s29  ;;  %s2450_s17 = sadd.s32 4294967295, %s2334_s16   ;;  %s2334_s16 = sphi %s2435_s16, %s2926_s16   ;;  %s2330_s15 = sphi %s2433_s15, %s2931_s15   ;;  %s2326_s30 = sphi %s2431_s30, %s2930_s30   ;;  %s2322_s29 = sphi %s2429_s29, %s2929_s29  }
  0x10   : > { %2893 = sst [smem:[#allocation18_spill]] %s2330_s15  ;;  %s1823_s18 = sadd.s32 4294967294, %s2334_s16  }
  0x11   : > { %p54_p0 = scmp.ne.s32.totalorder %s2326_s30, %s2322_s29  ;;  %p2875_p1 = scmp.eq.s32.totalorder %s2450_s17, 0 }
  0x12   : > { %p356_p2 = scmp.eq.s32.totalorder %s2450_s17, 1  ;;  %p362_p3 = scmp.eq.s32.totalorder %s1823_s18, 1 }
  0x13   : > { %p2459_p4 = por %p2875_p1, %p54_p0  ;;  %p1824_p5 = scmp.ge.s32.totalorder %s2334_s16, 1 }
  0x14   : > { %p2464_p6 = por %p362_p3, %p54_p0  ;;  %p369_p7 = scmp.lt.s32.totalorder %s2334_s16, 3 }
  0x15   : > { %s2894_s19 = scalar_select %p2459_p4, 1, 0 }
  0x16   : > { %s2895_s20 = scalar_select %p2464_p6, 1, 0 }
  0x17   : > { %p2469_p8 = pnand %p1824_p5, %p369_p7  ;;  %s2336_s22 = smov [#allocation7]  }
  0x18   : > { %2896 = sst [smem:[#allocation19_spill]] %s2895_s20  ;;  %s381_s23 = sshll.u32 %s2336_s22, 4  ;;  %s382_s23 = int_to_ptr.vmem [resolvable:$true] %s381_s23 }
  0x19   : > { %s2897_s21 = scalar_select %p2469_p8, 1, 0 }
  0x1a   : > { %p2022_p9 = pneg %p2469_p8  ;;  %s2337_s25 = smov [#allocation8]  }
  0x1b   : > { %s403_s26 = sshll.u32 %s2337_s25, 4  ;;  %s2338_s27 = smov [#allocation10]   ;;  %s404_s26 = int_to_ptr.vmem [resolvable:$true] %s403_s26 }
  0x1c   : > { %p2478_p11 = pnand %p2022_p9, %p2875_p1  ;;  %s431_s28 = sshll.u32 %s2338_s27, 4  ;;  %s432_s28 = int_to_ptr.vmem [resolvable:$true] %s431_s28 }
  0x1d   : > { %s2135_s18 = scalar_lea.vmem %s382_s23, 512  ;;  %p2143_p5 = scmp.lt.s32.totalorder %s382_s23, %s382_s23 }
  0x1e   : > { %p2126_p12 = pneg %p2478_p11  ;;  %p2136_p13 = scmp.ne.s32.totalorder %s382_s23, %s2135_s18 }
  0x1f   : > { %p2144_p7 = scmp.lt.s32.totalorder %s2135_s18, %s2135_s18 }
  0x20   : > { %p2138_p0 = pnand %p2136_p13, %p2126_p12 }
  0x21   : > { %p2145_p9 = por %p2144_p7, %p2143_p5 }
  0x22   : > { %p2139_p3 = pneg %p2138_p0 }
  0x24   : > { %p2146_p10 = pnand %p2145_p9, %p2139_p3 }
  0x26   : > { %2149 = shalt.err (!%p2146_p10)
}
  0x27   : > { %s2876_s22 = smov 128   ;;  %s2877_s25 = smov 8  }
  0x28   : > { %s2899_s2 = sld [smem:[#allocation24_spill]]  ;;  %s2161_s29 = scalar_lea.vmem %s404_s26, 512 }
  0x29   : > { %p2162_p13 = scmp.ne.s32.totalorder %s404_s26, %s2161_s29  ;;  %p2169_p3 = scmp.lt.s32.totalorder %s404_s26, %s404_s26 }
  0x2a   : > { %p2170_p10 = scmp.lt.s32.totalorder %s2161_s29, %s2161_s29 }
  0x2b   : > { %p2164_p0 = pnand %p2162_p13, %p2126_p12 }
  0x2c   : > { %p2171_p7 = por %p2170_p10, %p2169_p3 }
  0x2d   : > { %p2165_p5 = pneg %p2164_p0 }
  0x2e   : > { %2025 = dma.hbm_to_vmem [thread:$0]  (!%p2478_p11), %s2899_s2, 512, %s382_s23, [#allocation6], %s2876_s22, %s2876_s22, %s2877_s25  }
  0x2f   : > { %p2172_p9 = pnand %p2171_p7, %p2165_p5 }
  0x31   : > { %2175 = shalt.err (!%p2172_p9)
}
  0x32   : > { %s2900_s6 = sld [smem:[#allocation25_spill]]  ;;  %s2187_s20 = scalar_lea.vmem %s432_s28, 512 }
  0x33   : > { %p2188_p1 = scmp.ne.s32.totalorder %s432_s28, %s2187_s20  ;;  %p2195_p3 = scmp.lt.s32.totalorder %s432_s28, %s432_s28 }
  0x34   : > { %p2196_p5 = scmp.lt.s32.totalorder %s2187_s20, %s2187_s20 }
  0x35   : > { %p2190_p13 = pnand %p2188_p1, %p2126_p12 }
  0x36   : > { %p2197_p10 = por %p2196_p5, %p2195_p3 }
  0x37   : > { %p2191_p0 = pneg %p2190_p13 }
  0x38   : > { %2028 = dma.hbm_to_vmem [thread:$0]  (!%p2478_p11), %s2900_s6, 512, %s404_s26, [#allocation9], %s2876_s22, %s2876_s22, %s2877_s25  }
  0x39   : > { %p2198_p7 = pnand %p2197_p10, %p2191_p0 }
  0x3b   : > { %2201 = shalt.err (!%p2198_p7)
}
  0x3c   : > { %s2901_s12 = sld [smem:[#allocation26_spill]]  ;;  %s2518_s23 = sadd.s32 1, %s2334_s16  }
  0x3d   : > { %2902 = sst [smem:[#allocation20_spill]] %s2518_s23  ;;  %s38_s24 = ssub.s32 %s2334_s16, %s2518_s23 }
  0x3e   : > { %s41_s26 = sadd.s32 1, %s2330_s15  ;;  %p39_p1 = scmp.eq.s32.totalorder %s38_s24, 0 }
  0x3f   : > { %p48_p12 = scmp.ne.s32.totalorder %s2330_s15, %s2326_s30  ;;  %p49_p9 = scmp.eq.s32.totalorder %s2334_s16, 0 }
  0x40   : > { %p2046_p13 = scmp.lt.s32.totalorder %s2334_s16, 2  ;;  %s2537_s20 = sand.u32 1, %s2330_s15  }
  0x41   : > { %s2528_s27 = scalar_select %p39_p1, %s2330_s15, %s41_s26  }
  0x42   : > { %2031 = dma.hbm_to_vmem [thread:$0]  (!%p2478_p11), %s2901_s12, 512, %s432_s28, [#allocation9], %s2876_s22, %s2876_s22, %s2877_s25  }
  0x43   : > { %2903 = sst [smem:[#allocation21_spill]] %s2528_s27  ;;  %p50_p0 = por %p49_p9, %p48_p12 }
  0x44   : > { %p2532_p3 = por %p356_p2, %p48_p12  ;;  %s1874_s28 = sshll.u32 %s2334_s16, 8 }
  0x45   : > { %s1829_s14 = sshll.u32 %s2537_s20, 4  ;;  %s2906_s0 = sld [smem:[#allocation23_spill]] }
  0x46   : > { %s2904_s18 = scalar_select %p2532_p3, 1, 0 }
  0x47   : > { %s452_s26 = scalar_lea.vmem [#allocation2], %s1829_s14  ;;  %p2546_p2 = pnand %p2046_p13, %p50_p0 }
  0x48   : > { %2905 = sst [smem:[#allocation22_spill]] %s2904_s18  ;;  %s459_s25 = sshll.u32 %s452_s26, 4  ;;  %s2550_s25 = int_to_ptr.vmem [resolvable:$true] %s459_s25 }
  0x49   : > { %p2204_p5 = pneg %p2546_p2 }
  0x4b   : > { %s2544_s24 = scalar_lea.hbm %s2906_s0, %s1874_s28  ;;  %s2207_s14 = scalar_lea.hbm %s2906_s0, 512 }
  0x4c   : > { %s2202_s27 = scalar_lea.hbm %s2544_s24, 256  ;;  %p2208_p1 = scmp.lt.s32.totalorder %s2544_s24, %s2906_s0 }
  0x4d   : > { %p2203_p11 = scmp.ne.s32.totalorder %s2544_s24, %s2202_s27  ;;  %p2209_p12 = scmp.lt.s32.totalorder %s2207_s14, %s2202_s27 }
  0x4f   : > { %p2205_p10 = pnand %p2204_p5, %p2203_p11  ;;  %p2210_p9 = por %p2209_p12, %p2208_p1 }
  0x51   : > { %p2206_p7 = pneg %p2205_p10 }
  0x53   : > { %p2211_p13 = pnand %p2210_p9, %p2206_p7 }
  0x55   : > { %2214 = shalt.err (!%p2211_p13)
}
  0x56   : > { %s2215_s6 = scalar_lea.vmem %s2550_s25, 256  ;;  %s2341_s22 = smov [#allocation2]  }
  0x57   : > { %p2216_p0 = scmp.ne.s32.totalorder %s2550_s25, %s2215_s6  ;;  %s2220_s28 = sshll.u32 %s2341_s22, 4  ;;  %s2221_s28 = int_to_ptr.vmem [resolvable:$false] %s2220_s28 }
  0x58   : > { %s2222_s12 = scalar_lea.vmem %s2221_s28, 512  ;;  %p2223_p6 = scmp.lt.s32.totalorder %s2550_s25, %s2221_s28 }
  0x59   : > { %p2218_p11 = pnand %p2216_p0, %p2204_p5  ;;  %p2224_p3 = scmp.lt.s32.totalorder %s2222_s12, %s2215_s6 }
  0x5b   : > { %p2219_p10 = pneg %p2218_p11  ;;  %p2225_p4 = por %p2224_p3, %p2223_p6 }
  0x5d   : > { %p2226_p1 = pnand %p2225_p4, %p2219_p10 }
  0x5f   : > { %2229 = shalt.err (!%p2226_p1)
}
  0x60   : > { %s2908_s27 = smov 8   ;;  %s2909_s14 = smov 128  }
  0x61   : > { %s2910_s29 = scalar_lea.sflag [#allocation3], %s2537_s20  ;;  %s1832_s26 = sshll.u32 %s2537_s20, 3 }
  0x62   : > { %2035 = dma.hbm_to_vmem [thread:$0]  (!%p2546_p2), %s2544_s24, 256, %s2550_s25, %s2910_s29, %s2909_s14, %s2909_s14, %s2908_s27  }
  0x63   : > { %s1833_s22 = sshll.u32 %s2334_s16, 7  ;;  %s473_s0 = scalar_lea.vmem [#allocation5], %s1832_s26 }
  0x64   : > { %s2588_s28 = scalar_lea.hbm %s2858_s1, %s1833_s22  ;;  %s480_s15 = sshll.u32 %s473_s0, 4  ;;  %s481_s15 = int_to_ptr.vmem [resolvable:$true] %s480_s15 }
  0x65   : > { %s2911_s23 = sand.u32 1, %s2334_s16   ;;  %s2230_s18 = scalar_lea.hbm %s2588_s28, 128 }
  0x66   : > { %s470_s13 = scalar_lea.sflag [#allocation6], %s2911_s23  ;;  %p2231_p4 = scmp.ne.s32.totalorder %s2588_s28, %s2230_s18 }
  0x67   : > { %s2235_s24 = scalar_lea.hbm %s2858_s1, 256  ;;  %p2236_p7 = scmp.lt.s32.totalorder %s2588_s28, %s2858_s1 }
  0x68   : > { %p2233_p6 = pnand %p2231_p4, %p2204_p5  ;;  %p2237_p12 = scmp.lt.s32.totalorder %s2235_s24, %s2230_s18 }
  0x6a   : > { %p2234_p3 = pneg %p2233_p6  ;;  %p2238_p9 = por %p2237_p12, %p2236_p7 }
  0x6c   : > { %p2239_p13 = pnand %p2238_p9, %p2234_p3 }
  0x6e   : > { %2242 = shalt.err (!%p2239_p13)
}
  0x6f   : > { %s2243_s0 = scalar_lea.vmem %s481_s15, 128  ;;  %s2342_s23 = smov [#allocation5]  }
  0x70   : > { %p2244_p0 = scmp.ne.s32.totalorder %s481_s15, %s2243_s0  ;;  %s2248_s29 = sshll.u32 %s2342_s23, 4  ;;  %s2249_s29 = int_to_ptr.vmem [resolvable:$false] %s2248_s29 }
  0x71   : > { %s2250_s26 = scalar_lea.vmem %s2249_s29, 256  ;;  %p2251_p1 = scmp.lt.s32.totalorder %s481_s15, %s2249_s29 }
  0x72   : > { %p2246_p11 = pnand %p2244_p0, %p2204_p5  ;;  %p2252_p4 = scmp.lt.s32.totalorder %s2250_s26, %s2243_s0 }
  0x74   : > { %p2247_p10 = pneg %p2246_p11  ;;  %p2253_p6 = por %p2252_p4, %p2251_p1 }
  0x76   : > { %p2254_p8 = pnand %p2253_p6, %p2247_p10 }
  0x78   : > { %2257 = shalt.err (!%p2254_p8)
}
  0x79   : > { %2038 = dma.hbm_to_vmem [thread:$0]  (!%p2546_p2), %s2588_s28, 128, %s481_s15, %s470_s13  }
  0x7a   : > { %p2912_p3 = scmp.ne.s32.totalorder %s2897_s21, 0 }
  0x7b   : > { %s2613_s18 = sand.u32 (!%p2912_p3), 1, %s2326_s30   ;;  %p2913_p5 = scmp.ne.s32.totalorder (!%p2912_p3), %s2894_s19, 0 }
  0x7c   : > { %489 = sbr.rel (%p2912_p3) target bundleno = 1824 (0x720), region = 76  ;;  %s1835_s22 = sshll.u32 (!%p2912_p3), %s2613_s18, 4 }
  0x7d   : > { %s492_s6 = scalar_lea.sflag (!%p2912_p3), [#allocation3], %s2613_s18  ;;  %s2617_s12 = scalar_lea.vmem (!%p2912_p3), [#allocation2], %s1835_s22 }
  0x81   : > { %2301 = dma.done.wait (%p2913_p5), %s492_s6, 256  }
  0x82   : > { %2303 = vsyncadd (%p2913_p5), %s492_s6, 4294967040  ;;  %s500_s2 = sand.u32 1, %s2450_s17   ;;  %s1836_s13 = sshll.u32 %s2613_s18, 3 }
  0x83   : > { %s501_s15 = scalar_lea.sflag [#allocation6], %s500_s2  ;;  %s504_s21 = scalar_lea.vmem [#allocation5], %s1836_s13 }
  0x84   : > { %2305 = dma.done.wait (%p2913_p5), %s501_s15, 128  }
  0x85   : > { %2307 = vsyncadd (%p2913_p5), %s501_s15, 4294967168  ;;  %p2914_p8 = scmp.eq.s32.totalorder %s2450_s17, 0 }
  0x87   : > { %2309 = dma.done.wait (%p2914_p8), [#allocation6], 512   ;;  %p2915_p2 = pmov %p2914_p8 }
  0x89   : > { %2311 = vsyncadd (%p2915_p2), [#allocation6], 4294966784  ;;  %p2916_p7 = pmov %p2915_p2 }
  0x8a   : > { %p2917_p12 = pmov %p2915_p2 }
  0x8b   : > { %2313 = dma.done.wait (%p2916_p7), [#allocation9], 1024  }
  0x8c   : > { %2315 = vsyncadd (%p2917_p12), [#allocation9], 4294966272  ;;  %v2343_v0 = vmov 0.0   ;;  %vm2344_vm0 = vmmov 0   ;;  %v573_v1 = vld [vmem:[#allocation7 + $0x18] sm:$0xff]  ;;  %v572_v3 = vld [vmem:[#allocation7 + $0x10] sm:$0xff] }
  0x8d   : > { %1915 = vmatprep.subr.mxu0 %v2343_v0  ;;  %1923 = vmatprep.mubr.msk.f32.mxu0 %vm2344_vm0, %v2343_v0  ;;  %v688_v2 = vld [vmem:[#allocation8 + $0x18] sm:$0xff]  ;;  %v687_v4 = vld [vmem:[#allocation8 + $0x10] sm:$0xff]  ;;  %v571_v5 = vld [vmem:[#allocation7 + $0x8] sm:$0xff]  ;;  %vm581_vm1 = vcmask 261120   ;;  %s2345_s24 = smov 96   ;;  %vm921_vm2 = vcmask 64512  }
  0x8e   : > { %1916 = vmatpush3.msra.mxu0 %v573_v1  ;;  %1926 = vmatprep.subr.mxu1 %v688_v2  ;;  %v686_v6 = vld [vmem:[#allocation8 + $0x8] sm:$0xff]  ;;  %v570_v7 = vld [vmem:[#allocation7] sm:$0xff]  ;;  %v569_v9 = vld [vmem:[%s504_s21] sm:$0xff]  ;;  %s2347_s2 = smov 104   ;;  %s2348_s15 = smov 112   ;;  %vm1226_vm3 = vcmask 130048  }
  0x8f   : > { %1917 = vmatprep.subr.mxu0 %v2343_v0  ;;  %1927 = vmatpush3.msra.mxu1 %v688_v2  ;;  %v685_v8 = vld [vmem:[#allocation8] sm:$0xff]  ;;  %v568_v11 = vld [vmem:[%s2617_s12 + $0x8] sm:$0xff]  ;;  %v1841_v12 = vld [vmem:[%s2860_s3] ss:$0 sm:$0xff]  ;;  %s2349_s28 = smov 32   ;;  %s2351_s27 = smov 16  }
  0x90   : > { %1918 = vmatpush3.msra.mxu0 %v572_v3  ;;  %1928 = vmatprep.subr.mxu1 %v687_v4  ;;  %v567_v10 = vld [vmem:[%s2617_s12] sm:$0xff]  ;;  %s2346_s12 = smov 120   ;;  %s2352_s14 = smov 24   ;;  %vm1601_vm4 = vcmask 195584  }
  0x91   : > { %1919 = vmatprep.subr.mxu0 %v2343_v0  ;;  %1929 = vmatpush3.msra.mxu1 %v687_v4  ;;  %v1845_v14 = vld [vmem:[%s2864_s7] ss:$0 sm:$0xff]  ;;  %s2918_s0 = sld [smem:[#allocation22_spill]]  ;;  %s1871_s22 = sshll.u32 %s2450_s17, 7 }
  0x92   : > { %1920 = vmatpush3.msra.mxu0 %v571_v5  ;;  %1930 = vmatprep.subr.mxu1 %v686_v6  ;;  %v1848_v53 = vld [vmem:[%s2865_s8] ss:$0 sm:$0xff]  ;;  %s2919_s26 = sld [smem:[#allocation27_spill]]  ;;  %s565_s6 = scalar_lea.vmem [#allocation11], %s1836_s13 }
  0x93   : > { %1921 = vmatprep.subr.mxu0 %v2343_v0  ;;  %1931 = vmatpush3.msra.mxu1 %v686_v6  ;;  %v1849_v55 = vld [vmem:[%s2866_s9] ss:$0 sm:$0xff]  ;;  %s2920_s21 = sld [smem:[#allocation28_spill]]  ;;  %s2353_s17 = smov [#allocation11]  }
  0x94   : > { %1922 = vmatpush3.msra.mxu0 %v570_v7  ;;  %1932 = vmatprep.subr.mxu1 %v685_v8  ;;  %v1843_v58 = vld [vmem:[%s2861_s4] ss:$0 sm:$0xff]  ;;  %s2262_s13 = sshll.u32 %s2353_s17, 4  ;;  %s2263_s13 = int_to_ptr.vmem [resolvable:$false] %s2262_s13 }
  0x95   : > { %1924 = vmatmul.mubr.msk.f32.vlgmr.msra.gmra.mxu0 %vm581_vm1, %v569_v9  ;;  %1933 = vmatpush3.msra.mxu1 %v685_v8  ;;  %v1844_v63 = vld [vmem:[%s2862_s5] ss:$0 sm:$0xff]  ;;  %s2264_s20 = scalar_lea.vmem %s2263_s13, 256 }
  0x96   : > { %1934 = vmatprep.mubr.msk.f32.mxu1 %vm581_vm1, %v567_v10  ;;  %1937 = vmatprep.subr.mxu0 %v2343_v0 }
  0x97   : > { %1935 = vmatmul.mubr.msk.f32.vlgmr.msra.gmra.mxu1 %vm581_vm1, %v568_v11  ;;  %1941 = vmatprep.mubr.msk.f32.mxu0 %vm2344_vm0, %v2343_v0  ;;  %p2921_p13 = scmp.ne.s32.totalorder %s2918_s0, 0 }
  0x98   : > { %1944 = vmatprep.subr.mxu1 %v2343_v0  ;;  %1948 = vmatprep.mubr.msk.f32.mxu1 %vm2344_vm0, %v2343_v0 }
  0x99   : > { %s2819_s19 = scalar_lea.hbm %s2920_s21, %s1871_s22 }
 0x155   : > { %v651_v13 = vpop.f32.mrf.mxu0 }
 0x156   : > { %v652_v15 = vadd.f32 %v1841_v12, %v651_v13 }
 0x157   : > { %v1936_v16 = vpop.f32.mrf.mxu1  ;;  %v1925_v17 = vpop.f32.mrf.mxu0 }
 0x158   : > { %v2662_v18 = vadd.f32 %v1936_v16, %v1845_v14  ;;  %v657_v19 = vsel %vm581_vm1, %v652_v15, 0.0 }
 0x159   : > { %v768_v20 = vpop.f32.mrf.mxu1  ;;  %658 = vadd.xlane.f32.xlu1 %v657_v19 }
 0x15a   : > { %v2665_v21 = vadd.f32 %v1845_v14, %v768_v20  ;;  %v782_v22 = vsel %vm581_vm1, %v2662_v18, 0.0 }
 0x15b   : > { %783 = vadd.xlane.f32.xlu0 %v782_v22 }
 0x15c   : > { %v779_v23 = vsel %vm581_vm1, %v2665_v21, 0.0 }
 0x15f   : > { %780 = vadd.xlane.f32.xlu0 %v779_v23 }
 0x1e2   : > { %v659_v24 = vpop.xlane.xlu1 %658 }
 0x1e3   : > { %v661_v25 = vmul.f32 0.03125, %v659_v24 }
 0x1e4   : > { %v784_v26 = vpop.xlane.xlu0 %783 }
 0x1e5   : > { %v786_v27 = vmul.f32 0.03125, %v784_v26  ;;  %v662_v28 = vsub.f32 %v652_v15, %v661_v25 }
 0x1e7   : > { %v788_v29 = vsub.f32 %v2662_v18, %v786_v27  ;;  %v663_v35 = vmul.f32 %v662_v28, %v662_v28 }
 0x1e8   : > { %v781_v30 = vpop.xlane.xlu0 %780 }
 0x1e9   : > { %v785_v31 = vmul.f32 0.03125, %v781_v30  ;;  %v790_v32 = vmul.f32 %v788_v29, %v788_v29  ;;  %v664_v37 = vsel %vm581_vm1, %v663_v35, 0.0  ;;  %v1850_v30 = vld [vmem:[%s2867_s10] ss:$0 sm:$0xff] }
 0x1eb   : > { %v787_v33 = vsub.f32 %v2665_v21, %v785_v31  ;;  %v794_v34 = vsel %vm581_vm1, %v790_v32, 0.0 }
 0x1ec   : > { %795 = vadd.xlane.f32.xlu1 %v794_v34 }
 0x1ed   : > { %v789_v36 = vmul.f32 %v787_v33, %v787_v33 }
 0x1ef   : > { %v791_v38 = vsel %vm581_vm1, %v789_v36, 0.0 }
 0x1f0   : > { %665 = vadd.xlane.f32.xlu1 %v664_v37  ;;  %792 = vadd.xlane.f32.xlu0 %v791_v38 }
 0x201   : > { %825 = vrot.lane.b32.xlu1 %v2665_v21, %s2345_s24 }
 0x206   : > { %827 = vrot.lane.b32.xlu0 %v2662_v18, %s2345_s24 }
 0x275   : > { %v796_v39 = vpop.xlane.xlu1 %795 }
 0x276   : > { %v798_v40 = vmul.f32 0.03125, %v796_v39 }
 0x278   : > { %v800_v41 = vadd.f32 1e-05, %v798_v40 }
 0x279   : > { %v666_v42 = vpop.xlane.xlu1 %665  ;;  %v793_v43 = vpop.xlane.xlu0 %792 }
 0x27a   : > { %2098 = vrsqrt.f32 %v800_v41  ;;  %v667_v44 = vmul.f32 0.03125, %v666_v42  ;;  %v797_v45 = vmul.f32 0.03125, %v793_v43 }
 0x27c   : > { %v668_v46 = vadd.f32 1e-05, %v667_v44  ;;  %v799_v47 = vadd.f32 1e-05, %v797_v45 }
 0x27d   : > { %v826_v48 = vpop.permute.xlu1 %825  ;;  %v828_v49 = vpop.permute.xlu0 %827 }
 0x27e   : > { %2100 = vrsqrt.f32 %v668_v46  ;;  %v831_v50 = vsel %vm581_vm1, %v826_v48, 0.0  ;;  %v834_v51 = vsel %vm581_vm1, %v828_v49, 0.0 }
 0x27f   : > { %2102 = vrsqrt.f32 %v799_v47  ;;  %832 = vadd.xlane.f32.xlu0 %v831_v50  ;;  %835 = vadd.xlane.f32.xlu1 %v834_v51 }
 0x287   : > { %v2099_v52 = vpop.eup %2098 }
 0x288   : > { %v804_v54 = vmul.f32 %v2099_v52, %v788_v29  ;;  %v1851_v29 = vld [vmem:[%s2868_s11] ss:$0 sm:$0xff] }
 0x28a   : > { %v812_v56 = vmul.f32 %v1848_v53, %v804_v54 }
 0x28b   : > { %v2101_v57 = vpop.eup %2100 }
 0x28c   : > { %v2103_v59 = vpop.eup %2102  ;;  %v820_v60 = vadd.f32 %v1849_v55, %v812_v56  ;;  %v670_v61 = vmul.f32 %v2101_v57, %v662_v28 }
 0x28d   : > { %v803_v62 = vmul.f32 %v2103_v59, %v787_v33 }
 0x28e   : > { %1938 = vmatpush3.xpose.msk.msra.mxu0 %vm921_vm2, %v820_v60  ;;  %v677_v1 = vmul.f32 %v1843_v58, %v670_v61 }
 0x28f   : > { %1939 = vmatprep.subr.mxu0 %v2343_v0  ;;  %v811_v2 = vmul.f32 %v1848_v53, %v803_v62 }
 0x290   : > { %897 = vrot.lane.b32.xlu1 %v820_v60, %s2346_s12  ;;  %v684_v3 = vadd.f32 %v1844_v63, %v677_v1 }
 0x291   : > { %v819_v4 = vadd.f32 %v1849_v55, %v811_v2 }
 0x292   : > { %v885_v5 = vmul.f32 0.35355338, %v684_v3 }
 0x293   : > { %1940 = vmatpush3.xpose.msk.msra.mxu0 %vm921_vm2, %v819_v4 }
 0x294   : > { %887 = vrot.lane.b32.xlu1 %v885_v5, %s2346_s12  ;;  %1951 = vmatprep.subr.mxu0 %v2343_v0 }
 0x295   : > { %895 = vrot.lane.b32.xlu0 %v819_v4, %s2346_s12 }
 0x296   : > { %1942 = vmatmul.mubr.msk.f32.vlgmr.msra.gmra.mxu0 %vm921_vm2, %v885_v5 }
 0x297   : > { %1955 = vmatprep.mubr.msk.f32.mxu0 %vm2344_vm0, %v2343_v0 }
 0x298   : > { %905 = vrot.lane.b32.xlu1 %v820_v60, %s2347_s2 }
 0x299   : > { %901 = vrot.lane.b32.xlu0 %v820_v60, %s2348_s15 }
 0x29c   : > { %899 = vrot.lane.b32.xlu1 %v819_v4, %s2348_s15 }
 0x29d   : > { %903 = vrot.lane.b32.xlu0 %v819_v4, %s2347_s2 }
 0x2a0   : > { %889 = vrot.lane.b32.xlu1 %v885_v5, %s2348_s15 }
 0x2a1   : > { %891 = vrot.lane.b32.xlu0 %v885_v5, %s2347_s2 }
 0x308   : > { %v836_v6 = vpop.xlane.xlu1 %835  ;;  %v833_v7 = vpop.xlane.xlu0 %832 }
 0x309   : > { %v838_v8 = vmul.f32 0.03125, %v836_v6  ;;  %v837_v9 = vmul.f32 0.03125, %v833_v7 }
 0x30b   : > { %v2711_v10 = vsub.f32 %v2662_v18, %v838_v8  ;;  %v2714_v11 = vsub.f32 %v2665_v21, %v837_v9 }
 0x30c   : > { %v898_v12 = vpop.permute.xlu1 %897  ;;  %v896_v13 = vpop.permute.xlu0 %895 }
 0x30d   : > { %1945 = vmatpush3.xpose.msk.msra.mxu1 %vm921_vm2, %v898_v12  ;;  %v842_v14 = vmul.f32 %v2711_v10, %v2711_v10  ;;  %v841_v15 = vmul.f32 %v2714_v11, %v2714_v11 }
 0x30e   : > { %1946 = vmatprep.subr.mxu1 %v2343_v0 }
 0x30f   : > { %847 = vrot.lane.b32.xlu1 %v842_v14, %s2345_s24  ;;  %845 = vrot.lane.b32.xlu0 %v841_v15, %s2345_s24 }
 0x310   : > { %v888_v16 = vpop.permute.xlu1 %887  ;;  %v902_v17 = vpop.permute.xlu0 %901 }
 0x311   : > { %1947 = vmatpush3.xpose.msk.msra.mxu1 %vm921_vm2, %v896_v13  ;;  %1952 = vmatpush3.xpose.msk.msra.mxu0 %vm921_vm2, %v902_v17 }
 0x312   : > { %1958 = vmatprep.subr.mxu1 %v2343_v0  ;;  %1953 = vmatprep.subr.mxu0 %v2343_v0 }
 0x314   : > { %v906_v18 = vpop.permute.xlu1 %905  ;;  %1949 = vmatmul.mubr.msk.f32.vlgmr.msra.gmra.mxu1 %vm921_vm2, %v888_v16  ;;  %v904_v19 = vpop.permute.xlu0 %903 }
 0x315   : > { %1959 = vmatpush3.xpose.msk.msra.mxu1 %vm921_vm2, %v906_v18  ;;  %1962 = vmatprep.mubr.msk.f32.mxu1 %vm2344_vm0, %v2343_v0 }
 0x316   : > { %1960 = vmatprep.subr.mxu1 %v2343_v0 }
 0x318   : > { %v900_v20 = vpop.permute.xlu1 %899  ;;  %v892_v21 = vpop.permute.xlu0 %891 }
 0x319   : > { %1954 = vmatpush3.xpose.msk.msra.mxu0 %vm921_vm2, %v900_v20  ;;  %1961 = vmatpush3.xpose.msk.msra.mxu1 %vm921_vm2, %v904_v19 }
 0x31a   : > { %1965 = vmatprep.subr.mxu1 %v2343_v0  ;;  %1979 = vmatprep.subr.mxu0 %v2343_v0 }
 0x31c   : > { %v890_v22 = vpop.permute.xlu1 %889  ;;  %1963 = vmatmul.mubr.msk.f32.vlgmr.msra.gmra.mxu1 %vm921_vm2, %v892_v21 }
 0x31d   : > { %1956 = vmatmul.mubr.msk.f32.vlgmr.msra.gmra.mxu0 %vm921_vm2, %v890_v22  ;;  %1969 = vmatprep.mubr.msk.f32.mxu1 %vm2344_vm0, %v2343_v0 }
 0x31e   : > { %1983 = vmatprep.mubr.msk.f32.mxu0 %vm2344_vm0, %v2343_v0 }
 0x356   : > { %v2743_v23 = vpop.f32.mrf.mxu0 }
 0x357   : > { %v1227_v54 = vsel %vm1226_vm3, %v2743_v23, -inf }
 0x358   : > { %v1943_v24 = vpop.f32.mrf.mxu0 }
 0x381   : > { %v848_v25 = vpop.permute.xlu1 %847  ;;  %v846_v26 = vpop.permute.xlu0 %845 }
 0x382   : > { %v854_v27 = vsel %vm581_vm1, %v848_v25, 0.0  ;;  %v851_v28 = vsel %vm581_vm1, %v846_v26, 0.0 }
 0x383   : > { %855 = vadd.xlane.f32.xlu1 %v854_v27  ;;  %852 = vadd.xlane.f32.xlu0 %v851_v28 }
 0x394   : > { %880 = vrot.lane.b32.xlu1 %v1851_v29, %s2349_s28 }
 0x399   : > { %870 = vrot.lane.b32.xlu0 %v1850_v30, %s2349_s28  ;;  %s1689_s28 = scalar_lea.sflag [#allocation4], %s2613_s18 }
 0x3d4   : > { %v1070_v31 = vpop.f32.mrf.mxu1 }
 0x3d5   : > { %v1230_v53 = vsel %vm1226_vm3, %v1070_v31, -inf }
 0x3d6   : > { %v1950_v32 = vpop.f32.mrf.mxu1 }
 0x3dc   : > { %v2753_v33 = vpop.f32.mrf.mxu1 }
 0x3dd   : > { %v2755_v34 = vpop.f32.mrf.mxu0  ;;  %v1236_v56 = vsel %vm1226_vm3, %v2753_v33, -inf }
 0x3de   : > { %v1964_v35 = vpop.f32.mrf.mxu1  ;;  %v1233_v55 = vsel %vm1226_vm3, %v2755_v34, -inf }
 0x3df   : > { %v1957_v36 = vpop.f32.mrf.mxu0  ;;  %v1604_v35 = vld [vmem:[#allocation10 + $0x8] sm:$0xff] }
 0x3e0   : > { %v1603_v36 = vld [vmem:[#allocation10] sm:$0xff] }
 0x40c   : > { %v856_v37 = vpop.xlane.xlu1 %855  ;;  %v853_v38 = vpop.xlane.xlu0 %852 }
 0x40d   : > { %v858_v39 = vmul.f32 0.03125, %v856_v37  ;;  %v857_v40 = vmul.f32 0.03125, %v853_v38 }
 0x40f   : > { %v860_v41 = vadd.f32 1e-05, %v858_v39  ;;  %v859_v42 = vadd.f32 1e-05, %v857_v40 }
 0x410   : > { %v871_v44 = vpop.permute.xlu0 %870  ;;  %v881_v48 = vpop.permute.xlu1 %880 }
 0x411   : > { %2104 = vrsqrt.f32 %v860_v41 }
 0x412   : > { %2106 = vrsqrt.f32 %v859_v42 }
 0x41e   : > { %v2105_v43 = vpop.eup %2104 }
 0x41f   : > { %v2107_v45 = vpop.eup %2106  ;;  %v864_v46 = vmul.f32 %v2105_v43, %v2711_v10 }
 0x420   : > { %v863_v47 = vmul.f32 %v2107_v45, %v2714_v11 }
 0x421   : > { %v874_v49 = vmul.f32 %v871_v44, %v864_v46 }
 0x422   : > { %v873_v50 = vmul.f32 %v871_v44, %v863_v47 }
 0x423   : > { %v884_v51 = vadd.f32 %v881_v48, %v874_v49 }
 0x424   : > { %v883_v52 = vadd.f32 %v881_v48, %v873_v50 }
 0x425   : > { %919 = vrot.lane.b32.xlu0 %v884_v51, %s2347_s2  ;;  %911 = vrot.lane.b32.xlu1 %v884_v51, %s2346_s12 }
 0x429   : > { %915 = vrot.lane.b32.xlu1 %v884_v51, %s2348_s15  ;;  %909 = vrot.lane.b32.xlu0 %v883_v52, %s2346_s12  ;;  %s1702_s12 = sshll.u32 %s565_s6, 4  ;;  %s1703_s12 = int_to_ptr.vmem [resolvable:$true] %s1702_s12 }
 0x42a   : > { %s2258_s25 = scalar_lea.vmem %s1703_s12, 128  ;;  %p2265_p10 = scmp.lt.s32.totalorder %s1703_s12, %s2263_s13 }
 0x42b   : > { %p2259_p9 = scmp.ne.s32.totalorder %s1703_s12, %s2258_s25  ;;  %p2266_p1 = scmp.lt.s32.totalorder %s2264_s20, %s2258_s25 }
 0x42d   : > { %913 = vrot.lane.b32.xlu1 %v883_v52, %s2348_s15  ;;  %917 = vrot.lane.b32.xlu0 %v883_v52, %s2347_s2  ;;  %p2260_p0 = pnand %p2259_p9, %p2921_p13  ;;  %p2267_p4 = por %p2266_p1, %p2265_p10 }
 0x42f   : > { %p2261_p11 = pneg %p2260_p0 }
 0x431   : > { %1263 = vrot.lane.b32.xlu0 %v883_v52, %s2345_s24  ;;  %p2268_p6 = pnand %p2267_p4, %p2261_p11 }
 0x450   : > { %1231 = vmax.xlane.f32.xlu0 %v1230_v53 }
 0x451   : > { %1228 = vmax.xlane.f32.xlu1 %v1227_v54 }
 0x454   : > { %1234 = vmax.xlane.f32.xlu0 %v1233_v55 }
 0x458   : > { %1237 = vmax.xlane.f32.xlu0 %v1236_v56 }
 0x462   : > { %1265 = vrot.lane.b32.xlu1 %v884_v51, %s2345_s24 }
 0x497   : > { %v920_v57 = vpop.permute.xlu0 %919  ;;  %v912_v58 = vpop.permute.xlu1 %911 }
 0x498   : > { %1344 = vrot.lane.b32.xlu1 %v912_v58, %s2345_s24  ;;  %1502 = vrot.lane.b32.xlu0 %v920_v57, %s2345_s24  ;;  %v1868_v57 = vld [vmem:[%s2919_s26] ss:$0 sm:$0xff] }
 0x49b   : > { %v916_v59 = vpop.permute.xlu1 %915  ;;  %v910_v60 = vpop.permute.xlu0 %909 }
 0x49c   : > { %1423 = vrot.lane.b32.xlu1 %v916_v59, %s2345_s24 }
 0x49f   : > { %v918_v61 = vpop.permute.xlu0 %917  ;;  %v914_v62 = vpop.permute.xlu1 %913 }
 0x4a0   : > { %1342 = vrot.lane.b32.xlu1 %v910_v60, %s2345_s24  ;;  %1500 = vrot.lane.b32.xlu0 %v918_v61, %s2345_s24 }
 0x4a3   : > { %v1264_v63 = vpop.permute.xlu0 %1263 }
 0x4a4   : > { %1421 = vrot.lane.b32.xlu1 %v914_v62, %s2345_s24  ;;  %s2350_s24 = smov 8  }
 0x4d9   : > { %v1232_v1 = vpop.xlane.xlu0 %1231 }
 0x4da   : > { %v1240_v2 = vsub.f32 %v1070_v31, %v1232_v1  ;;  %v1229_v3 = vpop.xlane.xlu1 %1228 }
 0x4db   : > { %v1239_v4 = vsub.f32 %v2743_v23, %v1229_v3 }
 0x4dc   : > { %v1245_v5 = vmul.f32 1.442695, %v1240_v2 }
 0x4dd   : > { %v1243_v6 = vmul.f32 1.442695, %v1239_v4  ;;  %v1235_v7 = vpop.xlane.xlu0 %1234 }
 0x4de   : > { %2108 = vpow2.f32 %v1245_v5  ;;  %v1241_v8 = vsub.f32 %v2755_v34, %v1235_v7  ;;  %v1266_v9 = vpop.permute.xlu1 %1265  ;;  %v1605_v34 = vld [vmem:[#allocation10 + $0x10] sm:$0xff] }
 0x4df   : > { %2110 = vpow2.f32 %v1243_v6  ;;  %1966 = vmatpush3.msra.mxu1 %v1266_v9 }
 0x4e0   : > { %v1247_v10 = vmul.f32 1.442695, %v1241_v8  ;;  %1967 = vmatprep.subr.mxu1 %v2343_v0 }
 0x4e1   : > { %1968 = vmatpush3.msra.mxu1 %v1264_v63  ;;  %v1238_v11 = vpop.xlane.xlu0 %1237 }
 0x4e2   : > { %2112 = vpow2.f32 %v1247_v10  ;;  %v1242_v12 = vsub.f32 %v2753_v33, %v1238_v11  ;;  %1972 = vmatprep.subr.mxu1 %v2343_v0  ;;  %v1606_v33 = vld [vmem:[#allocation10 + $0x18] sm:$0xff] }
 0x4e4   : > { %v1249_v13 = vmul.f32 1.442695, %v1242_v12 }
 0x4e6   : > { %2114 = vpow2.f32 %v1249_v13 }
 0x4eb   : > { %v2109_v14 = vpop.eup %2108 }
 0x4ec   : > { %v2111_v15 = vpop.eup %2110  ;;  %v1254_v16 = vsel %vm1226_vm3, %v2109_v14, 0.0 }
 0x4ed   : > { %1970 = vmatmul.mubr.msk.f32.vlgmr.msra.gmra.mxu1 %vm1226_vm3, %v2111_v15  ;;  %1255 = vadd.xlane.f32.xlu1 %v1254_v16  ;;  %v1251_v21 = vsel %vm1226_vm3, %v2111_v15, 0.0 }
 0x4ee   : > { %1976 = vmatprep.mubr.msk.f32.mxu1 %vm2344_vm0, %v2343_v0 }
 0x4ef   : > { %v2113_v17 = vpop.eup %2112 }
 0x4f0   : > { %v1257_v18 = vsel %vm1226_vm3, %v2113_v17, 0.0 }
 0x4f1   : > { %1258 = vadd.xlane.f32.xlu0 %v1257_v18 }
 0x4f3   : > { %v2115_v19 = vpop.eup %2114 }
 0x4f4   : > { %v1260_v20 = vsel %vm1226_vm3, %v2115_v19, 0.0 }
 0x4f5   : > { %1261 = vadd.xlane.f32.xlu0 %v1260_v20 }
 0x4f9   : > { %1252 = vadd.xlane.f32.xlu0 %v1251_v21 }
 0x50a   : > { %v1345_v22 = vpop.permute.xlu1 %1344  ;;  %v1503_v24 = vpop.permute.xlu0 %1502 }
 0x50b   : > { %1973 = vmatpush3.msra.mxu1 %v1345_v22 }
 0x50c   : > { %1974 = vmatprep.subr.mxu1 %v2343_v0 }
 0x50e   : > { %v1424_v23 = vpop.permute.xlu1 %1423 }
 0x50f   : > { %1980 = vmatpush3.msra.mxu0 %v1424_v23 }
 0x510   : > { %1981 = vmatprep.subr.mxu0 %v2343_v0 }
 0x512   : > { %v1343_v25 = vpop.permute.xlu1 %1342  ;;  %v1501_v26 = vpop.permute.xlu0 %1500 }
 0x513   : > { %1975 = vmatpush3.msra.mxu1 %v1343_v25 }
 0x514   : > { %1977 = vmatmul.mubr.msk.f32.vlgmr.msra.gmra.mxu1 %vm1226_vm3, %v2109_v14  ;;  %1986 = vmatprep.subr.mxu1 %v2343_v0 }
 0x515   : > { %1987 = vmatpush3.msra.mxu1 %v1503_v24  ;;  %1990 = vmatprep.mubr.msk.f32.mxu1 %vm2344_vm0, %v2343_v0 }
 0x516   : > { %v1422_v27 = vpop.permute.xlu1 %1421  ;;  %1988 = vmatprep.subr.mxu1 %v2343_v0 }
 0x517   : > { %1982 = vmatpush3.msra.mxu0 %v1422_v27  ;;  %1989 = vmatpush3.msra.mxu1 %v1501_v26 }
 0x518   : > { %1984 = vmatmul.mubr.msk.f32.vlgmr.msra.gmra.mxu0 %vm1226_vm3, %v2113_v17  ;;  %1991 = vmatmul.mubr.msk.f32.vlgmr.msra.gmra.mxu1 %vm1226_vm3, %v2115_v19 }
 0x519   : > { %1993 = vmatprep.subr.mxu0 %v2343_v0  ;;  %2001 = vmatprep.mubr.msk.f32.mxu0 %vm2344_vm0, %v2343_v0 }
 0x51a   : > { %1994 = vmatpush3.msra.mxu0 %v1606_v33 }
 0x51b   : > { %1995 = vmatprep.subr.mxu0 %v2343_v0 }
 0x51c   : > { %1996 = vmatpush3.msra.mxu0 %v1605_v34 }
 0x51d   : > { %1997 = vmatprep.subr.mxu0 %v2343_v0 }
 0x51e   : > { %1998 = vmatpush3.msra.mxu0 %v1604_v35 }
 0x51f   : > { %1999 = vmatprep.subr.mxu0 %v2343_v0 }
 0x520   : > { %2000 = vmatpush3.msra.mxu0 %v1603_v36 }
 0x576   : > { %v1256_v31 = vpop.xlane.xlu1 %1255 }
 0x577   : > { %2116 = vrcp.f32 %v1256_v31 }
 0x57a   : > { %v1259_v30 = vpop.xlane.xlu0 %1258 }
 0x57b   : > { %2118 = vrcp.f32 %v1259_v30 }
 0x57e   : > { %v1262_v32 = vpop.xlane.xlu0 %1261 }
 0x57f   : > { %2120 = vrcp.f32 %v1262_v32 }
 0x582   : > { %v1253_v0 = vpop.xlane.xlu0 %1252 }
 0x583   : > { %2122 = vrcp.f32 %v1253_v0 }
 0x584   : > { %v2117_v37 = vpop.eup %2116 }
 0x588   : > { %v2119_v41 = vpop.eup %2118 }
 0x58c   : > { %v2121_v42 = vpop.eup %2120 }
 0x590   : > { %v2123_v50 = vpop.eup %2122 }
 0x5ad   : > { %v1338_v28 = vpop.f32.mrf.mxu1 }
 0x5ae   : > { %v1583_v51 = vmul.f32 %v2123_v50, %v1338_v28 }
 0x5af   : > { %v1971_v29 = vpop.f32.mrf.mxu1 }
 0x5d4   : > { %v1417_v38 = vpop.f32.mrf.mxu1 }
 0x5d5   : > { %v1584_v39 = vmul.f32 %v2117_v37, %v1417_v38 }
 0x5d6   : > { %v1978_v40 = vpop.f32.mrf.mxu1 }
 0x5d7   : > { %1588 = vrot.lane.b32.xlu1 %v1584_v39, %s2350_s24 }
 0x5d8   : > { %v1496_v43 = vpop.f32.mrf.mxu0  ;;  %v1575_v44 = vpop.f32.mrf.mxu1 }
 0x5d9   : > { %v1585_v45 = vmul.f32 %v2119_v41, %v1496_v43  ;;  %v1586_v46 = vmul.f32 %v2121_v42, %v1575_v44 }
 0x5da   : > { %v1985_v47 = vpop.f32.mrf.mxu0  ;;  %v1992_v48 = vpop.f32.mrf.mxu1 }
 0x5db   : > { %1592 = vrot.lane.b32.xlu0 %v1585_v45, %s2351_s27  ;;  %1596 = vrot.lane.b32.xlu1 %v1586_v46, %s2352_s14 }
 0x649   : > { %v1589_v49 = vpop.permute.xlu1 %1588 }
 0x64a   : > { %v1599_v52 = vsel %vm921_vm2, %v1583_v51, %v1589_v49 }
 0x64d   : > { %v1597_v53 = vpop.permute.xlu1 %1596  ;;  %v1593_v54 = vpop.permute.xlu0 %1592 }
 0x64e   : > { %v1600_v55 = vsel %vm1226_vm3, %v1599_v52, %v1593_v54 }
 0x64f   : > { %v1602_v56 = vsel %vm1601_vm4, %v1600_v55, %v1597_v53 }
 0x650   : > { %2002 = vmatmul.mubr.msk.f32.vlgmr.msra.gmra.mxu0 %vm581_vm1, %v1602_v56 }
 0x710   : > { %v1683_v58 = vpop.f32.mrf.mxu0 }
 0x711   : > { %v1684_v59 = vadd.f32 %v1868_v57, %v1683_v58 }
 0x712   : > { %v2003_v60 = vpop.f32.mrf.mxu0 }
 0x713   : > { %1687 = vst.msk [vmem:[%s565_s6] sm:$0xff] %vm581_vm1, %v1684_v59 }
 0x714   : > { %2271 = shalt.err (!%p2268_p6)
}
 0x715   : > { %s2272_s24 = scalar_lea.hbm %s2819_s19, 128  ;;  %s2276_s14 = scalar_lea.hbm %s2920_s21, 256 }
 0x716   : > { %p2273_p3 = scmp.ne.s32.totalorder %s2819_s19, %s2272_s24  ;;  %p2277_p2 = scmp.lt.s32.totalorder %s2819_s19, %s2920_s21 }
 0x717   : > { %p2278_p7 = scmp.lt.s32.totalorder %s2276_s14, %s2272_s24 }
 0x718   : > { %p2274_p5 = pnand %p2273_p3, %p2921_p13 }
 0x719   : > { %p2279_p12 = por %p2278_p7, %p2277_p2 }
 0x71a   : > { %p2275_p8 = pneg %p2274_p5 }
 0x71c   : > { %p2280_p9 = pnand %p2279_p12, %p2275_p8 }
 0x71e   : > { %2283 = shalt.err (!%p2280_p9)
}
 0x71f   : > { %2020 = dma.vmem_to_hbm [thread:$0]  (%p2921_p13), %s1703_s12, 128, %s2819_s19, %s1689_s28  }
 0x720 PF: > { %s2922_s26 = sld [smem:[#allocation17_spill]]  ;;  %p2925_p11 = scmp.ge.s32.totalorder %s2334_s16, 2 }
 0x721   : > { %s2923_s22 = sld [smem:[#allocation19_spill]] }
 0x726   : > { %s1714_s6 = sand.u32 1, %s2922_s26  }
 0x727   : > { %p2924_p0 = scmp.ne.s32.totalorder %s2923_s22, 0  ;;  %s1715_s2 = scalar_lea.sflag [#allocation4], %s1714_s6 }
 0x729   : > { %p2040_p10 = pnand %p2925_p11, %p2924_p0 }
 0x72b   : > { %p2041_p1 = pneg %p2040_p10 }
 0x72d   : > { %2317 = dma.done.wait (%p2041_p1), %s1715_s2, 128  }
 0x72e   : > { %2319 = vsyncadd (%p2041_p1), %s1715_s2, 4294967168  ;;  %s2926_s16 = sld [smem:[#allocation20_spill]]  ;;  %s2929_s29 = smov %s2326_s30 }
 0x72f   : > { %s2927_s15 = sld [smem:[#allocation18_spill]] }
 0x730   : > { %s2928_s25 = sld [smem:[#allocation21_spill]] }
 0x734   : > { %p31_p4 = scmp.ge.s32.totalorder %s2926_s16, 4  }
 0x735   : > { %s2930_s30 = smov %s2927_s15 }
 0x736   : > { %s2931_s15 = smov %s2928_s25  ;;  %33 = sbr.rel (!%p31_p4) target bundleno = 15 (0xf), region = 146 }
 0x73b   :  { %1720 = vsyncpa [#allocation3], 1 }
 0x73c   :  { %1722 = vsyncpa [#allocation3 + $0x1], 1 }
 0x73d   :  { %1723 = vsyncpa [#allocation6], 1 }
 0x73e   :  { %1725 = vsyncpa [#allocation6 + $0x1], 1 }
 0x73f   :  { %1726 = vsyncpa [#allocation9], 1 }
 0x740   :  { %1727 = vsyncpa [#allocation4], 1 }
 0x741   :  { %1729 = vsyncpa [#allocation4 + $0x1], 1 }

</bundles_post_ra>
